<compile_context>
chip_gen: v6e
topology: v6e:2x2x1
jax: 0.10.0
libtpu: 0.0.40
codegen_flags: <defaults>
</compile_context>

<pallas_src>
import functools

import jax
import jax.numpy as jnp
from jax.experimental import pallas as pl
from jax.experimental.pallas import tpu as pltpu

IN_FEATURES = 512 * 4      # 2048, fixed by nn.Linear(512 * 4, num_classes)
NUM_CLASSES = 10


def pool_fc_kernel(x_ref, w_ref, b_ref, o_ref):
    # x_ref: [TILE_B, TILE_K]  flat slab of the NCHW input (free reshape, no transpose)
    # w_ref: [TILE_K, NC_PAD]  spatially-replicated weight.T pre-scaled by 1/(H*W)
    # b_ref: [1, NC_PAD]
    # o_ref: [TILE_B, NC_PAD]  float32, VMEM-resident across the K axis (accumulator)
    k = pl.program_id(1)
    part = jnp.dot(x_ref[...], w_ref[...], preferred_element_type=jnp.float32)

    @pl.when(k == 0)
    def _():
        o_ref[...] = part + b_ref[...]

    @pl.when(k != 0)
    def _():
        o_ref[...] = o_ref[...] + part


def prepare_params(weight, bias, hw, param_dtype=jnp.float32):
    """One-time host-side parameter prep (hoisted out of the per-call path).

    Folds the average pool into the matmul: builds the spatially-replicated,
    pre-scaled weight  W_big[c*hw + s, n] = weight[n, c] / hw  so the kernel can
    consume the contiguous reshape of the NCHW activations directly.  Classes
    are zero-padded to a multiple of 128 lanes (lane-dense output stores).

    param_dtype=jnp.bfloat16 halves the weight's HBM/VMEM footprint (useful on
    v7x or for large spatial sizes) at a small accuracy cost.
    """
    nc, c = weight.shape
    nc_pad = max(128, ((nc + 127) // 128) * 128)
    w_scaled = weight.T.astype(jnp.float32) / float(hw)              # [C, nc]
    w_rep = jnp.repeat(w_scaled, hw, axis=0)                         # [C*hw, nc]
    w_big = jnp.zeros((c * hw, nc_pad), param_dtype)
    w_big = w_big.at[:, :nc].set(w_rep.astype(param_dtype))
    b_pad = jnp.zeros((1, nc_pad), jnp.float32)
    b_pad = b_pad.at[0, :nc].set(bias.astype(jnp.float32))
    return w_big, b_pad


def _pick_tiles(B, K, nc_pad, x_itemsize, w_itemsize):
    """Generation-aware tile sizing.  Returns (tile_b, tile_k, vmem_limit_bytes)."""
    try:
        phys_vmem = int(pltpu.get_tpu_info().vmem_capacity_bytes)
    except Exception:
        phys_vmem = 64 * 1024 * 1024            # conservative fallback (v7x per-TC VMEM)
    vmem_limit = int(phys_vmem * 3 // 4)        # leave headroom for compiler scratch

    # Contraction tile: multiple of 128 lanes, divides K, and keeps each weight
    # K-tile <= ~4 MiB so the double-buffered weight pair stays small on v7x.
    w_tile_cap = 4 * 1024 * 1024
    cap_k = max(128, w_tile_cap // (nc_pad * w_itemsize))
    if K <= cap_k:
        tile_k = K
    else:
        tile_k = 128
        t = 128
        while t <= cap_k:
            if K % t == 0:
                tile_k = t
            t += 128

    # Batch tile: spend the remaining VMEM on big, well-pipelined x tiles
    # (mem-bound kernels only approach the HBM roofline with 512+ row tiles).
    fixed = 2 * tile_k * nc_pad * w_itemsize + nc_pad * 4 + (4 << 20)  # w pair + bias + slack
    budget = max(vmem_limit - fixed, 2 << 20)
    per_row = 2 * tile_k * x_itemsize + 2 * nc_pad * 4   # dbl-buffered x row + out row
    tile_b = max(1, int(budget // per_row))
    tile_b = min(tile_b, B)
    if tile_b >= 8:
        tile_b = (tile_b // 8) * 8               # sublane multiple; large => MXU-friendly M
    # v7x megacore: guarantee >= 2 grid steps on the "parallel" batch axis when B allows.
    if B >= 16 and tile_b > B // 2:
        tile_b = max(8, (B // 2) // 8 * 8)
    # Prefer a tile_b that divides B (avoids a ragged, masked-store last block).
    if tile_b >= 8 and B % tile_b != 0:
        t = tile_b
        while t >= 8 and B % t != 0:
            t -= 8
        if t >= 8 and t >= tile_b // 2:
            tile_b = t
    return tile_b, tile_k, vmem_limit


@functools.partial(jax.jit, static_argnames=("num_classes",))
def simple_classifier_fwd(x, w_prep, b_prep, num_classes=NUM_CLASSES):
    """x: [B, C, H, W] (NCHW, as in the PyTorch module) -> [B, num_classes]."""
    # TODO(synk): the optional `backend` feature extractor (None in the module) is
    # treated as identity; only avgpool + flatten + fc are fused here.
    B, C, H, W = x.shape
    K = C * H * W
    nc_pad = w_prep.shape[1]
    assert w_prep.shape[0] == K, "w_prep must be prepared for this (C, H, W)"
    assert num_classes <= nc_pad, "num_classes exceeds padded class dim"

    # Free, contiguous reshape -- no HBM transpose of x; the 1/(H*W) scale and the
    # spatial sum live in the replicated weight.
    x_flat = x.reshape(B, K)

    tile_b, tile_k, vmem_limit = _pick_tiles(
        B, K, nc_pad, x_flat.dtype.itemsize, w_prep.dtype.itemsize)

    out_padded = pl.pallas_call(
        pool_fc_kernel,
        out_shape=jax.ShapeDtypeStruct((B, nc_pad), jnp.float32),
        grid=(pl.cdiv(B, tile_b), K // tile_k),
        in_specs=[
            pl.BlockSpec((tile_b, tile_k), lambda i, k: (i, k)),   # batch- & K-tiled x
            pl.BlockSpec((tile_k, nc_pad), lambda i, k: (k, 0)),   # weight K-tile
            pl.BlockSpec((1, nc_pad), lambda i, k: (0, 0)),        # bias, VMEM-resident
        ],
        out_specs=pl.BlockSpec((tile_b, nc_pad), lambda i, k: (i, 0)),
        compiler_params=pltpu.CompilerParams(
            dimension_semantics=("parallel", "arbitrary"),
            vmem_limit_bytes=vmem_limit),
    )(x_flat, w_prep, b_prep)

    return out_padded[:, :num_classes]


if __name__ == "__main__":
    key = jax.random.PRNGKey(0)
    kx, kw, kb = jax.random.split(key, 3)

    # Small example consistent with the module: B=2, C=512*4=2048, spatial 4x4.
    B, H, W = 2, 4, 4
    x = jax.random.normal(kx, (B, IN_FEATURES, H, W), dtype=jnp.float32)

    # Deterministic parameter init (shapes from nn.Linear(2048, num_classes)).
    bound = 1.0 / (IN_FEATURES ** 0.5)
    weight = jax.random.uniform(kw, (NUM_CLASSES, IN_FEATURES),
                                minval=-bound, maxval=bound, dtype=jnp.float32)
    bias = jax.random.uniform(kb, (NUM_CLASSES,),
                              minval=-bound, maxval=bound, dtype=jnp.float32)

    # One-time parameter prep, outside the per-call path.
    w_prep, b_prep = prepare_params(weight, bias, H * W)

    out = simple_classifier_fwd(x, w_prep, b_prep)
    out = jax.block_until_ready(out)

    # Pure-JAX reference: avgpool -> flatten -> linear.
    ref = jnp.mean(x, axis=(2, 3)) @ weight.T + bias
    assert out.shape == (B, NUM_CLASSES)
    # Tolerance allows for the MXU evaluating the f32 contraction (K = C*H*W = 32768)
    # with bf16 input passes under default precision; well above any such rounding,
    # far below any real layout/scale bug.
    assert jnp.allclose(out, ref, atol=2e-3, rtol=1e-2), (
        float(jnp.max(jnp.abs(out - ref))))

    print("KERNEL_OK")
</pallas_src>

<mosaic_0001>
module attributes {stable_mosaic.version = 11 : i64} {
  func.func @pool_fc_kernel(%arg0: i32, %arg1: i32, %arg2: memref<2x8192xf32, #tpu.memory_space<vmem>>, %arg3: memref<8192x128xf32, #tpu.memory_space<vmem>>, %arg4: memref<1x128xf32, #tpu.memory_space<vmem>>, %arg5: memref<2x128xf32, #tpu.memory_space<vmem>>) attributes {dimension_semantics = [#tpu.dimension_semantics<parallel>, #tpu.dimension_semantics<arbitrary>], iteration_bounds = array<i64: 1, 4>, scalar_prefetch = 0 : i64, scratch_operands = 0 : i64, tpu.core_type = #tpu.core_type<tc>, window_params = [{transform_indices = @transform_0, window_bounds = array<i64: 2, 8192>}, {transform_indices = @transform_1, window_bounds = array<i64: 8192, 128>}, {pipeline_mode = #tpu.pipeline_mode<synchronous>, transform_indices = @transform_2, window_bounds = array<i64: 1, 128>}, {transform_indices = @transform_3, window_bounds = array<i64: 2, 128>}]} {
    %c0 = arith.constant 0 : index
    %c0_0 = arith.constant 0 : index
    %0 = vector.load %arg2[%c0, %c0_0] : memref<2x8192xf32, #tpu.memory_space<vmem>>, vector<2x8192xf32>
    %c0_1 = arith.constant 0 : index
    %c0_2 = arith.constant 0 : index
    %1 = vector.load %arg3[%c0_1, %c0_2] : memref<8192x128xf32, #tpu.memory_space<vmem>>, vector<8192x128xf32>
    %cst = arith.constant dense<0.000000e+00> : vector<2x128xf32>
    %2 = tpu.matmul %0, %1, %cst {dimension_numbers = #tpu.dot_dimension_numbers<[1], [0], [0], [1], [0, 0, 1, 1], [], []>} : vector<2x8192xf32>, vector<8192x128xf32>, vector<2x128xf32> -> vector<2x128xf32>
    %c0_i32 = arith.constant 0 : i32
    %3 = arith.cmpi eq, %arg1, %c0_i32 : i32
    %4 = arith.extui %3 : i1 to i32
    %c0_i32_3 = arith.constant 0 : i32
    %5 = arith.cmpi ne, %4, %c0_i32_3 : i32
    scf.if %5 {
      %c0_6 = arith.constant 0 : index
      %c0_7 = arith.constant 0 : index
      %9 = vector.load %arg4[%c0_6, %c0_7] : memref<1x128xf32, #tpu.memory_space<vmem>>, vector<1x128xf32>
      %10 = vector.broadcast %9 : vector<1x128xf32> to vector<2x128xf32>
      %11 = arith.addf %2, %10 : vector<2x128xf32>
      %c0_8 = arith.constant 0 : index
      %c0_9 = arith.constant 0 : index
      %12 = vector.load %arg5[%c0_8, %c0_9] : memref<2x128xf32, #tpu.memory_space<vmem>>, vector<2x128xf32>
      tpu.vector_store %arg5[%c0_8, %c0_9], %11 {strides = array<i32>} : memref<2x128xf32, #tpu.memory_space<vmem>>, vector<2x128xf32>,
    } else {
    }
    %c0_i32_4 = arith.constant 0 : i32
    %6 = arith.cmpi ne, %arg1, %c0_i32_4 : i32
    %7 = arith.extui %6 : i1 to i32
    %c0_i32_5 = arith.constant 0 : i32
    %8 = arith.cmpi ne, %7, %c0_i32_5 : i32
    scf.if %8 {
      %c0_6 = arith.constant 0 : index
      %c0_7 = arith.constant 0 : index
      %9 = vector.load %arg5[%c0_6, %c0_7] : memref<2x128xf32, #tpu.memory_space<vmem>>, vector<2x128xf32>
      %10 = arith.addf %9, %2 : vector<2x128xf32>
      %c0_8 = arith.constant 0 : index
      %c0_9 = arith.constant 0 : index
      %11 = vector.load %arg5[%c0_8, %c0_9] : memref<2x128xf32, #tpu.memory_space<vmem>>, vector<2x128xf32>
      tpu.vector_store %arg5[%c0_8, %c0_9], %10 {strides = array<i32>} : memref<2x128xf32, #tpu.memory_space<vmem>>, vector<2x128xf32>,
    } else {
    }
    return
  }
  func.func @transform_0(%arg0: i32, %arg1: i32) -> (i32, i32) {
    %c0_i32 = arith.constant 0 : i32
    return %arg0, %arg1 : i32, i32
  }
  func.func @transform_1(%arg0: i32, %arg1: i32) -> (i32, i32) {
    %c0_i32 = arith.constant 0 : i32
    %c0_i32_0 = arith.constant 0 : i32
    return %arg1, %c0_i32 : i32, i32
  }
  func.func @transform_2(%arg0: i32, %arg1: i32) -> (i32, i32) {
    %c0_i32 = arith.constant 0 : i32
    %c0_i32_0 = arith.constant 0 : i32
    %c0_i32_1 = arith.constant 0 : i32
    return %c0_i32, %c0_i32_0 : i32, i32
  }
  func.func @transform_3(%arg0: i32, %arg1: i32) -> (i32, i32) {
    %c0_i32 = arith.constant 0 : i32
    %c0_i32_0 = arith.constant 0 : i32
    return %arg0, %c0_i32 : i32, i32
  }
}

</mosaic_0001>

<bundles_post_ra>
// kernel: simple_classifier_fwd.1
= control target key start
LH: loop header
LB: loop body
LE: loop exit
PB: predicated region body
PF: predicated region fallthrough
CT: control target
= control target key end

     0   :  { %8 = vsyncpa [#allocation3], 0  ;;  %s5198_s12 = smov 0   ;;  %s5200_s13 = smov 0   ;;  %s6349_s0 = inlined_call_operand.vmem [shape: f32[2,32768], index: 0, kind: input, shape index: {}]   ;;  %s6350_s1 = inlined_call_operand.vmem [shape: f32[32768,128], index: 1, kind: input, shape index: {}]   ;;  %s6351_s2 = inlined_call_operand.vmem [shape: f32[1,128], index: 2, kind: input, shape index: {}]   ;;  %s6352_s3 = inlined_call_operand.hbm [shape: f32[2,128], index: 3, kind: output, shape index: {}]  }
   0x1   :  { %s5202_s14 = smov 0  }
   0x2 LB: > { %s3941_s15 = sadd.s32 4294967295, %s5174_s14   ;;  %s23_s16 = sadd.s32 1, %s5170_s13  ;;  %s5174_s14 = sphi %s5202_s14, %s14_s14   ;;  %s5170_s13 = sphi %s5200_s13, %s6356_s13   ;;  %s5166_s12 = sphi %s5198_s12, %s6355_s12  }
   0x3   : > { %p24_p0 = scmp.ge.s32.totalorder %s23_s16, 4  ;;  %p3944_p1 = scmp.ge.s32.totalorder %s5174_s14, 1 }
   0x4   : > { %p168_p2 = scmp.lt.s32.totalorder %s5174_s14, 5 }
   0x5   : > { %s6358_s16 = smov (%p24_p0, %s23_s16), 0 }
   0x6   : > { %p169_p3 = pnand %p3944_p1, %p168_p2 }
   0x7   : > { %s3947_s17 = sshll.u32 (!%p169_p3), %s5166_s12, 10  ;;  %s3945_s22 = sshll.u32 (!%p169_p3), %s5166_s12, 6 }
   0x8   : > { %172 = sbr.rel (%p169_p3) target bundleno = 791 (0x317), region = 32  ;;  %p207_p4 = scmp.lt.s32.totalorder (!%p169_p3), %s3947_s17, 4095 }
   0x9   : > { %p5248_p5 = scmp.lt.s32.totalorder (!%p169_p3), %s3945_s22, 255  ;;  %p3949_p6 = scmp.ne.s32.totalorder (!%p169_p3), %s5166_s12, 0 }
   0xd   : > { %s6360_s17 = smov (!%p207_p4, %s3947_s17), 4095  ;;  %s6362_s22 = smov (!%p5248_p5, %s3945_s22), 255  ;;  %v5176_v30 = vmov 1983009808   ;;  %v1272_v32 = vlaneseq }
   0xe   : > { %s3948_s18 = sshll.u32 %s6360_s17, 3  ;;  %v1270_v31 = vunpack.c.l.s4 %v5176_v30  ;;  %s3946_s24 = sshll.u32 %s6362_s22, 1 }
   0xf   : > { %s5223_s21 = scalar_lea.vmem %s6350_s1, %s3948_s18  ;;  %v1273_v42 = vshrl.u32 %v1272_v32, 7  ;;  %s5284_s27 = scalar_lea.vmem %s6349_s0, %s3946_s24 }
  0x10   : > { %v259_v0 = vld [vmem:[%s5223_s21 + $0xf8] sm:$0xff]  ;;  %v258_v4 = vld [vmem:[%s5223_s21 + $0xf0] sm:$0xff]  ;;  %v257_v8 = vld [vmem:[%s5223_s21 + $0xe8] sm:$0xff]  ;;  %v1271_v41 = vunpack.c.0.s8 %v1270_v31 }
  0x11   : > { %v291_v1 = vld [vmem:[%s5223_s21 + $0x1f8] sm:$0xff]  ;;  %3956 = vmatprep.subr.mxu0 %v259_v0  ;;  %v290_v5 = vld [vmem:[%s5223_s21 + $0x1f0] sm:$0xff]  ;;  %v289_v9 = vld [vmem:[%s5223_s21 + $0x1e8] sm:$0xff] }
  0x12   : > { %v243_v2 = vld [vmem:[%s5223_s21 + $0x78] sm:$0xff]  ;;  %3991 = vmatprep.subr.mxu1 %v291_v1  ;;  %v242_v6 = vld [vmem:[%s5223_s21 + $0x70] sm:$0xff]  ;;  %v241_v10 = vld [vmem:[%s5223_s21 + $0x68] sm:$0xff]  ;;  %v5290_v51 = vsub.s32 %v1271_v41, %v1273_v42 }
  0x13   : > { %v275_v3 = vld [vmem:[%s5223_s21 + $0x178] sm:$0xff]  ;;  %3957 = vmatpush3.msra.mxu0 %v243_v2  ;;  %v274_v7 = vld [vmem:[%s5223_s21 + $0x170] sm:$0xff]  ;;  %v273_v11 = vld [vmem:[%s5223_s21 + $0x168] sm:$0xff] }
  0x14   : > { %3992 = vmatpush3.msra.mxu1 %v275_v3  ;;  %3958 = vmatprep.subr.mxu0 %v258_v4  ;;  %v256_v12 = vld [vmem:[%s5223_s21 + $0xe0] sm:$0xff]  ;;  %v255_v16 = vld [vmem:[%s5223_s21 + $0xd8] sm:$0xff]  ;;  %v254_v20 = vld [vmem:[%s5223_s21 + $0xd0] sm:$0xff] }
  0x15   : > { %3993 = vmatprep.subr.mxu1 %v290_v5  ;;  %3959 = vmatpush3.msra.mxu0 %v242_v6  ;;  %v288_v13 = vld [vmem:[%s5223_s21 + $0x1e0] sm:$0xff]  ;;  %v287_v17 = vld [vmem:[%s5223_s21 + $0x1d8] sm:$0xff]  ;;  %v286_v21 = vld [vmem:[%s5223_s21 + $0x1d0] sm:$0xff] }
  0x16   : > { %3994 = vmatpush3.msra.mxu1 %v274_v7  ;;  %3960 = vmatprep.subr.mxu0 %v257_v8  ;;  %v240_v14 = vld [vmem:[%s5223_s21 + $0x60] sm:$0xff]  ;;  %v239_v18 = vld [vmem:[%s5223_s21 + $0x58] sm:$0xff]  ;;  %v238_v22 = vld [vmem:[%s5223_s21 + $0x50] sm:$0xff] }
  0x17   : > { %3995 = vmatprep.subr.mxu1 %v289_v9  ;;  %v272_v15 = vld [vmem:[%s5223_s21 + $0x160] sm:$0xff]  ;;  %3961 = vmatpush3.msra.mxu0 %v241_v10  ;;  %v271_v19 = vld [vmem:[%s5223_s21 + $0x158] sm:$0xff]  ;;  %v270_v23 = vld [vmem:[%s5223_s21 + $0x150] sm:$0xff] }
  0x18   : > { %3996 = vmatpush3.msra.mxu1 %v273_v11  ;;  %3962 = vmatprep.subr.mxu0 %v256_v12  ;;  %v253_v24 = vld [vmem:[%s5223_s21 + $0xc8] sm:$0xff]  ;;  %v252_v28 = vld [vmem:[%s5223_s21 + $0xc0] sm:$0xff]  ;;  %v251_v35 = vld [vmem:[%s5223_s21 + $0xb8] sm:$0xff] }
  0x19   : > { %3997 = vmatprep.subr.mxu1 %v288_v13  ;;  %3963 = vmatpush3.msra.mxu0 %v240_v14  ;;  %v285_v25 = vld [vmem:[%s5223_s21 + $0x1c8] sm:$0xff]  ;;  %v284_v29 = vld [vmem:[%s5223_s21 + $0x1c0] sm:$0xff]  ;;  %v283_v36 = vld [vmem:[%s5223_s21 + $0x1b8] sm:$0xff] }
  0x1a   : > { %3998 = vmatpush3.msra.mxu1 %v272_v15  ;;  %3964 = vmatprep.subr.mxu0 %v255_v16  ;;  %v237_v26 = vld [vmem:[%s5223_s21 + $0x48] sm:$0xff]  ;;  %v236_v33 = vld [vmem:[%s5223_s21 + $0x40] sm:$0xff]  ;;  %v235_v37 = vld [vmem:[%s5223_s21 + $0x38] sm:$0xff] }
  0x1b   : > { %3999 = vmatprep.subr.mxu1 %v287_v17  ;;  %3965 = vmatpush3.msra.mxu0 %v239_v18  ;;  %v269_v27 = vld [vmem:[%s5223_s21 + $0x148] sm:$0xff]  ;;  %v268_v34 = vld [vmem:[%s5223_s21 + $0x140] sm:$0xff]  ;;  %v267_v38 = vld [vmem:[%s5223_s21 + $0x138] sm:$0xff] }
  0x1c   : > { %4000 = vmatpush3.msra.mxu1 %v271_v19  ;;  %3966 = vmatprep.subr.mxu0 %v254_v20  ;;  %v250_v39 = vld [vmem:[%s5223_s21 + $0xb0] sm:$0xff]  ;;  %v249_v45 = vld [vmem:[%s5223_s21 + $0xa8] sm:$0xff]  ;;  %v248_v49 = vld [vmem:[%s5223_s21 + $0xa0] sm:$0xff] }
  0x1d   : > { %4001 = vmatprep.subr.mxu1 %v286_v21  ;;  %3967 = vmatpush3.msra.mxu0 %v238_v22  ;;  %v282_v40 = vld [vmem:[%s5223_s21 + $0x1b0] sm:$0xff]  ;;  %v281_v46 = vld [vmem:[%s5223_s21 + $0x1a8] sm:$0xff]  ;;  %v280_v50 = vld [vmem:[%s5223_s21 + $0x1a0] sm:$0xff] }
  0x1e   : > { %4002 = vmatpush3.msra.mxu1 %v270_v23  ;;  %3968 = vmatprep.subr.mxu0 %v253_v24  ;;  %v234_v43 = vld [vmem:[%s5223_s21 + $0x30] sm:$0xff]  ;;  %v233_v47 = vld [vmem:[%s5223_s21 + $0x28] sm:$0xff]  ;;  %v232_v52 = vld [vmem:[%s5223_s21 + $0x20] sm:$0xff] }
  0x1f   : > { %4003 = vmatprep.subr.mxu1 %v285_v25  ;;  %3969 = vmatpush3.msra.mxu0 %v237_v26  ;;  %v266_v44 = vld [vmem:[%s5223_s21 + $0x130] sm:$0xff]  ;;  %v265_v48 = vld [vmem:[%s5223_s21 + $0x128] sm:$0xff]  ;;  %v264_v53 = vld [vmem:[%s5223_s21 + $0x120] sm:$0xff] }
  0x20   : > { %4004 = vmatpush3.msra.mxu1 %v269_v27  ;;  %3970 = vmatprep.subr.mxu0 %v252_v28  ;;  %v212_v54 = vld [vmem:[%s5284_s27] sm:$0xff]  ;;  %v247_v55 = vld [vmem:[%s5223_s21 + $0x98] sm:$0xff]  ;;  %v246_v60 = vld [vmem:[%s5223_s21 + $0x90] sm:$0xff] }
  0x21   : > { %4005 = vmatprep.subr.mxu1 %v284_v29  ;;  %3971 = vmatpush3.msra.mxu0 %v236_v33  ;;  %v279_v56 = vld [vmem:[%s5223_s21 + $0x198] sm:$0xff]  ;;  %v1268_v57 = vcombine.high %v212_v54, %v212_v54  ;;  %v278_v61 = vld [vmem:[%s5223_s21 + $0x190] sm:$0xff]  ;;  %v1275_v62 = vrot.slane %v212_v54, %v5290_v51  ;;  %v245_v2 = vld [vmem:[%s5223_s21 + $0x88] sm:$0xff] }
  0x22   : > { %4006 = vmatpush3.msra.mxu1 %v268_v34  ;;  %3972 = vmatprep.subr.mxu0 %v251_v35  ;;  %v231_v58 = vld [vmem:[%s5223_s21 + $0x18] sm:$0xff]  ;;  %v230_v63 = vld [vmem:[%s5223_s21 + $0x10] sm:$0xff]  ;;  %v277_v3 = vld [vmem:[%s5223_s21 + $0x188] sm:$0xff] }
  0x23   : > { %4007 = vmatprep.subr.mxu1 %v283_v36  ;;  %3973 = vmatpush3.msra.mxu0 %v235_v37  ;;  %v263_v59 = vld [vmem:[%s5223_s21 + $0x118] sm:$0xff]  ;;  %v262_v0 = vld [vmem:[%s5223_s21 + $0x110] sm:$0xff]  ;;  %v1282_v1 = vrot.slane %v1268_v57, %v5290_v51  ;;  %v229_v4 = vld [vmem:[%s5223_s21 + $0x8] sm:$0xff]  ;;  %v1283_v8 = vcombine.high %v1275_v62, %v1275_v62 }
  0x24   : > { %4008 = vmatpush3.msra.mxu1 %v267_v38  ;;  %3974 = vmatprep.subr.mxu0 %v250_v39  ;;  %v261_v5 = vld [vmem:[%s5223_s21 + $0x108] sm:$0xff]  ;;  %v244_v6 = vld [vmem:[%s5223_s21 + $0x80] sm:$0xff]  ;;  %v323_v12 = vld [vmem:[%s5223_s21 + $0x2f8] sm:$0xff] }
  0x25   : > { %4009 = vmatprep.subr.mxu1 %v282_v40  ;;  %3975 = vmatpush3.msra.mxu0 %v234_v43  ;;  %v276_v7 = vld [vmem:[%s5223_s21 + $0x180] sm:$0xff]  ;;  %v1284_v10 = vcombine.high %v1282_v1, %v1282_v1  ;;  %v355_v13 = vld [vmem:[%s5223_s21 + $0x3f8] sm:$0xff]  ;;  %v322_v16 = vld [vmem:[%s5223_s21 + $0x2f0] sm:$0xff] }
  0x26   : > { %4010 = vmatpush3.msra.mxu1 %v266_v44  ;;  %3976 = vmatprep.subr.mxu0 %v249_v45  ;;  %v228_v9 = vld [vmem:[%s5223_s21] sm:$0xff]  ;;  %v307_v14 = vld [vmem:[%s5223_s21 + $0x278] sm:$0xff]  ;;  %v354_v17 = vld [vmem:[%s5223_s21 + $0x3f0] sm:$0xff] }
  0x27   : > { %4011 = vmatprep.subr.mxu1 %v281_v46  ;;  %3977 = vmatpush3.msra.mxu0 %v233_v47  ;;  %v260_v11 = vld [vmem:[%s5223_s21 + $0x100] sm:$0xff]  ;;  %v339_v15 = vld [vmem:[%s5223_s21 + $0x378] sm:$0xff]  ;;  %v306_v18 = vld [vmem:[%s5223_s21 + $0x270] sm:$0xff] }
  0x28   : > { %4012 = vmatpush3.msra.mxu1 %v265_v48  ;;  %3978 = vmatprep.subr.mxu0 %v248_v49  ;;  %v338_v19 = vld [vmem:[%s5223_s21 + $0x370] sm:$0xff]  ;;  %v321_v20 = vld [vmem:[%s5223_s21 + $0x2e8] sm:$0xff]  ;;  %v320_v24 = vld [vmem:[%s5223_s21 + $0x2e0] sm:$0xff] }
  0x29   : > { %4013 = vmatprep.subr.mxu1 %v280_v50  ;;  %3979 = vmatpush3.msra.mxu0 %v232_v52  ;;  %v353_v21 = vld [vmem:[%s5223_s21 + $0x3e8] sm:$0xff]  ;;  %v352_v25 = vld [vmem:[%s5223_s21 + $0x3e0] sm:$0xff]  ;;  %v319_v28 = vld [vmem:[%s5223_s21 + $0x2d8] sm:$0xff] }
  0x2a   : > { %4014 = vmatpush3.msra.mxu1 %v264_v53  ;;  %3980 = vmatprep.subr.mxu0 %v247_v55  ;;  %v305_v22 = vld [vmem:[%s5223_s21 + $0x268] sm:$0xff]  ;;  %v304_v26 = vld [vmem:[%s5223_s21 + $0x260] sm:$0xff]  ;;  %v351_v29 = vld [vmem:[%s5223_s21 + $0x3d8] sm:$0xff] }
  0x2b   : > { %4015 = vmatprep.subr.mxu1 %v279_v56  ;;  %3981 = vmatpush3.msra.mxu0 %v231_v58  ;;  %v337_v23 = vld [vmem:[%s5223_s21 + $0x368] sm:$0xff]  ;;  %v336_v27 = vld [vmem:[%s5223_s21 + $0x360] sm:$0xff]  ;;  %v303_v30 = vld [vmem:[%s5223_s21 + $0x258] sm:$0xff] }
  0x2c   : > { %4016 = vmatpush3.msra.mxu1 %v263_v59  ;;  %3982 = vmatprep.subr.mxu0 %v246_v60  ;;  %v335_v31 = vld [vmem:[%s5223_s21 + $0x358] sm:$0xff]  ;;  %v318_v32 = vld [vmem:[%s5223_s21 + $0x2d0] sm:$0xff]  ;;  %v317_v36 = vld [vmem:[%s5223_s21 + $0x2c8] sm:$0xff] }
  0x2d   : > { %4017 = vmatprep.subr.mxu1 %v278_v61  ;;  %3983 = vmatpush3.msra.mxu0 %v230_v63  ;;  %v350_v33 = vld [vmem:[%s5223_s21 + $0x3d0] sm:$0xff]  ;;  %v349_v37 = vld [vmem:[%s5223_s21 + $0x3c8] sm:$0xff]  ;;  %v316_v40 = vld [vmem:[%s5223_s21 + $0x2c0] sm:$0xff] }
  0x2e   : > { %4018 = vmatpush3.msra.mxu1 %v262_v0  ;;  %3984 = vmatprep.subr.mxu0 %v245_v2  ;;  %v302_v34 = vld [vmem:[%s5223_s21 + $0x250] sm:$0xff]  ;;  %v301_v38 = vld [vmem:[%s5223_s21 + $0x248] sm:$0xff]  ;;  %v348_v41 = vld [vmem:[%s5223_s21 + $0x3c0] sm:$0xff] }
  0x2f   : > { %4019 = vmatprep.subr.mxu1 %v277_v3  ;;  %3985 = vmatpush3.msra.mxu0 %v229_v4  ;;  %v334_v35 = vld [vmem:[%s5223_s21 + $0x350] sm:$0xff]  ;;  %v333_v39 = vld [vmem:[%s5223_s21 + $0x348] sm:$0xff]  ;;  %v300_v42 = vld [vmem:[%s5223_s21 + $0x240] sm:$0xff] }
  0x30   : > { %4020 = vmatpush3.msra.mxu1 %v261_v5  ;;  %3986 = vmatprep.subr.mxu0 %v244_v6  ;;  %v332_v43 = vld [vmem:[%s5223_s21 + $0x340] sm:$0xff]  ;;  %v315_v44 = vld [vmem:[%s5223_s21 + $0x2b8] sm:$0xff]  ;;  %v314_v48 = vld [vmem:[%s5223_s21 + $0x2b0] sm:$0xff] }
  0x31   : > { %4021 = vmatprep.subr.mxu1 %v276_v7  ;;  %3987 = vmatpush3.msra.mxu0 %v228_v9  ;;  %v347_v45 = vld [vmem:[%s5223_s21 + $0x3b8] sm:$0xff]  ;;  %v346_v49 = vld [vmem:[%s5223_s21 + $0x3b0] sm:$0xff]  ;;  %v313_v53 = vld [vmem:[%s5223_s21 + $0x2a8] sm:$0xff] }
  0x32   : > { %1668 = vmatprep.mubr.f32.mxu0 %v1283_v8  ;;  %4022 = vmatpush3.msra.mxu1 %v260_v11  ;;  %v299_v46 = vld [vmem:[%s5223_s21 + $0x238] sm:$0xff]  ;;  %v298_v50 = vld [vmem:[%s5223_s21 + $0x230] sm:$0xff]  ;;  %v345_v54 = vld [vmem:[%s5223_s21 + $0x3a8] sm:$0xff] }
  0x33   : > { %1738 = vmatprep.mubr.f32.mxu1 %v1284_v10  ;;  %1669 = vmatmul.mubr.f32.vlgmr.msra.gmra.mxu0 %v1275_v62  ;;  %v331_v47 = vld [vmem:[%s5223_s21 + $0x338] sm:$0xff]  ;;  %v330_v52 = vld [vmem:[%s5223_s21 + $0x330] sm:$0xff]  ;;  %v297_v55 = vld [vmem:[%s5223_s21 + $0x228] sm:$0xff] }
  0x34   : > { %1739 = vmatmul.mubr.f32.vlgmr.msra.gmra.mxu1 %v1282_v1  ;;  %4026 = vmatprep.subr.mxu0 %v323_v12  ;;  %v329_v56 = vld [vmem:[%s5223_s21 + $0x328] sm:$0xff]  ;;  %v312_v58 = vld [vmem:[%s5223_s21 + $0x2a0] sm:$0xff]  ;;  %v311_v62 = vld [vmem:[%s5223_s21 + $0x298] sm:$0xff] }
  0x35   : > { %4061 = vmatprep.subr.mxu1 %v355_v13  ;;  %4027 = vmatpush3.msra.mxu0 %v307_v14  ;;  %v213_v57 = vld [vmem:[%s5284_s27 + $0x8] sm:$0xff]  ;;  %v344_v59 = vld [vmem:[%s5223_s21 + $0x3a0] sm:$0xff]  ;;  %v343_v63 = vld [vmem:[%s5223_s21 + $0x398] sm:$0xff] }
  0x36   : > { %4062 = vmatpush3.msra.mxu1 %v339_v15  ;;  %4028 = vmatprep.subr.mxu0 %v322_v16  ;;  %v296_v60 = vld [vmem:[%s5223_s21 + $0x220] sm:$0xff]  ;;  %v1285_v0 = vcombine.high %v213_v57, %v213_v57  ;;  %v295_v1 = vld [vmem:[%s5223_s21 + $0x218] sm:$0xff]  ;;  %v310_v3 = vld [vmem:[%s5223_s21 + $0x290] sm:$0xff]  ;;  %v1292_v5 = vrot.slane %v213_v57, %v5290_v51 }
  0x37   : > { %4063 = vmatprep.subr.mxu1 %v354_v17  ;;  %4029 = vmatpush3.msra.mxu0 %v306_v18  ;;  %v328_v61 = vld [vmem:[%s5223_s21 + $0x320] sm:$0xff]  ;;  %v327_v2 = vld [vmem:[%s5223_s21 + $0x318] sm:$0xff]  ;;  %v342_v4 = vld [vmem:[%s5223_s21 + $0x390] sm:$0xff] }
  0x38   : > { %4064 = vmatpush3.msra.mxu1 %v338_v19  ;;  %4030 = vmatprep.subr.mxu0 %v321_v20  ;;  %v294_v6 = vld [vmem:[%s5223_s21 + $0x210] sm:$0xff]  ;;  %v309_v8 = vld [vmem:[%s5223_s21 + $0x288] sm:$0xff]  ;;  %v1299_v10 = vrot.slane %v1285_v0, %v5290_v51  ;;  %v308_v13 = vld [vmem:[%s5223_s21 + $0x280] sm:$0xff]  ;;  %v1300_v15 = vcombine.high %v1292_v5, %v1292_v5 }
  0x39   : > { %4065 = vmatprep.subr.mxu1 %v353_v21  ;;  %4031 = vmatpush3.msra.mxu0 %v305_v22  ;;  %v326_v7 = vld [vmem:[%s5223_s21 + $0x310] sm:$0xff]  ;;  %v341_v9 = vld [vmem:[%s5223_s21 + $0x388] sm:$0xff]  ;;  %v340_v14 = vld [vmem:[%s5223_s21 + $0x380] sm:$0xff] }
  0x3a   : > { %4066 = vmatpush3.msra.mxu1 %v337_v23  ;;  %4032 = vmatprep.subr.mxu0 %v320_v24  ;;  %v293_v11 = vld [vmem:[%s5223_s21 + $0x208] sm:$0xff]  ;;  %v292_v16 = vld [vmem:[%s5223_s21 + $0x200] sm:$0xff]  ;;  %v1301_v18 = vcombine.high %v1299_v10, %v1299_v10  ;;  %v387_v19 = vld [vmem:[%s5223_s21 + $0x4f8] sm:$0xff] }
  0x3b   : > { %4067 = vmatprep.subr.mxu1 %v352_v25  ;;  %4033 = vmatpush3.msra.mxu0 %v304_v26  ;;  %v325_v12 = vld [vmem:[%s5223_s21 + $0x308] sm:$0xff]  ;;  %v324_v17 = vld [vmem:[%s5223_s21 + $0x300] sm:$0xff]  ;;  %v419_v20 = vld [vmem:[%s5223_s21 + $0x5f8] sm:$0xff] }
  0x3c   : > { %4068 = vmatpush3.msra.mxu1 %v336_v27  ;;  %4034 = vmatprep.subr.mxu0 %v319_v28  ;;  %v371_v21 = vld [vmem:[%s5223_s21 + $0x478] sm:$0xff]  ;;  %v386_v23 = vld [vmem:[%s5223_s21 + $0x4f0] sm:$0xff]  ;;  %v385_v27 = vld [vmem:[%s5223_s21 + $0x4e8] sm:$0xff] }
  0x3d   : > { %4069 = vmatprep.subr.mxu1 %v351_v29  ;;  %4035 = vmatpush3.msra.mxu0 %v303_v30  ;;  %v403_v22 = vld [vmem:[%s5223_s21 + $0x578] sm:$0xff]  ;;  %v418_v24 = vld [vmem:[%s5223_s21 + $0x5f0] sm:$0xff]  ;;  %v417_v28 = vld [vmem:[%s5223_s21 + $0x5e8] sm:$0xff] }
  0x3e   : > { %4070 = vmatpush3.msra.mxu1 %v335_v31  ;;  %4036 = vmatprep.subr.mxu0 %v318_v32  ;;  %v370_v25 = vld [vmem:[%s5223_s21 + $0x470] sm:$0xff]  ;;  %v369_v29 = vld [vmem:[%s5223_s21 + $0x468] sm:$0xff]  ;;  %v384_v31 = vld [vmem:[%s5223_s21 + $0x4e0] sm:$0xff] }
  0x3f   : > { %4071 = vmatprep.subr.mxu1 %v350_v33  ;;  %4037 = vmatpush3.msra.mxu0 %v302_v34  ;;  %v402_v26 = vld [vmem:[%s5223_s21 + $0x570] sm:$0xff]  ;;  %v401_v30 = vld [vmem:[%s5223_s21 + $0x568] sm:$0xff]  ;;  %v416_v32 = vld [vmem:[%s5223_s21 + $0x5e0] sm:$0xff] }
  0x40   : > { %4072 = vmatpush3.msra.mxu1 %v334_v35  ;;  %4038 = vmatprep.subr.mxu0 %v317_v36  ;;  %v368_v33 = vld [vmem:[%s5223_s21 + $0x460] sm:$0xff]  ;;  %v383_v35 = vld [vmem:[%s5223_s21 + $0x4d8] sm:$0xff]  ;;  %v410_v57 = vld [vmem:[%s5223_s21 + $0x5b0] sm:$0xff] }
  0x41   : > { %4073 = vmatprep.subr.mxu1 %v349_v37  ;;  %4039 = vmatpush3.msra.mxu0 %v301_v38  ;;  %v400_v34 = vld [vmem:[%s5223_s21 + $0x560] sm:$0xff]  ;;  %v415_v36 = vld [vmem:[%s5223_s21 + $0x5d8] sm:$0xff]  ;;  %v214_v0 = vld [vmem:[%s5284_s27 + $0x10] sm:$0xff] }
  0x42   : > { %4074 = vmatpush3.msra.mxu1 %v333_v39  ;;  %4040 = vmatprep.subr.mxu0 %v316_v40  ;;  %v367_v37 = vld [vmem:[%s5223_s21 + $0x458] sm:$0xff]  ;;  %v382_v39 = vld [vmem:[%s5223_s21 + $0x4d0] sm:$0xff] }
  0x43   : > { %4075 = vmatprep.subr.mxu1 %v348_v41  ;;  %4041 = vmatpush3.msra.mxu0 %v300_v42  ;;  %v399_v38 = vld [vmem:[%s5223_s21 + $0x558] sm:$0xff]  ;;  %v414_v40 = vld [vmem:[%s5223_s21 + $0x5d0] sm:$0xff] }
  0x44   : > { %4076 = vmatpush3.msra.mxu1 %v332_v43  ;;  %4042 = vmatprep.subr.mxu0 %v315_v44  ;;  %v366_v41 = vld [vmem:[%s5223_s21 + $0x450] sm:$0xff]  ;;  %v381_v43 = vld [vmem:[%s5223_s21 + $0x4c8] sm:$0xff] }
  0x45   : > { %4077 = vmatprep.subr.mxu1 %v347_v45  ;;  %4043 = vmatpush3.msra.mxu0 %v299_v46  ;;  %v398_v42 = vld [vmem:[%s5223_s21 + $0x550] sm:$0xff]  ;;  %v413_v44 = vld [vmem:[%s5223_s21 + $0x5c8] sm:$0xff] }
  0x46   : > { %4078 = vmatpush3.msra.mxu1 %v331_v47  ;;  %4044 = vmatprep.subr.mxu0 %v314_v48  ;;  %v365_v45 = vld [vmem:[%s5223_s21 + $0x448] sm:$0xff]  ;;  %v380_v47 = vld [vmem:[%s5223_s21 + $0x4c0] sm:$0xff] }
  0x47   : > { %4079 = vmatprep.subr.mxu1 %v346_v49  ;;  %4045 = vmatpush3.msra.mxu0 %v298_v50  ;;  %v397_v46 = vld [vmem:[%s5223_s21 + $0x548] sm:$0xff]  ;;  %v412_v48 = vld [vmem:[%s5223_s21 + $0x5c0] sm:$0xff] }
  0x48   : > { %4080 = vmatpush3.msra.mxu1 %v330_v52  ;;  %4046 = vmatprep.subr.mxu0 %v313_v53  ;;  %v364_v49 = vld [vmem:[%s5223_s21 + $0x440] sm:$0xff]  ;;  %v379_v52 = vld [vmem:[%s5223_s21 + $0x4b8] sm:$0xff] }
  0x49   : > { %4081 = vmatprep.subr.mxu1 %v345_v54  ;;  %4047 = vmatpush3.msra.mxu0 %v297_v55  ;;  %v396_v50 = vld [vmem:[%s5223_s21 + $0x540] sm:$0xff]  ;;  %v411_v53 = vld [vmem:[%s5223_s21 + $0x5b8] sm:$0xff] }
  0x4a   : > { %4082 = vmatpush3.msra.mxu1 %v329_v56  ;;  %4048 = vmatprep.subr.mxu0 %v312_v58  ;;  %v363_v54 = vld [vmem:[%s5223_s21 + $0x438] sm:$0xff]  ;;  %v378_v56 = vld [vmem:[%s5223_s21 + $0x4b0] sm:$0xff] }
  0x4b   : > { %4083 = vmatprep.subr.mxu1 %v344_v59  ;;  %4049 = vmatpush3.msra.mxu0 %v296_v60  ;;  %v395_v55 = vld [vmem:[%s5223_s21 + $0x538] sm:$0xff]  ;;  %v362_v58 = vld [vmem:[%s5223_s21 + $0x430] sm:$0xff]  ;;  %v377_v60 = vld [vmem:[%s5223_s21 + $0x4a8] sm:$0xff] }
  0x4c   : > { %4084 = vmatpush3.msra.mxu1 %v328_v61  ;;  %4050 = vmatprep.subr.mxu0 %v311_v62  ;;  %v394_v59 = vld [vmem:[%s5223_s21 + $0x530] sm:$0xff]  ;;  %v409_v61 = vld [vmem:[%s5223_s21 + $0x5a8] sm:$0xff] }
  0x4d   : > { %4085 = vmatprep.subr.mxu1 %v343_v63  ;;  %4051 = vmatpush3.msra.mxu0 %v295_v1  ;;  %v361_v62 = vld [vmem:[%s5223_s21 + $0x428] sm:$0xff]  ;;  %v376_v1 = vld [vmem:[%s5223_s21 + $0x4a0] sm:$0xff] }
  0x4e   : > { %4086 = vmatpush3.msra.mxu1 %v327_v2  ;;  %4052 = vmatprep.subr.mxu0 %v310_v3  ;;  %v393_v63 = vld [vmem:[%s5223_s21 + $0x528] sm:$0xff]  ;;  %v408_v2 = vld [vmem:[%s5223_s21 + $0x5a0] sm:$0xff] }
  0x4f   : > { %4087 = vmatprep.subr.mxu1 %v342_v4  ;;  %4053 = vmatpush3.msra.mxu0 %v294_v6  ;;  %v360_v3 = vld [vmem:[%s5223_s21 + $0x420] sm:$0xff]  ;;  %v407_v6 = vld [vmem:[%s5223_s21 + $0x598] sm:$0xff] }
  0x50   : > { %4088 = vmatpush3.msra.mxu1 %v326_v7  ;;  %4054 = vmatprep.subr.mxu0 %v309_v8  ;;  %v392_v4 = vld [vmem:[%s5223_s21 + $0x520] sm:$0xff]  ;;  %v1302_v7 = vcombine.high %v214_v0, %v214_v0  ;;  %v359_v8 = vld [vmem:[%s5223_s21 + $0x418] sm:$0xff] }
  0x51   : > { %4089 = vmatprep.subr.mxu1 %v341_v9  ;;  %4055 = vmatpush3.msra.mxu0 %v293_v11  ;;  %v391_v9 = vld [vmem:[%s5223_s21 + $0x518] sm:$0xff]  ;;  %v406_v11 = vld [vmem:[%s5223_s21 + $0x590] sm:$0xff] }
  0x52   : > { %4090 = vmatpush3.msra.mxu1 %v325_v12  ;;  %4056 = vmatprep.subr.mxu0 %v308_v13  ;;  %v1309_v12 = vrot.slane %v214_v0, %v5290_v51  ;;  %v358_v13 = vld [vmem:[%s5223_s21 + $0x410] sm:$0xff] }
  0x53   : > { %4091 = vmatprep.subr.mxu1 %v340_v14  ;;  %4057 = vmatpush3.msra.mxu0 %v292_v16  ;;  %v390_v14 = vld [vmem:[%s5223_s21 + $0x510] sm:$0xff]  ;;  %v405_v16 = vld [vmem:[%s5223_s21 + $0x588] sm:$0xff] }
  0x54   : > { %1808 = vmatprep.mubr.f32.mxu0 %v1300_v15  ;;  %4092 = vmatpush3.msra.mxu1 %v324_v17  ;;  %v373_v15 = vld [vmem:[%s5223_s21 + $0x488] sm:$0xff]  ;;  %v1316_v17 = vrot.slane %v1302_v7, %v5290_v51  ;;  %v474_v0 = vld [vmem:[%s5223_s21 + $0x7b0] sm:$0xff]  ;;  %v215_v7 = vld [vmem:[%s5284_s27 + $0x18] sm:$0xff] }
  0x55   : > { %1809 = vmatmul.mubr.f32.vlgmr.msra.gmra.mxu0 %v1292_v5  ;;  %1878 = vmatprep.mubr.f32.mxu1 %v1301_v18  ;;  %v375_v5 = vld [vmem:[%s5223_s21 + $0x498] sm:$0xff]  ;;  %v357_v18 = vld [vmem:[%s5223_s21 + $0x408] sm:$0xff] }
  0x56   : > { %4096 = vmatprep.subr.mxu0 %v387_v19  ;;  %4131 = vmatprep.subr.mxu1 %v419_v20  ;;  %v389_v19 = vld [vmem:[%s5223_s21 + $0x508] sm:$0xff]  ;;  %v372_v20 = vld [vmem:[%s5223_s21 + $0x480] sm:$0xff] }
  0x57   : > { %1879 = vmatmul.mubr.f32.vlgmr.msra.gmra.mxu1 %v1299_v10  ;;  %4097 = vmatpush3.msra.mxu0 %v371_v21  ;;  %v374_v10 = vld [vmem:[%s5223_s21 + $0x490] sm:$0xff]  ;;  %v404_v21 = vld [vmem:[%s5223_s21 + $0x580] sm:$0xff] }
  0x58   : > { %4132 = vmatpush3.msra.mxu1 %v403_v22  ;;  %4098 = vmatprep.subr.mxu0 %v386_v23  ;;  %v1317_v22 = vcombine.high %v1309_v12, %v1309_v12  ;;  %v356_v23 = vld [vmem:[%s5223_s21 + $0x400] sm:$0xff] }
  0x59   : > { %4133 = vmatprep.subr.mxu1 %v418_v24  ;;  %4099 = vmatpush3.msra.mxu0 %v370_v25  ;;  %v388_v24 = vld [vmem:[%s5223_s21 + $0x500] sm:$0xff]  ;;  %v1318_v25 = vcombine.high %v1316_v17, %v1316_v17 }
  0x5a   : > { %4134 = vmatpush3.msra.mxu1 %v402_v26  ;;  %4100 = vmatprep.subr.mxu0 %v385_v27  ;;  %v451_v26 = vld [vmem:[%s5223_s21 + $0x6f8] sm:$0xff] }
  0x5b   : > { %4135 = vmatprep.subr.mxu1 %v417_v28  ;;  %4101 = vmatpush3.msra.mxu0 %v369_v29  ;;  %v483_v27 = vld [vmem:[%s5223_s21 + $0x7f8] sm:$0xff] }
  0x5c   : > { %4136 = vmatpush3.msra.mxu1 %v401_v30  ;;  %4102 = vmatprep.subr.mxu0 %v384_v31  ;;  %v435_v28 = vld [vmem:[%s5223_s21 + $0x678] sm:$0xff]  ;;  %v450_v30 = vld [vmem:[%s5223_s21 + $0x6f0] sm:$0xff] }
  0x5d   : > { %4137 = vmatprep.subr.mxu1 %v416_v32  ;;  %4103 = vmatpush3.msra.mxu0 %v368_v33  ;;  %v467_v29 = vld [vmem:[%s5223_s21 + $0x778] sm:$0xff]  ;;  %v482_v31 = vld [vmem:[%s5223_s21 + $0x7f0] sm:$0xff] }
  0x5e   : > { %4138 = vmatpush3.msra.mxu1 %v400_v34  ;;  %4104 = vmatprep.subr.mxu0 %v383_v35  ;;  %v434_v32 = vld [vmem:[%s5223_s21 + $0x670] sm:$0xff]  ;;  %v449_v34 = vld [vmem:[%s5223_s21 + $0x6e8] sm:$0xff] }
  0x5f   : > { %4139 = vmatprep.subr.mxu1 %v415_v36  ;;  %4105 = vmatpush3.msra.mxu0 %v367_v37  ;;  %v466_v33 = vld [vmem:[%s5223_s21 + $0x770] sm:$0xff]  ;;  %v481_v35 = vld [vmem:[%s5223_s21 + $0x7e8] sm:$0xff] }
  0x60   : > { %4140 = vmatpush3.msra.mxu1 %v399_v38  ;;  %4106 = vmatprep.subr.mxu0 %v382_v39  ;;  %v433_v36 = vld [vmem:[%s5223_s21 + $0x668] sm:$0xff]  ;;  %v448_v38 = vld [vmem:[%s5223_s21 + $0x6e0] sm:$0xff] }
  0x61   : > { %4141 = vmatprep.subr.mxu1 %v414_v40  ;;  %4107 = vmatpush3.msra.mxu0 %v366_v41  ;;  %v465_v37 = vld [vmem:[%s5223_s21 + $0x768] sm:$0xff]  ;;  %v480_v39 = vld [vmem:[%s5223_s21 + $0x7e0] sm:$0xff] }
  0x62   : > { %4142 = vmatpush3.msra.mxu1 %v398_v42  ;;  %4108 = vmatprep.subr.mxu0 %v381_v43  ;;  %v432_v40 = vld [vmem:[%s5223_s21 + $0x660] sm:$0xff]  ;;  %v447_v42 = vld [vmem:[%s5223_s21 + $0x6d8] sm:$0xff] }
  0x63   : > { %4143 = vmatprep.subr.mxu1 %v413_v44  ;;  %4109 = vmatpush3.msra.mxu0 %v365_v45  ;;  %v464_v41 = vld [vmem:[%s5223_s21 + $0x760] sm:$0xff]  ;;  %v479_v43 = vld [vmem:[%s5223_s21 + $0x7d8] sm:$0xff] }
  0x64   : > { %4144 = vmatpush3.msra.mxu1 %v397_v46  ;;  %4110 = vmatprep.subr.mxu0 %v380_v47  ;;  %v431_v44 = vld [vmem:[%s5223_s21 + $0x658] sm:$0xff]  ;;  %v446_v46 = vld [vmem:[%s5223_s21 + $0x6d0] sm:$0xff] }
  0x65   : > { %4145 = vmatprep.subr.mxu1 %v412_v48  ;;  %4111 = vmatpush3.msra.mxu0 %v364_v49  ;;  %v463_v45 = vld [vmem:[%s5223_s21 + $0x758] sm:$0xff]  ;;  %v478_v47 = vld [vmem:[%s5223_s21 + $0x7d0] sm:$0xff] }
  0x66   : > { %4146 = vmatpush3.msra.mxu1 %v396_v50  ;;  %4112 = vmatprep.subr.mxu0 %v379_v52  ;;  %v430_v48 = vld [vmem:[%s5223_s21 + $0x650] sm:$0xff]  ;;  %v445_v50 = vld [vmem:[%s5223_s21 + $0x6c8] sm:$0xff] }
  0x67   : > { %4147 = vmatprep.subr.mxu1 %v411_v53  ;;  %4113 = vmatpush3.msra.mxu0 %v363_v54  ;;  %v462_v49 = vld [vmem:[%s5223_s21 + $0x750] sm:$0xff]  ;;  %v477_v52 = vld [vmem:[%s5223_s21 + $0x7c8] sm:$0xff] }
  0x68   : > { %4148 = vmatpush3.msra.mxu1 %v395_v55  ;;  %4114 = vmatprep.subr.mxu0 %v378_v56  ;;  %v429_v53 = vld [vmem:[%s5223_s21 + $0x648] sm:$0xff]  ;;  %v444_v55 = vld [vmem:[%s5223_s21 + $0x6c0] sm:$0xff] }
  0x69   : > { %4149 = vmatprep.subr.mxu1 %v410_v57  ;;  %4115 = vmatpush3.msra.mxu0 %v362_v58  ;;  %v461_v54 = vld [vmem:[%s5223_s21 + $0x748] sm:$0xff]  ;;  %v476_v56 = vld [vmem:[%s5223_s21 + $0x7c0] sm:$0xff] }
  0x6a   : > { %4150 = vmatpush3.msra.mxu1 %v394_v59  ;;  %4116 = vmatprep.subr.mxu0 %v377_v60  ;;  %v428_v57 = vld [vmem:[%s5223_s21 + $0x640] sm:$0xff]  ;;  %v443_v59 = vld [vmem:[%s5223_s21 + $0x6b8] sm:$0xff] }
  0x6b   : > { %4151 = vmatprep.subr.mxu1 %v409_v61  ;;  %4117 = vmatpush3.msra.mxu0 %v361_v62  ;;  %v460_v58 = vld [vmem:[%s5223_s21 + $0x740] sm:$0xff]  ;;  %v475_v60 = vld [vmem:[%s5223_s21 + $0x7b8] sm:$0xff] }
  0x6c   : > { %4152 = vmatpush3.msra.mxu1 %v393_v63  ;;  %4118 = vmatprep.subr.mxu0 %v376_v1  ;;  %v427_v61 = vld [vmem:[%s5223_s21 + $0x638] sm:$0xff]  ;;  %v442_v63 = vld [vmem:[%s5223_s21 + $0x6b0] sm:$0xff] }
  0x6d   : > { %4153 = vmatprep.subr.mxu1 %v408_v2  ;;  %4119 = vmatpush3.msra.mxu0 %v360_v3  ;;  %v459_v62 = vld [vmem:[%s5223_s21 + $0x738] sm:$0xff]  ;;  %v426_v1 = vld [vmem:[%s5223_s21 + $0x630] sm:$0xff]  ;;  %v441_v3 = vld [vmem:[%s5223_s21 + $0x6a8] sm:$0xff] }
  0x6e   : > { %4154 = vmatpush3.msra.mxu1 %v392_v4  ;;  %4120 = vmatprep.subr.mxu0 %v375_v5  ;;  %v458_v2 = vld [vmem:[%s5223_s21 + $0x730] sm:$0xff]  ;;  %v473_v4 = vld [vmem:[%s5223_s21 + $0x7a8] sm:$0xff] }
  0x6f   : > { %4155 = vmatprep.subr.mxu1 %v407_v6  ;;  %4121 = vmatpush3.msra.mxu0 %v359_v8  ;;  %v425_v5 = vld [vmem:[%s5223_s21 + $0x628] sm:$0xff]  ;;  %v440_v8 = vld [vmem:[%s5223_s21 + $0x6a0] sm:$0xff] }
  0x70   : > { %4156 = vmatpush3.msra.mxu1 %v391_v9  ;;  %4122 = vmatprep.subr.mxu0 %v374_v10  ;;  %v457_v6 = vld [vmem:[%s5223_s21 + $0x728] sm:$0xff]  ;;  %v472_v9 = vld [vmem:[%s5223_s21 + $0x7a0] sm:$0xff] }
  0x71   : > { %4157 = vmatprep.subr.mxu1 %v406_v11  ;;  %4123 = vmatpush3.msra.mxu0 %v358_v13  ;;  %v424_v10 = vld [vmem:[%s5223_s21 + $0x620] sm:$0xff]  ;;  %v471_v13 = vld [vmem:[%s5223_s21 + $0x798] sm:$0xff] }
  0x72   : > { %4158 = vmatpush3.msra.mxu1 %v390_v14  ;;  %4124 = vmatprep.subr.mxu0 %v373_v15  ;;  %v456_v11 = vld [vmem:[%s5223_s21 + $0x720] sm:$0xff]  ;;  %v1319_v14 = vcombine.high %v215_v7, %v215_v7  ;;  %v423_v15 = vld [vmem:[%s5223_s21 + $0x618] sm:$0xff] }
  0x73   : > { %4159 = vmatprep.subr.mxu1 %v405_v16  ;;  %4125 = vmatpush3.msra.mxu0 %v357_v18  ;;  %v455_v16 = vld [vmem:[%s5223_s21 + $0x718] sm:$0xff]  ;;  %v470_v18 = vld [vmem:[%s5223_s21 + $0x790] sm:$0xff] }
  0x74   : > { %4160 = vmatpush3.msra.mxu1 %v389_v19  ;;  %4126 = vmatprep.subr.mxu0 %v372_v20  ;;  %v1326_v19 = vrot.slane %v215_v7, %v5290_v51  ;;  %v422_v20 = vld [vmem:[%s5223_s21 + $0x610] sm:$0xff] }
  0x75   : > { %4161 = vmatprep.subr.mxu1 %v404_v21  ;;  %4127 = vmatpush3.msra.mxu0 %v356_v23  ;;  %v454_v21 = vld [vmem:[%s5223_s21 + $0x710] sm:$0xff]  ;;  %v469_v23 = vld [vmem:[%s5223_s21 + $0x788] sm:$0xff] }
  0x76   : > { %1948 = vmatprep.mubr.f32.mxu0 %v1317_v22  ;;  %4162 = vmatpush3.msra.mxu1 %v388_v24  ;;  %v437_v22 = vld [vmem:[%s5223_s21 + $0x688] sm:$0xff]  ;;  %v1333_v24 = vrot.slane %v1319_v14, %v5290_v51  ;;  %v538_v7 = vld [vmem:[%s5223_s21 + $0x9b0] sm:$0xff]  ;;  %v216_v14 = vld [vmem:[%s5284_s27 + $0x20] sm:$0xff] }
  0x77   : > { %1949 = vmatmul.mubr.f32.vlgmr.msra.gmra.mxu0 %v1309_v12  ;;  %2018 = vmatprep.mubr.f32.mxu1 %v1318_v25  ;;  %v439_v12 = vld [vmem:[%s5223_s21 + $0x698] sm:$0xff]  ;;  %v421_v25 = vld [vmem:[%s5223_s21 + $0x608] sm:$0xff] }
  0x78   : > { %4166 = vmatprep.subr.mxu0 %v451_v26  ;;  %4201 = vmatprep.subr.mxu1 %v483_v27  ;;  %v453_v26 = vld [vmem:[%s5223_s21 + $0x708] sm:$0xff]  ;;  %v436_v27 = vld [vmem:[%s5223_s21 + $0x680] sm:$0xff] }
  0x79   : > { %2019 = vmatmul.mubr.f32.vlgmr.msra.gmra.mxu1 %v1316_v17  ;;  %4167 = vmatpush3.msra.mxu0 %v435_v28  ;;  %v438_v17 = vld [vmem:[%s5223_s21 + $0x690] sm:$0xff]  ;;  %v468_v28 = vld [vmem:[%s5223_s21 + $0x780] sm:$0xff] }
  0x7a   : > { %4202 = vmatpush3.msra.mxu1 %v467_v29  ;;  %4168 = vmatprep.subr.mxu0 %v450_v30  ;;  %v1334_v29 = vcombine.high %v1326_v19, %v1326_v19  ;;  %v420_v30 = vld [vmem:[%s5223_s21 + $0x600] sm:$0xff] }
  0x7b   : > { %4203 = vmatprep.subr.mxu1 %v482_v31  ;;  %4169 = vmatpush3.msra.mxu0 %v434_v32  ;;  %v452_v31 = vld [vmem:[%s5223_s21 + $0x700] sm:$0xff]  ;;  %v1335_v32 = vcombine.high %v1333_v24, %v1333_v24 }
  0x7c   : > { %4204 = vmatpush3.msra.mxu1 %v466_v33  ;;  %4170 = vmatprep.subr.mxu0 %v449_v34  ;;  %v515_v33 = vld [vmem:[%s5223_s21 + $0x8f8] sm:$0xff] }
  0x7d   : > { %4205 = vmatprep.subr.mxu1 %v481_v35  ;;  %4171 = vmatpush3.msra.mxu0 %v433_v36  ;;  %v547_v34 = vld [vmem:[%s5223_s21 + $0x9f8] sm:$0xff] }
  0x7e   : > { %4206 = vmatpush3.msra.mxu1 %v465_v37  ;;  %4172 = vmatprep.subr.mxu0 %v448_v38  ;;  %v499_v35 = vld [vmem:[%s5223_s21 + $0x878] sm:$0xff]  ;;  %v514_v37 = vld [vmem:[%s5223_s21 + $0x8f0] sm:$0xff] }
  0x7f   : > { %4207 = vmatprep.subr.mxu1 %v480_v39  ;;  %4173 = vmatpush3.msra.mxu0 %v432_v40  ;;  %v531_v36 = vld [vmem:[%s5223_s21 + $0x978] sm:$0xff]  ;;  %v546_v38 = vld [vmem:[%s5223_s21 + $0x9f0] sm:$0xff] }
  0x80   : > { %4208 = vmatpush3.msra.mxu1 %v464_v41  ;;  %4174 = vmatprep.subr.mxu0 %v447_v42  ;;  %v498_v39 = vld [vmem:[%s5223_s21 + $0x870] sm:$0xff]  ;;  %v513_v41 = vld [vmem:[%s5223_s21 + $0x8e8] sm:$0xff] }
  0x81   : > { %4209 = vmatprep.subr.mxu1 %v479_v43  ;;  %4175 = vmatpush3.msra.mxu0 %v431_v44  ;;  %v530_v40 = vld [vmem:[%s5223_s21 + $0x970] sm:$0xff]  ;;  %v545_v42 = vld [vmem:[%s5223_s21 + $0x9e8] sm:$0xff] }
  0x82   : > { %4210 = vmatpush3.msra.mxu1 %v463_v45  ;;  %4176 = vmatprep.subr.mxu0 %v446_v46  ;;  %v497_v43 = vld [vmem:[%s5223_s21 + $0x868] sm:$0xff]  ;;  %v512_v45 = vld [vmem:[%s5223_s21 + $0x8e0] sm:$0xff] }
  0x83   : > { %4211 = vmatprep.subr.mxu1 %v478_v47  ;;  %4177 = vmatpush3.msra.mxu0 %v430_v48  ;;  %v529_v44 = vld [vmem:[%s5223_s21 + $0x968] sm:$0xff]  ;;  %v544_v46 = vld [vmem:[%s5223_s21 + $0x9e0] sm:$0xff] }
  0x84   : > { %4212 = vmatpush3.msra.mxu1 %v462_v49  ;;  %4178 = vmatprep.subr.mxu0 %v445_v50  ;;  %v496_v47 = vld [vmem:[%s5223_s21 + $0x860] sm:$0xff]  ;;  %v511_v49 = vld [vmem:[%s5223_s21 + $0x8d8] sm:$0xff] }
  0x85   : > { %4213 = vmatprep.subr.mxu1 %v477_v52  ;;  %4179 = vmatpush3.msra.mxu0 %v429_v53  ;;  %v528_v48 = vld [vmem:[%s5223_s21 + $0x960] sm:$0xff]  ;;  %v543_v50 = vld [vmem:[%s5223_s21 + $0x9d8] sm:$0xff] }
  0x86   : > { %4214 = vmatpush3.msra.mxu1 %v461_v54  ;;  %4180 = vmatprep.subr.mxu0 %v444_v55  ;;  %v495_v52 = vld [vmem:[%s5223_s21 + $0x858] sm:$0xff]  ;;  %v510_v54 = vld [vmem:[%s5223_s21 + $0x8d0] sm:$0xff] }
  0x87   : > { %4215 = vmatprep.subr.mxu1 %v476_v56  ;;  %4181 = vmatpush3.msra.mxu0 %v428_v57  ;;  %v527_v53 = vld [vmem:[%s5223_s21 + $0x958] sm:$0xff]  ;;  %v542_v55 = vld [vmem:[%s5223_s21 + $0x9d0] sm:$0xff] }
  0x88   : > { %4216 = vmatpush3.msra.mxu1 %v460_v58  ;;  %4182 = vmatprep.subr.mxu0 %v443_v59  ;;  %v494_v56 = vld [vmem:[%s5223_s21 + $0x850] sm:$0xff]  ;;  %v509_v58 = vld [vmem:[%s5223_s21 + $0x8c8] sm:$0xff] }
  0x89   : > { %4217 = vmatprep.subr.mxu1 %v475_v60  ;;  %4183 = vmatpush3.msra.mxu0 %v427_v61  ;;  %v526_v57 = vld [vmem:[%s5223_s21 + $0x950] sm:$0xff]  ;;  %v541_v59 = vld [vmem:[%s5223_s21 + $0x9c8] sm:$0xff] }
  0x8a   : > { %4218 = vmatpush3.msra.mxu1 %v459_v62  ;;  %4184 = vmatprep.subr.mxu0 %v442_v63  ;;  %v493_v60 = vld [vmem:[%s5223_s21 + $0x848] sm:$0xff]  ;;  %v508_v62 = vld [vmem:[%s5223_s21 + $0x8c0] sm:$0xff] }
  0x8b   : > { %4219 = vmatprep.subr.mxu1 %v474_v0  ;;  %4185 = vmatpush3.msra.mxu0 %v426_v1  ;;  %v525_v61 = vld [vmem:[%s5223_s21 + $0x948] sm:$0xff]  ;;  %v540_v63 = vld [vmem:[%s5223_s21 + $0x9c0] sm:$0xff] }
  0x8c   : > { %4220 = vmatpush3.msra.mxu1 %v458_v2  ;;  %4186 = vmatprep.subr.mxu0 %v441_v3  ;;  %v492_v0 = vld [vmem:[%s5223_s21 + $0x840] sm:$0xff]  ;;  %v507_v2 = vld [vmem:[%s5223_s21 + $0x8b8] sm:$0xff] }
  0x8d   : > { %4221 = vmatprep.subr.mxu1 %v473_v4  ;;  %4187 = vmatpush3.msra.mxu0 %v425_v5  ;;  %v524_v1 = vld [vmem:[%s5223_s21 + $0x940] sm:$0xff]  ;;  %v539_v3 = vld [vmem:[%s5223_s21 + $0x9b8] sm:$0xff] }
  0x8e   : > { %4222 = vmatpush3.msra.mxu1 %v457_v6  ;;  %4188 = vmatprep.subr.mxu0 %v440_v8  ;;  %v491_v4 = vld [vmem:[%s5223_s21 + $0x838] sm:$0xff]  ;;  %v506_v6 = vld [vmem:[%s5223_s21 + $0x8b0] sm:$0xff] }
  0x8f   : > { %4223 = vmatprep.subr.mxu1 %v472_v9  ;;  %4189 = vmatpush3.msra.mxu0 %v424_v10  ;;  %v523_v5 = vld [vmem:[%s5223_s21 + $0x938] sm:$0xff]  ;;  %v490_v8 = vld [vmem:[%s5223_s21 + $0x830] sm:$0xff]  ;;  %v505_v10 = vld [vmem:[%s5223_s21 + $0x8a8] sm:$0xff] }
  0x90   : > { %4224 = vmatpush3.msra.mxu1 %v456_v11  ;;  %4190 = vmatprep.subr.mxu0 %v439_v12  ;;  %v522_v9 = vld [vmem:[%s5223_s21 + $0x930] sm:$0xff]  ;;  %v537_v11 = vld [vmem:[%s5223_s21 + $0x9a8] sm:$0xff] }
  0x91   : > { %4225 = vmatprep.subr.mxu1 %v471_v13  ;;  %4191 = vmatpush3.msra.mxu0 %v423_v15  ;;  %v489_v12 = vld [vmem:[%s5223_s21 + $0x828] sm:$0xff]  ;;  %v504_v15 = vld [vmem:[%s5223_s21 + $0x8a0] sm:$0xff] }
  0x92   : > { %4226 = vmatpush3.msra.mxu1 %v455_v16  ;;  %4192 = vmatprep.subr.mxu0 %v438_v17  ;;  %v521_v13 = vld [vmem:[%s5223_s21 + $0x928] sm:$0xff]  ;;  %v536_v16 = vld [vmem:[%s5223_s21 + $0x9a0] sm:$0xff] }
  0x93   : > { %4227 = vmatprep.subr.mxu1 %v470_v18  ;;  %4193 = vmatpush3.msra.mxu0 %v422_v20  ;;  %v488_v17 = vld [vmem:[%s5223_s21 + $0x820] sm:$0xff]  ;;  %v535_v20 = vld [vmem:[%s5223_s21 + $0x998] sm:$0xff] }
  0x94   : > { %4228 = vmatpush3.msra.mxu1 %v454_v21  ;;  %4194 = vmatprep.subr.mxu0 %v437_v22  ;;  %v520_v18 = vld [vmem:[%s5223_s21 + $0x920] sm:$0xff]  ;;  %v1336_v21 = vcombine.high %v216_v14, %v216_v14  ;;  %v487_v22 = vld [vmem:[%s5223_s21 + $0x818] sm:$0xff] }
  0x95   : > { %4229 = vmatprep.subr.mxu1 %v469_v23  ;;  %4195 = vmatpush3.msra.mxu0 %v421_v25  ;;  %v519_v23 = vld [vmem:[%s5223_s21 + $0x918] sm:$0xff]  ;;  %v534_v25 = vld [vmem:[%s5223_s21 + $0x990] sm:$0xff] }
  0x96   : > { %4230 = vmatpush3.msra.mxu1 %v453_v26  ;;  %4196 = vmatprep.subr.mxu0 %v436_v27  ;;  %v1343_v26 = vrot.slane %v216_v14, %v5290_v51  ;;  %v486_v27 = vld [vmem:[%s5223_s21 + $0x810] sm:$0xff] }
  0x97   : > { %4231 = vmatprep.subr.mxu1 %v468_v28  ;;  %4197 = vmatpush3.msra.mxu0 %v420_v30  ;;  %v518_v28 = vld [vmem:[%s5223_s21 + $0x910] sm:$0xff]  ;;  %v533_v30 = vld [vmem:[%s5223_s21 + $0x988] sm:$0xff] }
  0x98   : > { %2088 = vmatprep.mubr.f32.mxu0 %v1334_v29  ;;  %4232 = vmatpush3.msra.mxu1 %v452_v31  ;;  %v501_v29 = vld [vmem:[%s5223_s21 + $0x888] sm:$0xff]  ;;  %v1350_v31 = vrot.slane %v1336_v21, %v5290_v51  ;;  %v602_v14 = vld [vmem:[%s5223_s21 + $0xbb0] sm:$0xff] }
  0x99   : > { %2089 = vmatmul.mubr.f32.vlgmr.msra.gmra.mxu0 %v1326_v19  ;;  %2158 = vmatprep.mubr.f32.mxu1 %v1335_v32  ;;  %v503_v19 = vld [vmem:[%s5223_s21 + $0x898] sm:$0xff]  ;;  %v485_v32 = vld [vmem:[%s5223_s21 + $0x808] sm:$0xff] }
  0x9a   : > { %4236 = vmatprep.subr.mxu0 %v515_v33  ;;  %4271 = vmatprep.subr.mxu1 %v547_v34  ;;  %v517_v33 = vld [vmem:[%s5223_s21 + $0x908] sm:$0xff]  ;;  %v500_v34 = vld [vmem:[%s5223_s21 + $0x880] sm:$0xff] }
  0x9b   : > { %2159 = vmatmul.mubr.f32.vlgmr.msra.gmra.mxu1 %v1333_v24  ;;  %4237 = vmatpush3.msra.mxu0 %v499_v35  ;;  %v502_v24 = vld [vmem:[%s5223_s21 + $0x890] sm:$0xff]  ;;  %v532_v35 = vld [vmem:[%s5223_s21 + $0x980] sm:$0xff]  ;;  %v217_v21 = vld [vmem:[%s5284_s27 + $0x28] sm:$0xff] }
  0x9c   : > { %4272 = vmatpush3.msra.mxu1 %v531_v36  ;;  %4238 = vmatprep.subr.mxu0 %v514_v37  ;;  %v1351_v36 = vcombine.high %v1343_v26, %v1343_v26  ;;  %v484_v37 = vld [vmem:[%s5223_s21 + $0x800] sm:$0xff] }
  0x9d   : > { %4273 = vmatprep.subr.mxu1 %v546_v38  ;;  %4239 = vmatpush3.msra.mxu0 %v498_v39  ;;  %v516_v38 = vld [vmem:[%s5223_s21 + $0x900] sm:$0xff]  ;;  %v1352_v39 = vcombine.high %v1350_v31, %v1350_v31 }
  0x9e   : > { %4274 = vmatpush3.msra.mxu1 %v530_v40  ;;  %4240 = vmatprep.subr.mxu0 %v513_v41  ;;  %v579_v40 = vld [vmem:[%s5223_s21 + $0xaf8] sm:$0xff] }
  0x9f   : > { %4275 = vmatprep.subr.mxu1 %v545_v42  ;;  %4241 = vmatpush3.msra.mxu0 %v497_v43  ;;  %v611_v41 = vld [vmem:[%s5223_s21 + $0xbf8] sm:$0xff] }
  0xa0   : > { %4276 = vmatpush3.msra.mxu1 %v529_v44  ;;  %4242 = vmatprep.subr.mxu0 %v512_v45  ;;  %v563_v42 = vld [vmem:[%s5223_s21 + $0xa78] sm:$0xff]  ;;  %v578_v44 = vld [vmem:[%s5223_s21 + $0xaf0] sm:$0xff] }
  0xa1   : > { %4277 = vmatprep.subr.mxu1 %v544_v46  ;;  %4243 = vmatpush3.msra.mxu0 %v496_v47  ;;  %v595_v43 = vld [vmem:[%s5223_s21 + $0xb78] sm:$0xff]  ;;  %v610_v45 = vld [vmem:[%s5223_s21 + $0xbf0] sm:$0xff] }
  0xa2   : > { %4278 = vmatpush3.msra.mxu1 %v528_v48  ;;  %4244 = vmatprep.subr.mxu0 %v511_v49  ;;  %v562_v46 = vld [vmem:[%s5223_s21 + $0xa70] sm:$0xff]  ;;  %v577_v48 = vld [vmem:[%s5223_s21 + $0xae8] sm:$0xff] }
  0xa3   : > { %4279 = vmatprep.subr.mxu1 %v543_v50  ;;  %4245 = vmatpush3.msra.mxu0 %v495_v52  ;;  %v594_v47 = vld [vmem:[%s5223_s21 + $0xb70] sm:$0xff]  ;;  %v609_v49 = vld [vmem:[%s5223_s21 + $0xbe8] sm:$0xff] }
  0xa4   : > { %4280 = vmatpush3.msra.mxu1 %v527_v53  ;;  %4246 = vmatprep.subr.mxu0 %v510_v54  ;;  %v561_v50 = vld [vmem:[%s5223_s21 + $0xa68] sm:$0xff]  ;;  %v576_v53 = vld [vmem:[%s5223_s21 + $0xae0] sm:$0xff] }
  0xa5   : > { %4281 = vmatprep.subr.mxu1 %v542_v55  ;;  %4247 = vmatpush3.msra.mxu0 %v494_v56  ;;  %v593_v52 = vld [vmem:[%s5223_s21 + $0xb68] sm:$0xff]  ;;  %v608_v54 = vld [vmem:[%s5223_s21 + $0xbe0] sm:$0xff] }
  0xa6   : > { %4282 = vmatpush3.msra.mxu1 %v526_v57  ;;  %4248 = vmatprep.subr.mxu0 %v509_v58  ;;  %v560_v55 = vld [vmem:[%s5223_s21 + $0xa60] sm:$0xff]  ;;  %v575_v57 = vld [vmem:[%s5223_s21 + $0xad8] sm:$0xff] }
  0xa7   : > { %4283 = vmatprep.subr.mxu1 %v541_v59  ;;  %4249 = vmatpush3.msra.mxu0 %v493_v60  ;;  %v592_v56 = vld [vmem:[%s5223_s21 + $0xb60] sm:$0xff]  ;;  %v607_v58 = vld [vmem:[%s5223_s21 + $0xbd8] sm:$0xff] }
  0xa8   : > { %4284 = vmatpush3.msra.mxu1 %v525_v61  ;;  %4250 = vmatprep.subr.mxu0 %v508_v62  ;;  %v559_v59 = vld [vmem:[%s5223_s21 + $0xa58] sm:$0xff]  ;;  %v574_v61 = vld [vmem:[%s5223_s21 + $0xad0] sm:$0xff] }
  0xa9   : > { %4285 = vmatprep.subr.mxu1 %v540_v63  ;;  %4251 = vmatpush3.msra.mxu0 %v492_v0  ;;  %v591_v60 = vld [vmem:[%s5223_s21 + $0xb58] sm:$0xff]  ;;  %v606_v62 = vld [vmem:[%s5223_s21 + $0xbd0] sm:$0xff] }
  0xaa   : > { %4286 = vmatpush3.msra.mxu1 %v524_v1  ;;  %4252 = vmatprep.subr.mxu0 %v507_v2  ;;  %v558_v63 = vld [vmem:[%s5223_s21 + $0xa50] sm:$0xff]  ;;  %v573_v1 = vld [vmem:[%s5223_s21 + $0xac8] sm:$0xff] }
  0xab   : > { %4287 = vmatprep.subr.mxu1 %v539_v3  ;;  %4253 = vmatpush3.msra.mxu0 %v491_v4  ;;  %v590_v0 = vld [vmem:[%s5223_s21 + $0xb50] sm:$0xff]  ;;  %v605_v2 = vld [vmem:[%s5223_s21 + $0xbc8] sm:$0xff] }
  0xac   : > { %4288 = vmatpush3.msra.mxu1 %v523_v5  ;;  %4254 = vmatprep.subr.mxu0 %v506_v6  ;;  %v557_v3 = vld [vmem:[%s5223_s21 + $0xa48] sm:$0xff]  ;;  %v572_v5 = vld [vmem:[%s5223_s21 + $0xac0] sm:$0xff] }
  0xad   : > { %4289 = vmatprep.subr.mxu1 %v538_v7  ;;  %4255 = vmatpush3.msra.mxu0 %v490_v8  ;;  %v589_v4 = vld [vmem:[%s5223_s21 + $0xb48] sm:$0xff]  ;;  %v604_v6 = vld [vmem:[%s5223_s21 + $0xbc0] sm:$0xff] }
  0xae   : > { %4290 = vmatpush3.msra.mxu1 %v522_v9  ;;  %4256 = vmatprep.subr.mxu0 %v505_v10  ;;  %v556_v7 = vld [vmem:[%s5223_s21 + $0xa40] sm:$0xff]  ;;  %v571_v9 = vld [vmem:[%s5223_s21 + $0xab8] sm:$0xff] }
  0xaf   : > { %4291 = vmatprep.subr.mxu1 %v537_v11  ;;  %4257 = vmatpush3.msra.mxu0 %v489_v12  ;;  %v588_v8 = vld [vmem:[%s5223_s21 + $0xb40] sm:$0xff]  ;;  %v603_v10 = vld [vmem:[%s5223_s21 + $0xbb8] sm:$0xff] }
  0xb0   : > { %4292 = vmatpush3.msra.mxu1 %v521_v13  ;;  %4258 = vmatprep.subr.mxu0 %v504_v15  ;;  %v555_v11 = vld [vmem:[%s5223_s21 + $0xa38] sm:$0xff]  ;;  %v570_v13 = vld [vmem:[%s5223_s21 + $0xab0] sm:$0xff] }
  0xb1   : > { %4293 = vmatprep.subr.mxu1 %v536_v16  ;;  %4259 = vmatpush3.msra.mxu0 %v488_v17  ;;  %v587_v12 = vld [vmem:[%s5223_s21 + $0xb38] sm:$0xff]  ;;  %v554_v15 = vld [vmem:[%s5223_s21 + $0xa30] sm:$0xff]  ;;  %v569_v17 = vld [vmem:[%s5223_s21 + $0xaa8] sm:$0xff] }
  0xb2   : > { %4294 = vmatpush3.msra.mxu1 %v520_v18  ;;  %4260 = vmatprep.subr.mxu0 %v503_v19  ;;  %v586_v16 = vld [vmem:[%s5223_s21 + $0xb30] sm:$0xff]  ;;  %v601_v18 = vld [vmem:[%s5223_s21 + $0xba8] sm:$0xff] }
  0xb3   : > { %4295 = vmatprep.subr.mxu1 %v535_v20  ;;  %4261 = vmatpush3.msra.mxu0 %v487_v22  ;;  %v553_v19 = vld [vmem:[%s5223_s21 + $0xa28] sm:$0xff]  ;;  %v568_v22 = vld [vmem:[%s5223_s21 + $0xaa0] sm:$0xff] }
  0xb4   : > { %4296 = vmatpush3.msra.mxu1 %v519_v23  ;;  %4262 = vmatprep.subr.mxu0 %v502_v24  ;;  %v585_v20 = vld [vmem:[%s5223_s21 + $0xb28] sm:$0xff]  ;;  %v600_v23 = vld [vmem:[%s5223_s21 + $0xba0] sm:$0xff] }
  0xb5   : > { %4297 = vmatprep.subr.mxu1 %v534_v25  ;;  %4263 = vmatpush3.msra.mxu0 %v486_v27  ;;  %v552_v24 = vld [vmem:[%s5223_s21 + $0xa20] sm:$0xff]  ;;  %v599_v27 = vld [vmem:[%s5223_s21 + $0xb98] sm:$0xff] }
  0xb6   : > { %4298 = vmatpush3.msra.mxu1 %v518_v28  ;;  %4264 = vmatprep.subr.mxu0 %v501_v29  ;;  %v584_v25 = vld [vmem:[%s5223_s21 + $0xb20] sm:$0xff]  ;;  %v1353_v28 = vcombine.high %v217_v21, %v217_v21  ;;  %v551_v29 = vld [vmem:[%s5223_s21 + $0xa18] sm:$0xff] }
  0xb7   : > { %4299 = vmatprep.subr.mxu1 %v533_v30  ;;  %4265 = vmatpush3.msra.mxu0 %v485_v32  ;;  %v583_v30 = vld [vmem:[%s5223_s21 + $0xb18] sm:$0xff]  ;;  %v598_v32 = vld [vmem:[%s5223_s21 + $0xb90] sm:$0xff] }
  0xb8   : > { %4300 = vmatpush3.msra.mxu1 %v517_v33  ;;  %4266 = vmatprep.subr.mxu0 %v500_v34  ;;  %v1360_v33 = vrot.slane %v217_v21, %v5290_v51  ;;  %v550_v34 = vld [vmem:[%s5223_s21 + $0xa10] sm:$0xff] }
  0xb9   : > { %4301 = vmatprep.subr.mxu1 %v532_v35  ;;  %4267 = vmatpush3.msra.mxu0 %v484_v37  ;;  %v582_v35 = vld [vmem:[%s5223_s21 + $0xb10] sm:$0xff]  ;;  %v597_v37 = vld [vmem:[%s5223_s21 + $0xb88] sm:$0xff] }
  0xba   : > { %2228 = vmatprep.mubr.f32.mxu0 %v1351_v36  ;;  %4302 = vmatpush3.msra.mxu1 %v516_v38  ;;  %v565_v36 = vld [vmem:[%s5223_s21 + $0xa88] sm:$0xff]  ;;  %v1367_v38 = vrot.slane %v1353_v28, %v5290_v51  ;;  %v666_v21 = vld [vmem:[%s5223_s21 + $0xdb0] sm:$0xff] }
  0xbb   : > { %2229 = vmatmul.mubr.f32.vlgmr.msra.gmra.mxu0 %v1343_v26  ;;  %2298 = vmatprep.mubr.f32.mxu1 %v1352_v39  ;;  %v567_v26 = vld [vmem:[%s5223_s21 + $0xa98] sm:$0xff]  ;;  %v549_v39 = vld [vmem:[%s5223_s21 + $0xa08] sm:$0xff]  ;;  %v218_v28 = vld [vmem:[%s5284_s27 + $0x30] sm:$0xff] }
  0xbc   : > { %4306 = vmatprep.subr.mxu0 %v579_v40  ;;  %4341 = vmatprep.subr.mxu1 %v611_v41  ;;  %v581_v40 = vld [vmem:[%s5223_s21 + $0xb08] sm:$0xff]  ;;  %v564_v41 = vld [vmem:[%s5223_s21 + $0xa80] sm:$0xff] }
  0xbd   : > { %2299 = vmatmul.mubr.f32.vlgmr.msra.gmra.mxu1 %v1350_v31  ;;  %4307 = vmatpush3.msra.mxu0 %v563_v42  ;;  %v566_v31 = vld [vmem:[%s5223_s21 + $0xa90] sm:$0xff]  ;;  %v596_v42 = vld [vmem:[%s5223_s21 + $0xb80] sm:$0xff] }
  0xbe   : > { %4342 = vmatpush3.msra.mxu1 %v595_v43  ;;  %4308 = vmatprep.subr.mxu0 %v578_v44  ;;  %v1368_v43 = vcombine.high %v1360_v33, %v1360_v33  ;;  %v548_v44 = vld [vmem:[%s5223_s21 + $0xa00] sm:$0xff] }
  0xbf   : > { %4343 = vmatprep.subr.mxu1 %v610_v45  ;;  %4309 = vmatpush3.msra.mxu0 %v562_v46  ;;  %v580_v45 = vld [vmem:[%s5223_s21 + $0xb00] sm:$0xff]  ;;  %v1369_v46 = vcombine.high %v1367_v38, %v1367_v38 }
  0xc0   : > { %4344 = vmatpush3.msra.mxu1 %v594_v47  ;;  %4310 = vmatprep.subr.mxu0 %v577_v48  ;;  %v643_v47 = vld [vmem:[%s5223_s21 + $0xcf8] sm:$0xff] }
  0xc1   : > { %4345 = vmatprep.subr.mxu1 %v609_v49  ;;  %4311 = vmatpush3.msra.mxu0 %v561_v50  ;;  %v675_v48 = vld [vmem:[%s5223_s21 + $0xdf8] sm:$0xff] }
  0xc2   : > { %4346 = vmatpush3.msra.mxu1 %v593_v52  ;;  %4312 = vmatprep.subr.mxu0 %v576_v53  ;;  %v627_v49 = vld [vmem:[%s5223_s21 + $0xc78] sm:$0xff]  ;;  %v642_v52 = vld [vmem:[%s5223_s21 + $0xcf0] sm:$0xff] }
  0xc3   : > { %4347 = vmatprep.subr.mxu1 %v608_v54  ;;  %4313 = vmatpush3.msra.mxu0 %v560_v55  ;;  %v659_v50 = vld [vmem:[%s5223_s21 + $0xd78] sm:$0xff]  ;;  %v674_v53 = vld [vmem:[%s5223_s21 + $0xdf0] sm:$0xff] }
  0xc4   : > { %4348 = vmatpush3.msra.mxu1 %v592_v56  ;;  %4314 = vmatprep.subr.mxu0 %v575_v57  ;;  %v626_v54 = vld [vmem:[%s5223_s21 + $0xc70] sm:$0xff]  ;;  %v641_v56 = vld [vmem:[%s5223_s21 + $0xce8] sm:$0xff] }
  0xc5   : > { %4349 = vmatprep.subr.mxu1 %v607_v58  ;;  %4315 = vmatpush3.msra.mxu0 %v559_v59  ;;  %v658_v55 = vld [vmem:[%s5223_s21 + $0xd70] sm:$0xff]  ;;  %v673_v57 = vld [vmem:[%s5223_s21 + $0xde8] sm:$0xff] }
  0xc6   : > { %4350 = vmatpush3.msra.mxu1 %v591_v60  ;;  %4316 = vmatprep.subr.mxu0 %v574_v61  ;;  %v625_v58 = vld [vmem:[%s5223_s21 + $0xc68] sm:$0xff]  ;;  %v640_v60 = vld [vmem:[%s5223_s21 + $0xce0] sm:$0xff] }
  0xc7   : > { %4351 = vmatprep.subr.mxu1 %v606_v62  ;;  %4317 = vmatpush3.msra.mxu0 %v558_v63  ;;  %v657_v59 = vld [vmem:[%s5223_s21 + $0xd68] sm:$0xff]  ;;  %v672_v61 = vld [vmem:[%s5223_s21 + $0xde0] sm:$0xff] }
  0xc8   : > { %4352 = vmatpush3.msra.mxu1 %v590_v0  ;;  %4318 = vmatprep.subr.mxu0 %v573_v1  ;;  %v624_v62 = vld [vmem:[%s5223_s21 + $0xc60] sm:$0xff]  ;;  %v639_v0 = vld [vmem:[%s5223_s21 + $0xcd8] sm:$0xff] }
  0xc9   : > { %4353 = vmatprep.subr.mxu1 %v605_v2  ;;  %4319 = vmatpush3.msra.mxu0 %v557_v3  ;;  %v656_v63 = vld [vmem:[%s5223_s21 + $0xd60] sm:$0xff]  ;;  %v671_v1 = vld [vmem:[%s5223_s21 + $0xdd8] sm:$0xff] }
  0xca   : > { %4354 = vmatpush3.msra.mxu1 %v589_v4  ;;  %4320 = vmatprep.subr.mxu0 %v572_v5  ;;  %v623_v2 = vld [vmem:[%s5223_s21 + $0xc58] sm:$0xff]  ;;  %v638_v4 = vld [vmem:[%s5223_s21 + $0xcd0] sm:$0xff] }
  0xcb   : > { %4355 = vmatprep.subr.mxu1 %v604_v6  ;;  %4321 = vmatpush3.msra.mxu0 %v556_v7  ;;  %v655_v3 = vld [vmem:[%s5223_s21 + $0xd58] sm:$0xff]  ;;  %v670_v5 = vld [vmem:[%s5223_s21 + $0xdd0] sm:$0xff] }
  0xcc   : > { %4356 = vmatpush3.msra.mxu1 %v588_v8  ;;  %4322 = vmatprep.subr.mxu0 %v571_v9  ;;  %v622_v6 = vld [vmem:[%s5223_s21 + $0xc50] sm:$0xff]  ;;  %v637_v8 = vld [vmem:[%s5223_s21 + $0xcc8] sm:$0xff] }
  0xcd   : > { %4357 = vmatprep.subr.mxu1 %v603_v10  ;;  %4323 = vmatpush3.msra.mxu0 %v555_v11  ;;  %v654_v7 = vld [vmem:[%s5223_s21 + $0xd50] sm:$0xff]  ;;  %v669_v9 = vld [vmem:[%s5223_s21 + $0xdc8] sm:$0xff] }
  0xce   : > { %4358 = vmatpush3.msra.mxu1 %v587_v12  ;;  %4324 = vmatprep.subr.mxu0 %v570_v13  ;;  %v621_v10 = vld [vmem:[%s5223_s21 + $0xc48] sm:$0xff]  ;;  %v636_v12 = vld [vmem:[%s5223_s21 + $0xcc0] sm:$0xff] }
  0xcf   : > { %4359 = vmatprep.subr.mxu1 %v602_v14  ;;  %4325 = vmatpush3.msra.mxu0 %v554_v15  ;;  %v653_v11 = vld [vmem:[%s5223_s21 + $0xd48] sm:$0xff]  ;;  %v668_v13 = vld [vmem:[%s5223_s21 + $0xdc0] sm:$0xff] }
  0xd0   : > { %4360 = vmatpush3.msra.mxu1 %v586_v16  ;;  %4326 = vmatprep.subr.mxu0 %v569_v17  ;;  %v620_v14 = vld [vmem:[%s5223_s21 + $0xc40] sm:$0xff]  ;;  %v635_v16 = vld [vmem:[%s5223_s21 + $0xcb8] sm:$0xff] }
  0xd1   : > { %4361 = vmatprep.subr.mxu1 %v601_v18  ;;  %4327 = vmatpush3.msra.mxu0 %v553_v19  ;;  %v652_v15 = vld [vmem:[%s5223_s21 + $0xd40] sm:$0xff]  ;;  %v667_v17 = vld [vmem:[%s5223_s21 + $0xdb8] sm:$0xff] }
  0xd2   : > { %4362 = vmatpush3.msra.mxu1 %v585_v20  ;;  %4328 = vmatprep.subr.mxu0 %v568_v22  ;;  %v619_v18 = vld [vmem:[%s5223_s21 + $0xc38] sm:$0xff]  ;;  %v634_v20 = vld [vmem:[%s5223_s21 + $0xcb0] sm:$0xff] }
  0xd3   : > { %4363 = vmatprep.subr.mxu1 %v600_v23  ;;  %4329 = vmatpush3.msra.mxu0 %v552_v24  ;;  %v651_v19 = vld [vmem:[%s5223_s21 + $0xd38] sm:$0xff]  ;;  %v618_v22 = vld [vmem:[%s5223_s21 + $0xc30] sm:$0xff]  ;;  %v633_v24 = vld [vmem:[%s5223_s21 + $0xca8] sm:$0xff] }
  0xd4   : > { %4364 = vmatpush3.msra.mxu1 %v584_v25  ;;  %4330 = vmatprep.subr.mxu0 %v567_v26  ;;  %v650_v23 = vld [vmem:[%s5223_s21 + $0xd30] sm:$0xff]  ;;  %v665_v25 = vld [vmem:[%s5223_s21 + $0xda8] sm:$0xff] }
  0xd5   : > { %4365 = vmatprep.subr.mxu1 %v599_v27  ;;  %4331 = vmatpush3.msra.mxu0 %v551_v29  ;;  %v617_v26 = vld [vmem:[%s5223_s21 + $0xc28] sm:$0xff]  ;;  %v632_v29 = vld [vmem:[%s5223_s21 + $0xca0] sm:$0xff] }
  0xd6   : > { %4366 = vmatpush3.msra.mxu1 %v583_v30  ;;  %4332 = vmatprep.subr.mxu0 %v566_v31  ;;  %v649_v27 = vld [vmem:[%s5223_s21 + $0xd28] sm:$0xff]  ;;  %v664_v30 = vld [vmem:[%s5223_s21 + $0xda0] sm:$0xff] }
  0xd7   : > { %4367 = vmatprep.subr.mxu1 %v598_v32  ;;  %4333 = vmatpush3.msra.mxu0 %v550_v34  ;;  %v616_v31 = vld [vmem:[%s5223_s21 + $0xc20] sm:$0xff]  ;;  %v663_v34 = vld [vmem:[%s5223_s21 + $0xd98] sm:$0xff] }
  0xd8   : > { %4368 = vmatpush3.msra.mxu1 %v582_v35  ;;  %4334 = vmatprep.subr.mxu0 %v565_v36  ;;  %v648_v32 = vld [vmem:[%s5223_s21 + $0xd20] sm:$0xff]  ;;  %v1370_v35 = vcombine.high %v218_v28, %v218_v28  ;;  %v615_v36 = vld [vmem:[%s5223_s21 + $0xc18] sm:$0xff] }
  0xd9   : > { %4369 = vmatprep.subr.mxu1 %v597_v37  ;;  %4335 = vmatpush3.msra.mxu0 %v549_v39  ;;  %v647_v37 = vld [vmem:[%s5223_s21 + $0xd18] sm:$0xff]  ;;  %v662_v39 = vld [vmem:[%s5223_s21 + $0xd90] sm:$0xff] }
  0xda   : > { %4370 = vmatpush3.msra.mxu1 %v581_v40  ;;  %4336 = vmatprep.subr.mxu0 %v564_v41  ;;  %v1377_v40 = vrot.slane %v218_v28, %v5290_v51  ;;  %v614_v41 = vld [vmem:[%s5223_s21 + $0xc10] sm:$0xff] }
  0xdb   : > { %4371 = vmatprep.subr.mxu1 %v596_v42  ;;  %4337 = vmatpush3.msra.mxu0 %v548_v44  ;;  %v646_v42 = vld [vmem:[%s5223_s21 + $0xd10] sm:$0xff]  ;;  %v661_v44 = vld [vmem:[%s5223_s21 + $0xd88] sm:$0xff] }
  0xdc   : > { %2368 = vmatprep.mubr.f32.mxu0 %v1368_v43  ;;  %4372 = vmatpush3.msra.mxu1 %v580_v45  ;;  %v629_v43 = vld [vmem:[%s5223_s21 + $0xc88] sm:$0xff]  ;;  %v1384_v45 = vrot.slane %v1370_v35, %v5290_v51  ;;  %v730_v28 = vld [vmem:[%s5223_s21 + $0xfb0] sm:$0xff]  ;;  %v219_v35 = vld [vmem:[%s5284_s27 + $0x38] sm:$0xff] }
  0xdd   : > { %2369 = vmatmul.mubr.f32.vlgmr.msra.gmra.mxu0 %v1360_v33  ;;  %2438 = vmatprep.mubr.f32.mxu1 %v1369_v46  ;;  %v631_v33 = vld [vmem:[%s5223_s21 + $0xc98] sm:$0xff]  ;;  %v613_v46 = vld [vmem:[%s5223_s21 + $0xc08] sm:$0xff] }
  0xde   : > { %4376 = vmatprep.subr.mxu0 %v643_v47  ;;  %4411 = vmatprep.subr.mxu1 %v675_v48  ;;  %v645_v47 = vld [vmem:[%s5223_s21 + $0xd08] sm:$0xff]  ;;  %v628_v48 = vld [vmem:[%s5223_s21 + $0xc80] sm:$0xff] }
  0xdf   : > { %2439 = vmatmul.mubr.f32.vlgmr.msra.gmra.mxu1 %v1367_v38  ;;  %4377 = vmatpush3.msra.mxu0 %v627_v49  ;;  %v630_v38 = vld [vmem:[%s5223_s21 + $0xc90] sm:$0xff]  ;;  %v660_v49 = vld [vmem:[%s5223_s21 + $0xd80] sm:$0xff] }
  0xe0   : > { %4412 = vmatpush3.msra.mxu1 %v659_v50  ;;  %4378 = vmatprep.subr.mxu0 %v642_v52  ;;  %v1385_v50 = vcombine.high %v1377_v40, %v1377_v40  ;;  %v612_v52 = vld [vmem:[%s5223_s21 + $0xc00] sm:$0xff] }
  0xe1   : > { %4413 = vmatprep.subr.mxu1 %v674_v53  ;;  %4379 = vmatpush3.msra.mxu0 %v626_v54  ;;  %v644_v53 = vld [vmem:[%s5223_s21 + $0xd00] sm:$0xff]  ;;  %v1386_v54 = vcombine.high %v1384_v45, %v1384_v45 }
  0xe2   : > { %4414 = vmatpush3.msra.mxu1 %v658_v55  ;;  %4380 = vmatprep.subr.mxu0 %v641_v56  ;;  %v707_v55 = vld [vmem:[%s5223_s21 + $0xef8] sm:$0xff] }
  0xe3   : > { %4415 = vmatprep.subr.mxu1 %v673_v57  ;;  %4381 = vmatpush3.msra.mxu0 %v625_v58  ;;  %v739_v56 = vld [vmem:[%s5223_s21 + $0xff8] sm:$0xff] }
  0xe4   : > { %4416 = vmatpush3.msra.mxu1 %v657_v59  ;;  %4382 = vmatprep.subr.mxu0 %v640_v60  ;;  %v691_v57 = vld [vmem:[%s5223_s21 + $0xe78] sm:$0xff]  ;;  %v706_v59 = vld [vmem:[%s5223_s21 + $0xef0] sm:$0xff] }
  0xe5   : > { %4417 = vmatprep.subr.mxu1 %v672_v61  ;;  %4383 = vmatpush3.msra.mxu0 %v624_v62  ;;  %v723_v58 = vld [vmem:[%s5223_s21 + $0xf78] sm:$0xff]  ;;  %v738_v60 = vld [vmem:[%s5223_s21 + $0xff0] sm:$0xff] }
  0xe6   : > { %4418 = vmatpush3.msra.mxu1 %v656_v63  ;;  %4384 = vmatprep.subr.mxu0 %v639_v0  ;;  %v690_v61 = vld [vmem:[%s5223_s21 + $0xe70] sm:$0xff]  ;;  %v705_v63 = vld [vmem:[%s5223_s21 + $0xee8] sm:$0xff] }
  0xe7   : > { %4419 = vmatprep.subr.mxu1 %v671_v1  ;;  %4385 = vmatpush3.msra.mxu0 %v623_v2  ;;  %v722_v62 = vld [vmem:[%s5223_s21 + $0xf70] sm:$0xff]  ;;  %v737_v0 = vld [vmem:[%s5223_s21 + $0xfe8] sm:$0xff] }
  0xe8   : > { %4420 = vmatpush3.msra.mxu1 %v655_v3  ;;  %4386 = vmatprep.subr.mxu0 %v638_v4  ;;  %v689_v1 = vld [vmem:[%s5223_s21 + $0xe68] sm:$0xff]  ;;  %v704_v3 = vld [vmem:[%s5223_s21 + $0xee0] sm:$0xff] }
  0xe9   : > { %4421 = vmatprep.subr.mxu1 %v670_v5  ;;  %4387 = vmatpush3.msra.mxu0 %v622_v6  ;;  %v721_v2 = vld [vmem:[%s5223_s21 + $0xf68] sm:$0xff]  ;;  %v736_v4 = vld [vmem:[%s5223_s21 + $0xfe0] sm:$0xff] }
  0xea   : > { %4422 = vmatpush3.msra.mxu1 %v654_v7  ;;  %4388 = vmatprep.subr.mxu0 %v637_v8  ;;  %v688_v5 = vld [vmem:[%s5223_s21 + $0xe60] sm:$0xff]  ;;  %v703_v7 = vld [vmem:[%s5223_s21 + $0xed8] sm:$0xff] }
  0xeb   : > { %4423 = vmatprep.subr.mxu1 %v669_v9  ;;  %4389 = vmatpush3.msra.mxu0 %v621_v10  ;;  %v720_v6 = vld [vmem:[%s5223_s21 + $0xf60] sm:$0xff]  ;;  %v735_v8 = vld [vmem:[%s5223_s21 + $0xfd8] sm:$0xff] }
  0xec   : > { %4424 = vmatpush3.msra.mxu1 %v653_v11  ;;  %4390 = vmatprep.subr.mxu0 %v636_v12  ;;  %v687_v9 = vld [vmem:[%s5223_s21 + $0xe58] sm:$0xff]  ;;  %v702_v11 = vld [vmem:[%s5223_s21 + $0xed0] sm:$0xff] }
  0xed   : > { %4425 = vmatprep.subr.mxu1 %v668_v13  ;;  %4391 = vmatpush3.msra.mxu0 %v620_v14  ;;  %v719_v10 = vld [vmem:[%s5223_s21 + $0xf58] sm:$0xff]  ;;  %v734_v12 = vld [vmem:[%s5223_s21 + $0xfd0] sm:$0xff] }
  0xee   : > { %4426 = vmatpush3.msra.mxu1 %v652_v15  ;;  %4392 = vmatprep.subr.mxu0 %v635_v16  ;;  %v686_v13 = vld [vmem:[%s5223_s21 + $0xe50] sm:$0xff]  ;;  %v701_v15 = vld [vmem:[%s5223_s21 + $0xec8] sm:$0xff] }
  0xef   : > { %4427 = vmatprep.subr.mxu1 %v667_v17  ;;  %4393 = vmatpush3.msra.mxu0 %v619_v18  ;;  %v718_v14 = vld [vmem:[%s5223_s21 + $0xf50] sm:$0xff]  ;;  %v733_v16 = vld [vmem:[%s5223_s21 + $0xfc8] sm:$0xff] }
  0xf0   : > { %4428 = vmatpush3.msra.mxu1 %v651_v19  ;;  %4394 = vmatprep.subr.mxu0 %v634_v20  ;;  %v685_v17 = vld [vmem:[%s5223_s21 + $0xe48] sm:$0xff]  ;;  %v700_v19 = vld [vmem:[%s5223_s21 + $0xec0] sm:$0xff] }
  0xf1   : > { %4429 = vmatprep.subr.mxu1 %v666_v21  ;;  %4395 = vmatpush3.msra.mxu0 %v618_v22  ;;  %v717_v18 = vld [vmem:[%s5223_s21 + $0xf48] sm:$0xff]  ;;  %v732_v20 = vld [vmem:[%s5223_s21 + $0xfc0] sm:$0xff] }
  0xf2   : > { %4430 = vmatpush3.msra.mxu1 %v650_v23  ;;  %4396 = vmatprep.subr.mxu0 %v633_v24  ;;  %v684_v21 = vld [vmem:[%s5223_s21 + $0xe40] sm:$0xff]  ;;  %v699_v23 = vld [vmem:[%s5223_s21 + $0xeb8] sm:$0xff] }
  0xf3   : > { %4431 = vmatprep.subr.mxu1 %v665_v25  ;;  %4397 = vmatpush3.msra.mxu0 %v617_v26  ;;  %v716_v22 = vld [vmem:[%s5223_s21 + $0xf40] sm:$0xff]  ;;  %v731_v24 = vld [vmem:[%s5223_s21 + $0xfb8] sm:$0xff] }
  0xf4   : > { %4432 = vmatpush3.msra.mxu1 %v649_v27  ;;  %4398 = vmatprep.subr.mxu0 %v632_v29  ;;  %v683_v25 = vld [vmem:[%s5223_s21 + $0xe38] sm:$0xff]  ;;  %v698_v27 = vld [vmem:[%s5223_s21 + $0xeb0] sm:$0xff] }
  0xf5   : > { %4433 = vmatprep.subr.mxu1 %v664_v30  ;;  %4399 = vmatpush3.msra.mxu0 %v616_v31  ;;  %v715_v26 = vld [vmem:[%s5223_s21 + $0xf38] sm:$0xff]  ;;  %v682_v29 = vld [vmem:[%s5223_s21 + $0xe30] sm:$0xff]  ;;  %v697_v31 = vld [vmem:[%s5223_s21 + $0xea8] sm:$0xff] }
  0xf6   : > { %4434 = vmatpush3.msra.mxu1 %v648_v32  ;;  %4400 = vmatprep.subr.mxu0 %v631_v33  ;;  %v714_v30 = vld [vmem:[%s5223_s21 + $0xf30] sm:$0xff]  ;;  %v729_v32 = vld [vmem:[%s5223_s21 + $0xfa8] sm:$0xff] }
  0xf7   : > { %4435 = vmatprep.subr.mxu1 %v663_v34  ;;  %4401 = vmatpush3.msra.mxu0 %v615_v36  ;;  %v681_v33 = vld [vmem:[%s5223_s21 + $0xe28] sm:$0xff]  ;;  %v696_v36 = vld [vmem:[%s5223_s21 + $0xea0] sm:$0xff] }
  0xf8   : > { %4436 = vmatpush3.msra.mxu1 %v647_v37  ;;  %4402 = vmatprep.subr.mxu0 %v630_v38  ;;  %v713_v34 = vld [vmem:[%s5223_s21 + $0xf28] sm:$0xff]  ;;  %v728_v37 = vld [vmem:[%s5223_s21 + $0xfa0] sm:$0xff] }
  0xf9   : > { %4437 = vmatprep.subr.mxu1 %v662_v39  ;;  %4403 = vmatpush3.msra.mxu0 %v614_v41  ;;  %v680_v38 = vld [vmem:[%s5223_s21 + $0xe20] sm:$0xff]  ;;  %v727_v41 = vld [vmem:[%s5223_s21 + $0xf98] sm:$0xff] }
  0xfa   : > { %4438 = vmatpush3.msra.mxu1 %v646_v42  ;;  %4404 = vmatprep.subr.mxu0 %v629_v43  ;;  %v712_v39 = vld [vmem:[%s5223_s21 + $0xf20] sm:$0xff]  ;;  %v1387_v42 = vcombine.high %v219_v35, %v219_v35  ;;  %v679_v43 = vld [vmem:[%s5223_s21 + $0xe18] sm:$0xff] }
  0xfb   : > { %4439 = vmatprep.subr.mxu1 %v661_v44  ;;  %4405 = vmatpush3.msra.mxu0 %v613_v46  ;;  %v711_v44 = vld [vmem:[%s5223_s21 + $0xf18] sm:$0xff]  ;;  %v726_v46 = vld [vmem:[%s5223_s21 + $0xf90] sm:$0xff] }
  0xfc   : > { %4440 = vmatpush3.msra.mxu1 %v645_v47  ;;  %4406 = vmatprep.subr.mxu0 %v628_v48  ;;  %v1394_v47 = vrot.slane %v219_v35, %v5290_v51  ;;  %v678_v48 = vld [vmem:[%s5223_s21 + $0xe10] sm:$0xff] }
  0xfd   : > { %4441 = vmatprep.subr.mxu1 %v660_v49  ;;  %4407 = vmatpush3.msra.mxu0 %v612_v52  ;;  %v710_v49 = vld [vmem:[%s5223_s21 + $0xf10] sm:$0xff]  ;;  %v725_v52 = vld [vmem:[%s5223_s21 + $0xf88] sm:$0xff] }
  0xfe   : > { %2508 = vmatprep.mubr.f32.mxu0 %v1385_v50  ;;  %4442 = vmatpush3.msra.mxu1 %v644_v53  ;;  %v693_v50 = vld [vmem:[%s5223_s21 + $0xe88] sm:$0xff]  ;;  %v1401_v53 = vrot.slane %v1387_v42, %v5290_v51  ;;  %v794_v35 = vld [vmem:[%s5223_s21 + $0x11b0] sm:$0xff]  ;;  %v220_v42 = vld [vmem:[%s5284_s27 + $0x40] sm:$0xff] }
  0xff   : > { %2509 = vmatmul.mubr.f32.vlgmr.msra.gmra.mxu0 %v1377_v40  ;;  %2578 = vmatprep.mubr.f32.mxu1 %v1386_v54  ;;  %v695_v40 = vld [vmem:[%s5223_s21 + $0xe98] sm:$0xff]  ;;  %v677_v54 = vld [vmem:[%s5223_s21 + $0xe08] sm:$0xff] }
 0x100   : > { %4446 = vmatprep.subr.mxu0 %v707_v55  ;;  %4481 = vmatprep.subr.mxu1 %v739_v56  ;;  %v709_v55 = vld [vmem:[%s5223_s21 + $0xf08] sm:$0xff]  ;;  %v692_v56 = vld [vmem:[%s5223_s21 + $0xe80] sm:$0xff] }
 0x101   : > { %2579 = vmatmul.mubr.f32.vlgmr.msra.gmra.mxu1 %v1384_v45  ;;  %4447 = vmatpush3.msra.mxu0 %v691_v57  ;;  %v694_v45 = vld [vmem:[%s5223_s21 + $0xe90] sm:$0xff]  ;;  %v724_v57 = vld [vmem:[%s5223_s21 + $0xf80] sm:$0xff] }
 0x102   : > { %4482 = vmatpush3.msra.mxu1 %v723_v58  ;;  %4448 = vmatprep.subr.mxu0 %v706_v59  ;;  %v1402_v58 = vcombine.high %v1394_v47, %v1394_v47  ;;  %v676_v59 = vld [vmem:[%s5223_s21 + $0xe00] sm:$0xff] }
 0x103   : > { %4483 = vmatprep.subr.mxu1 %v738_v60  ;;  %4449 = vmatpush3.msra.mxu0 %v690_v61  ;;  %v708_v60 = vld [vmem:[%s5223_s21 + $0xf00] sm:$0xff]  ;;  %v1403_v61 = vcombine.high %v1401_v53, %v1401_v53 }
 0x104   : > { %4484 = vmatpush3.msra.mxu1 %v722_v62  ;;  %4450 = vmatprep.subr.mxu0 %v705_v63  ;;  %v771_v62 = vld [vmem:[%s5223_s21 + $0x10f8] sm:$0xff] }
 0x105   : > { %4485 = vmatprep.subr.mxu1 %v737_v0  ;;  %4451 = vmatpush3.msra.mxu0 %v689_v1  ;;  %v803_v63 = vld [vmem:[%s5223_s21 + $0x11f8] sm:$0xff] }
 0x106   : > { %4486 = vmatpush3.msra.mxu1 %v721_v2  ;;  %4452 = vmatprep.subr.mxu0 %v704_v3  ;;  %v755_v0 = vld [vmem:[%s5223_s21 + $0x1078] sm:$0xff]  ;;  %v770_v2 = vld [vmem:[%s5223_s21 + $0x10f0] sm:$0xff] }
 0x107   : > { %4487 = vmatprep.subr.mxu1 %v736_v4  ;;  %4453 = vmatpush3.msra.mxu0 %v688_v5  ;;  %v787_v1 = vld [vmem:[%s5223_s21 + $0x1178] sm:$0xff]  ;;  %v802_v3 = vld [vmem:[%s5223_s21 + $0x11f0] sm:$0xff] }
 0x108   : > { %4488 = vmatpush3.msra.mxu1 %v720_v6  ;;  %4454 = vmatprep.subr.mxu0 %v703_v7  ;;  %v754_v4 = vld [vmem:[%s5223_s21 + $0x1070] sm:$0xff]  ;;  %v769_v6 = vld [vmem:[%s5223_s21 + $0x10e8] sm:$0xff] }
 0x109   : > { %4489 = vmatprep.subr.mxu1 %v735_v8  ;;  %4455 = vmatpush3.msra.mxu0 %v687_v9  ;;  %v786_v5 = vld [vmem:[%s5223_s21 + $0x1170] sm:$0xff]  ;;  %v801_v7 = vld [vmem:[%s5223_s21 + $0x11e8] sm:$0xff] }
 0x10a   : > { %4490 = vmatpush3.msra.mxu1 %v719_v10  ;;  %4456 = vmatprep.subr.mxu0 %v702_v11  ;;  %v753_v8 = vld [vmem:[%s5223_s21 + $0x1068] sm:$0xff]  ;;  %v768_v10 = vld [vmem:[%s5223_s21 + $0x10e0] sm:$0xff] }
 0x10b   : > { %4491 = vmatprep.subr.mxu1 %v734_v12  ;;  %4457 = vmatpush3.msra.mxu0 %v686_v13  ;;  %v785_v9 = vld [vmem:[%s5223_s21 + $0x1168] sm:$0xff]  ;;  %v800_v11 = vld [vmem:[%s5223_s21 + $0x11e0] sm:$0xff] }
 0x10c   : > { %4492 = vmatpush3.msra.mxu1 %v718_v14  ;;  %4458 = vmatprep.subr.mxu0 %v701_v15  ;;  %v752_v12 = vld [vmem:[%s5223_s21 + $0x1060] sm:$0xff]  ;;  %v767_v14 = vld [vmem:[%s5223_s21 + $0x10d8] sm:$0xff] }
 0x10d   : > { %4493 = vmatprep.subr.mxu1 %v733_v16  ;;  %4459 = vmatpush3.msra.mxu0 %v685_v17  ;;  %v784_v13 = vld [vmem:[%s5223_s21 + $0x1160] sm:$0xff]  ;;  %v799_v15 = vld [vmem:[%s5223_s21 + $0x11d8] sm:$0xff] }
 0x10e   : > { %4494 = vmatpush3.msra.mxu1 %v717_v18  ;;  %4460 = vmatprep.subr.mxu0 %v700_v19  ;;  %v751_v16 = vld [vmem:[%s5223_s21 + $0x1058] sm:$0xff]  ;;  %v766_v18 = vld [vmem:[%s5223_s21 + $0x10d0] sm:$0xff] }
 0x10f   : > { %4495 = vmatprep.subr.mxu1 %v732_v20  ;;  %4461 = vmatpush3.msra.mxu0 %v684_v21  ;;  %v783_v17 = vld [vmem:[%s5223_s21 + $0x1158] sm:$0xff]  ;;  %v798_v19 = vld [vmem:[%s5223_s21 + $0x11d0] sm:$0xff] }
 0x110   : > { %4496 = vmatpush3.msra.mxu1 %v716_v22  ;;  %4462 = vmatprep.subr.mxu0 %v699_v23  ;;  %v750_v20 = vld [vmem:[%s5223_s21 + $0x1050] sm:$0xff]  ;;  %v765_v22 = vld [vmem:[%s5223_s21 + $0x10c8] sm:$0xff] }
 0x111   : > { %4497 = vmatprep.subr.mxu1 %v731_v24  ;;  %4463 = vmatpush3.msra.mxu0 %v683_v25  ;;  %v782_v21 = vld [vmem:[%s5223_s21 + $0x1150] sm:$0xff]  ;;  %v797_v23 = vld [vmem:[%s5223_s21 + $0x11c8] sm:$0xff] }
 0x112   : > { %4498 = vmatpush3.msra.mxu1 %v715_v26  ;;  %4464 = vmatprep.subr.mxu0 %v698_v27  ;;  %v749_v24 = vld [vmem:[%s5223_s21 + $0x1048] sm:$0xff]  ;;  %v764_v26 = vld [vmem:[%s5223_s21 + $0x10c0] sm:$0xff] }
 0x113   : > { %4499 = vmatprep.subr.mxu1 %v730_v28  ;;  %4465 = vmatpush3.msra.mxu0 %v682_v29  ;;  %v781_v25 = vld [vmem:[%s5223_s21 + $0x1148] sm:$0xff]  ;;  %v796_v27 = vld [vmem:[%s5223_s21 + $0x11c0] sm:$0xff] }
 0x114   : > { %4500 = vmatpush3.msra.mxu1 %v714_v30  ;;  %4466 = vmatprep.subr.mxu0 %v697_v31  ;;  %v748_v28 = vld [vmem:[%s5223_s21 + $0x1040] sm:$0xff]  ;;  %v763_v30 = vld [vmem:[%s5223_s21 + $0x10b8] sm:$0xff] }
 0x115   : > { %4501 = vmatprep.subr.mxu1 %v729_v32  ;;  %4467 = vmatpush3.msra.mxu0 %v681_v33  ;;  %v780_v29 = vld [vmem:[%s5223_s21 + $0x1140] sm:$0xff]  ;;  %v795_v31 = vld [vmem:[%s5223_s21 + $0x11b8] sm:$0xff] }
 0x116   : > { %4502 = vmatpush3.msra.mxu1 %v713_v34  ;;  %4468 = vmatprep.subr.mxu0 %v696_v36  ;;  %v747_v32 = vld [vmem:[%s5223_s21 + $0x1038] sm:$0xff]  ;;  %v762_v34 = vld [vmem:[%s5223_s21 + $0x10b0] sm:$0xff] }
 0x117   : > { %4503 = vmatprep.subr.mxu1 %v728_v37  ;;  %4469 = vmatpush3.msra.mxu0 %v680_v38  ;;  %v779_v33 = vld [vmem:[%s5223_s21 + $0x1138] sm:$0xff]  ;;  %v746_v36 = vld [vmem:[%s5223_s21 + $0x1030] sm:$0xff]  ;;  %v761_v38 = vld [vmem:[%s5223_s21 + $0x10a8] sm:$0xff] }
 0x118   : > { %4504 = vmatpush3.msra.mxu1 %v712_v39  ;;  %4470 = vmatprep.subr.mxu0 %v695_v40  ;;  %v778_v37 = vld [vmem:[%s5223_s21 + $0x1130] sm:$0xff]  ;;  %v793_v39 = vld [vmem:[%s5223_s21 + $0x11a8] sm:$0xff] }
 0x119   : > { %4505 = vmatprep.subr.mxu1 %v727_v41  ;;  %4471 = vmatpush3.msra.mxu0 %v679_v43  ;;  %v745_v40 = vld [vmem:[%s5223_s21 + $0x1028] sm:$0xff]  ;;  %v760_v43 = vld [vmem:[%s5223_s21 + $0x10a0] sm:$0xff] }
 0x11a   : > { %4506 = vmatpush3.msra.mxu1 %v711_v44  ;;  %4472 = vmatprep.subr.mxu0 %v694_v45  ;;  %v777_v41 = vld [vmem:[%s5223_s21 + $0x1128] sm:$0xff]  ;;  %v792_v44 = vld [vmem:[%s5223_s21 + $0x11a0] sm:$0xff] }
 0x11b   : > { %4507 = vmatprep.subr.mxu1 %v726_v46  ;;  %4473 = vmatpush3.msra.mxu0 %v678_v48  ;;  %v744_v45 = vld [vmem:[%s5223_s21 + $0x1020] sm:$0xff]  ;;  %v791_v48 = vld [vmem:[%s5223_s21 + $0x1198] sm:$0xff] }
 0x11c   : > { %4508 = vmatpush3.msra.mxu1 %v710_v49  ;;  %4474 = vmatprep.subr.mxu0 %v693_v50  ;;  %v776_v46 = vld [vmem:[%s5223_s21 + $0x1120] sm:$0xff]  ;;  %v1404_v49 = vcombine.high %v220_v42, %v220_v42  ;;  %v743_v50 = vld [vmem:[%s5223_s21 + $0x1018] sm:$0xff] }
 0x11d   : > { %4509 = vmatprep.subr.mxu1 %v725_v52  ;;  %4475 = vmatpush3.msra.mxu0 %v677_v54  ;;  %v775_v52 = vld [vmem:[%s5223_s21 + $0x1118] sm:$0xff]  ;;  %v790_v54 = vld [vmem:[%s5223_s21 + $0x1190] sm:$0xff] }
 0x11e   : > { %4510 = vmatpush3.msra.mxu1 %v709_v55  ;;  %4476 = vmatprep.subr.mxu0 %v692_v56  ;;  %v1411_v55 = vrot.slane %v220_v42, %v5290_v51  ;;  %v742_v56 = vld [vmem:[%s5223_s21 + $0x1010] sm:$0xff] }
 0x11f   : > { %4511 = vmatprep.subr.mxu1 %v724_v57  ;;  %4477 = vmatpush3.msra.mxu0 %v676_v59  ;;  %v774_v57 = vld [vmem:[%s5223_s21 + $0x1110] sm:$0xff]  ;;  %v789_v59 = vld [vmem:[%s5223_s21 + $0x1188] sm:$0xff] }
 0x120   : > { %2648 = vmatprep.mubr.f32.mxu0 %v1402_v58  ;;  %4512 = vmatpush3.msra.mxu1 %v708_v60  ;;  %v757_v58 = vld [vmem:[%s5223_s21 + $0x1088] sm:$0xff]  ;;  %v1418_v60 = vrot.slane %v1404_v49, %v5290_v51  ;;  %v858_v42 = vld [vmem:[%s5223_s21 + $0x13b0] sm:$0xff] }
 0x121   : > { %2649 = vmatmul.mubr.f32.vlgmr.msra.gmra.mxu0 %v1394_v47  ;;  %2718 = vmatprep.mubr.f32.mxu1 %v1403_v61  ;;  %v759_v47 = vld [vmem:[%s5223_s21 + $0x1098] sm:$0xff]  ;;  %v741_v61 = vld [vmem:[%s5223_s21 + $0x1008] sm:$0xff] }
 0x122   : > { %4516 = vmatprep.subr.mxu0 %v771_v62  ;;  %4551 = vmatprep.subr.mxu1 %v803_v63  ;;  %v773_v62 = vld [vmem:[%s5223_s21 + $0x1108] sm:$0xff]  ;;  %v756_v63 = vld [vmem:[%s5223_s21 + $0x1080] sm:$0xff] }
 0x123   : > { %2719 = vmatmul.mubr.f32.vlgmr.msra.gmra.mxu1 %v1401_v53  ;;  %4517 = vmatpush3.msra.mxu0 %v755_v0  ;;  %v758_v53 = vld [vmem:[%s5223_s21 + $0x1090] sm:$0xff]  ;;  %v788_v0 = vld [vmem:[%s5223_s21 + $0x1180] sm:$0xff]  ;;  %v221_v49 = vld [vmem:[%s5284_s27 + $0x48] sm:$0xff] }
 0x124   : > { %4552 = vmatpush3.msra.mxu1 %v787_v1  ;;  %4518 = vmatprep.subr.mxu0 %v770_v2  ;;  %v1419_v1 = vcombine.high %v1411_v55, %v1411_v55  ;;  %v740_v2 = vld [vmem:[%s5223_s21 + $0x1000] sm:$0xff] }
 0x125   : > { %4553 = vmatprep.subr.mxu1 %v802_v3  ;;  %4519 = vmatpush3.msra.mxu0 %v754_v4  ;;  %v772_v3 = vld [vmem:[%s5223_s21 + $0x1100] sm:$0xff]  ;;  %v1420_v4 = vcombine.high %v1418_v60, %v1418_v60 }
 0x126   : > { %4554 = vmatpush3.msra.mxu1 %v786_v5  ;;  %4520 = vmatprep.subr.mxu0 %v769_v6  ;;  %v835_v5 = vld [vmem:[%s5223_s21 + $0x12f8] sm:$0xff] }
 0x127   : > { %4555 = vmatprep.subr.mxu1 %v801_v7  ;;  %4521 = vmatpush3.msra.mxu0 %v753_v8  ;;  %v867_v6 = vld [vmem:[%s5223_s21 + $0x13f8] sm:$0xff] }
 0x128   : > { %4556 = vmatpush3.msra.mxu1 %v785_v9  ;;  %4522 = vmatprep.subr.mxu0 %v768_v10  ;;  %v819_v7 = vld [vmem:[%s5223_s21 + $0x1278] sm:$0xff]  ;;  %v834_v9 = vld [vmem:[%s5223_s21 + $0x12f0] sm:$0xff] }
 0x129   : > { %4557 = vmatprep.subr.mxu1 %v800_v11  ;;  %4523 = vmatpush3.msra.mxu0 %v752_v12  ;;  %v851_v8 = vld [vmem:[%s5223_s21 + $0x1378] sm:$0xff]  ;;  %v866_v10 = vld [vmem:[%s5223_s21 + $0x13f0] sm:$0xff] }
 0x12a   : > { %4558 = vmatpush3.msra.mxu1 %v784_v13  ;;  %4524 = vmatprep.subr.mxu0 %v767_v14  ;;  %v818_v11 = vld [vmem:[%s5223_s21 + $0x1270] sm:$0xff]  ;;  %v833_v13 = vld [vmem:[%s5223_s21 + $0x12e8] sm:$0xff] }
 0x12b   : > { %4559 = vmatprep.subr.mxu1 %v799_v15  ;;  %4525 = vmatpush3.msra.mxu0 %v751_v16  ;;  %v850_v12 = vld [vmem:[%s5223_s21 + $0x1370] sm:$0xff]  ;;  %v865_v14 = vld [vmem:[%s5223_s21 + $0x13e8] sm:$0xff] }
 0x12c   : > { %4560 = vmatpush3.msra.mxu1 %v783_v17  ;;  %4526 = vmatprep.subr.mxu0 %v766_v18  ;;  %v817_v15 = vld [vmem:[%s5223_s21 + $0x1268] sm:$0xff]  ;;  %v832_v17 = vld [vmem:[%s5223_s21 + $0x12e0] sm:$0xff] }
 0x12d   : > { %4561 = vmatprep.subr.mxu1 %v798_v19  ;;  %4527 = vmatpush3.msra.mxu0 %v750_v20  ;;  %v849_v16 = vld [vmem:[%s5223_s21 + $0x1368] sm:$0xff]  ;;  %v864_v18 = vld [vmem:[%s5223_s21 + $0x13e0] sm:$0xff] }
 0x12e   : > { %4562 = vmatpush3.msra.mxu1 %v782_v21  ;;  %4528 = vmatprep.subr.mxu0 %v765_v22  ;;  %v816_v19 = vld [vmem:[%s5223_s21 + $0x1260] sm:$0xff]  ;;  %v831_v21 = vld [vmem:[%s5223_s21 + $0x12d8] sm:$0xff] }
 0x12f   : > { %4563 = vmatprep.subr.mxu1 %v797_v23  ;;  %4529 = vmatpush3.msra.mxu0 %v749_v24  ;;  %v848_v20 = vld [vmem:[%s5223_s21 + $0x1360] sm:$0xff]  ;;  %v863_v22 = vld [vmem:[%s5223_s21 + $0x13d8] sm:$0xff] }
 0x130   : > { %4564 = vmatpush3.msra.mxu1 %v781_v25  ;;  %4530 = vmatprep.subr.mxu0 %v764_v26  ;;  %v815_v23 = vld [vmem:[%s5223_s21 + $0x1258] sm:$0xff]  ;;  %v830_v25 = vld [vmem:[%s5223_s21 + $0x12d0] sm:$0xff] }
 0x131   : > { %4565 = vmatprep.subr.mxu1 %v796_v27  ;;  %4531 = vmatpush3.msra.mxu0 %v748_v28  ;;  %v847_v24 = vld [vmem:[%s5223_s21 + $0x1358] sm:$0xff]  ;;  %v862_v26 = vld [vmem:[%s5223_s21 + $0x13d0] sm:$0xff] }
 0x132   : > { %4566 = vmatpush3.msra.mxu1 %v780_v29  ;;  %4532 = vmatprep.subr.mxu0 %v763_v30  ;;  %v814_v27 = vld [vmem:[%s5223_s21 + $0x1250] sm:$0xff]  ;;  %v829_v29 = vld [vmem:[%s5223_s21 + $0x12c8] sm:$0xff] }
 0x133   : > { %4567 = vmatprep.subr.mxu1 %v795_v31  ;;  %4533 = vmatpush3.msra.mxu0 %v747_v32  ;;  %v846_v28 = vld [vmem:[%s5223_s21 + $0x1350] sm:$0xff]  ;;  %v861_v30 = vld [vmem:[%s5223_s21 + $0x13c8] sm:$0xff] }
 0x134   : > { %4568 = vmatpush3.msra.mxu1 %v779_v33  ;;  %4534 = vmatprep.subr.mxu0 %v762_v34  ;;  %v813_v31 = vld [vmem:[%s5223_s21 + $0x1248] sm:$0xff]  ;;  %v828_v33 = vld [vmem:[%s5223_s21 + $0x12c0] sm:$0xff] }
 0x135   : > { %4569 = vmatprep.subr.mxu1 %v794_v35  ;;  %4535 = vmatpush3.msra.mxu0 %v746_v36  ;;  %v845_v32 = vld [vmem:[%s5223_s21 + $0x1348] sm:$0xff]  ;;  %v860_v34 = vld [vmem:[%s5223_s21 + $0x13c0] sm:$0xff] }
 0x136   : > { %4570 = vmatpush3.msra.mxu1 %v778_v37  ;;  %4536 = vmatprep.subr.mxu0 %v761_v38  ;;  %v812_v35 = vld [vmem:[%s5223_s21 + $0x1240] sm:$0xff]  ;;  %v827_v37 = vld [vmem:[%s5223_s21 + $0x12b8] sm:$0xff] }
 0x137   : > { %4571 = vmatprep.subr.mxu1 %v793_v39  ;;  %4537 = vmatpush3.msra.mxu0 %v745_v40  ;;  %v844_v36 = vld [vmem:[%s5223_s21 + $0x1340] sm:$0xff]  ;;  %v859_v38 = vld [vmem:[%s5223_s21 + $0x13b8] sm:$0xff] }
 0x138   : > { %4572 = vmatpush3.msra.mxu1 %v777_v41  ;;  %4538 = vmatprep.subr.mxu0 %v760_v43  ;;  %v811_v39 = vld [vmem:[%s5223_s21 + $0x1238] sm:$0xff]  ;;  %v826_v41 = vld [vmem:[%s5223_s21 + $0x12b0] sm:$0xff] }
 0x139   : > { %4573 = vmatprep.subr.mxu1 %v792_v44  ;;  %4539 = vmatpush3.msra.mxu0 %v744_v45  ;;  %v843_v40 = vld [vmem:[%s5223_s21 + $0x1338] sm:$0xff]  ;;  %v810_v43 = vld [vmem:[%s5223_s21 + $0x1230] sm:$0xff]  ;;  %v825_v45 = vld [vmem:[%s5223_s21 + $0x12a8] sm:$0xff] }
 0x13a   : > { %4574 = vmatpush3.msra.mxu1 %v776_v46  ;;  %4540 = vmatprep.subr.mxu0 %v759_v47  ;;  %v842_v44 = vld [vmem:[%s5223_s21 + $0x1330] sm:$0xff]  ;;  %v857_v46 = vld [vmem:[%s5223_s21 + $0x13a8] sm:$0xff] }
 0x13b   : > { %4575 = vmatprep.subr.mxu1 %v791_v48  ;;  %4541 = vmatpush3.msra.mxu0 %v743_v50  ;;  %v809_v47 = vld [vmem:[%s5223_s21 + $0x1228] sm:$0xff]  ;;  %v824_v50 = vld [vmem:[%s5223_s21 + $0x12a0] sm:$0xff] }
 0x13c   : > { %4576 = vmatpush3.msra.mxu1 %v775_v52  ;;  %4542 = vmatprep.subr.mxu0 %v758_v53  ;;  %v841_v48 = vld [vmem:[%s5223_s21 + $0x1328] sm:$0xff]  ;;  %v856_v52 = vld [vmem:[%s5223_s21 + $0x13a0] sm:$0xff] }
 0x13d   : > { %4577 = vmatprep.subr.mxu1 %v790_v54  ;;  %4543 = vmatpush3.msra.mxu0 %v742_v56  ;;  %v808_v53 = vld [vmem:[%s5223_s21 + $0x1220] sm:$0xff]  ;;  %v855_v56 = vld [vmem:[%s5223_s21 + $0x1398] sm:$0xff] }
 0x13e   : > { %4578 = vmatpush3.msra.mxu1 %v774_v57  ;;  %4544 = vmatprep.subr.mxu0 %v757_v58  ;;  %v840_v54 = vld [vmem:[%s5223_s21 + $0x1320] sm:$0xff]  ;;  %v1421_v57 = vcombine.high %v221_v49, %v221_v49  ;;  %v807_v58 = vld [vmem:[%s5223_s21 + $0x1218] sm:$0xff] }
 0x13f   : > { %4579 = vmatprep.subr.mxu1 %v789_v59  ;;  %4545 = vmatpush3.msra.mxu0 %v741_v61  ;;  %v839_v59 = vld [vmem:[%s5223_s21 + $0x1318] sm:$0xff]  ;;  %v854_v61 = vld [vmem:[%s5223_s21 + $0x1390] sm:$0xff] }
 0x140   : > { %4580 = vmatpush3.msra.mxu1 %v773_v62  ;;  %4546 = vmatprep.subr.mxu0 %v756_v63  ;;  %v1428_v62 = vrot.slane %v221_v49, %v5290_v51  ;;  %v806_v63 = vld [vmem:[%s5223_s21 + $0x1210] sm:$0xff] }
 0x141   : > { %4581 = vmatprep.subr.mxu1 %v788_v0  ;;  %4547 = vmatpush3.msra.mxu0 %v740_v2  ;;  %v838_v0 = vld [vmem:[%s5223_s21 + $0x1310] sm:$0xff]  ;;  %v853_v2 = vld [vmem:[%s5223_s21 + $0x1388] sm:$0xff] }
 0x142   : > { %2788 = vmatprep.mubr.f32.mxu0 %v1419_v1  ;;  %4582 = vmatpush3.msra.mxu1 %v772_v3  ;;  %v821_v1 = vld [vmem:[%s5223_s21 + $0x1288] sm:$0xff]  ;;  %v1435_v3 = vrot.slane %v1421_v57, %v5290_v51  ;;  %v922_v49 = vld [vmem:[%s5223_s21 + $0x15b0] sm:$0xff] }
 0x143   : > { %2789 = vmatmul.mubr.f32.vlgmr.msra.gmra.mxu0 %v1411_v55  ;;  %2858 = vmatprep.mubr.f32.mxu1 %v1420_v4  ;;  %v823_v55 = vld [vmem:[%s5223_s21 + $0x1298] sm:$0xff]  ;;  %v805_v4 = vld [vmem:[%s5223_s21 + $0x1208] sm:$0xff]  ;;  %v222_v57 = vld [vmem:[%s5284_s27 + $0x50] sm:$0xff] }
 0x144   : > { %4586 = vmatprep.subr.mxu0 %v835_v5  ;;  %4621 = vmatprep.subr.mxu1 %v867_v6  ;;  %v837_v5 = vld [vmem:[%s5223_s21 + $0x1308] sm:$0xff]  ;;  %v820_v6 = vld [vmem:[%s5223_s21 + $0x1280] sm:$0xff] }
 0x145   : > { %2859 = vmatmul.mubr.f32.vlgmr.msra.gmra.mxu1 %v1418_v60  ;;  %4587 = vmatpush3.msra.mxu0 %v819_v7  ;;  %v822_v60 = vld [vmem:[%s5223_s21 + $0x1290] sm:$0xff]  ;;  %v852_v7 = vld [vmem:[%s5223_s21 + $0x1380] sm:$0xff] }
 0x146   : > { %4622 = vmatpush3.msra.mxu1 %v851_v8  ;;  %4588 = vmatprep.subr.mxu0 %v834_v9  ;;  %v1436_v8 = vcombine.high %v1428_v62, %v1428_v62  ;;  %v804_v9 = vld [vmem:[%s5223_s21 + $0x1200] sm:$0xff] }
 0x147   : > { %4623 = vmatprep.subr.mxu1 %v866_v10  ;;  %4589 = vmatpush3.msra.mxu0 %v818_v11  ;;  %v836_v10 = vld [vmem:[%s5223_s21 + $0x1300] sm:$0xff]  ;;  %v1437_v11 = vcombine.high %v1435_v3, %v1435_v3 }
 0x148   : > { %4624 = vmatpush3.msra.mxu1 %v850_v12  ;;  %4590 = vmatprep.subr.mxu0 %v833_v13  ;;  %v899_v12 = vld [vmem:[%s5223_s21 + $0x14f8] sm:$0xff] }
 0x149   : > { %4625 = vmatprep.subr.mxu1 %v865_v14  ;;  %4591 = vmatpush3.msra.mxu0 %v817_v15  ;;  %v931_v13 = vld [vmem:[%s5223_s21 + $0x15f8] sm:$0xff] }
 0x14a   : > { %4626 = vmatpush3.msra.mxu1 %v849_v16  ;;  %4592 = vmatprep.subr.mxu0 %v832_v17  ;;  %v883_v14 = vld [vmem:[%s5223_s21 + $0x1478] sm:$0xff]  ;;  %v898_v16 = vld [vmem:[%s5223_s21 + $0x14f0] sm:$0xff] }
 0x14b   : > { %4627 = vmatprep.subr.mxu1 %v864_v18  ;;  %4593 = vmatpush3.msra.mxu0 %v816_v19  ;;  %v915_v15 = vld [vmem:[%s5223_s21 + $0x1578] sm:$0xff]  ;;  %v930_v17 = vld [vmem:[%s5223_s21 + $0x15f0] sm:$0xff] }
 0x14c   : > { %4628 = vmatpush3.msra.mxu1 %v848_v20  ;;  %4594 = vmatprep.subr.mxu0 %v831_v21  ;;  %v882_v18 = vld [vmem:[%s5223_s21 + $0x1470] sm:$0xff]  ;;  %v897_v20 = vld [vmem:[%s5223_s21 + $0x14e8] sm:$0xff] }
 0x14d   : > { %4629 = vmatprep.subr.mxu1 %v863_v22  ;;  %4595 = vmatpush3.msra.mxu0 %v815_v23  ;;  %v914_v19 = vld [vmem:[%s5223_s21 + $0x1570] sm:$0xff]  ;;  %v929_v21 = vld [vmem:[%s5223_s21 + $0x15e8] sm:$0xff] }
 0x14e   : > { %4630 = vmatpush3.msra.mxu1 %v847_v24  ;;  %4596 = vmatprep.subr.mxu0 %v830_v25  ;;  %v881_v22 = vld [vmem:[%s5223_s21 + $0x1468] sm:$0xff]  ;;  %v896_v24 = vld [vmem:[%s5223_s21 + $0x14e0] sm:$0xff] }
 0x14f   : > { %4631 = vmatprep.subr.mxu1 %v862_v26  ;;  %4597 = vmatpush3.msra.mxu0 %v814_v27  ;;  %v913_v23 = vld [vmem:[%s5223_s21 + $0x1568] sm:$0xff]  ;;  %v928_v25 = vld [vmem:[%s5223_s21 + $0x15e0] sm:$0xff] }
 0x150   : > { %4632 = vmatpush3.msra.mxu1 %v846_v28  ;;  %4598 = vmatprep.subr.mxu0 %v829_v29  ;;  %v880_v26 = vld [vmem:[%s5223_s21 + $0x1460] sm:$0xff]  ;;  %v895_v28 = vld [vmem:[%s5223_s21 + $0x14d8] sm:$0xff] }
 0x151   : > { %4633 = vmatprep.subr.mxu1 %v861_v30  ;;  %4599 = vmatpush3.msra.mxu0 %v813_v31  ;;  %v912_v27 = vld [vmem:[%s5223_s21 + $0x1560] sm:$0xff]  ;;  %v927_v29 = vld [vmem:[%s5223_s21 + $0x15d8] sm:$0xff] }
 0x152   : > { %4634 = vmatpush3.msra.mxu1 %v845_v32  ;;  %4600 = vmatprep.subr.mxu0 %v828_v33  ;;  %v879_v30 = vld [vmem:[%s5223_s21 + $0x1458] sm:$0xff]  ;;  %v894_v32 = vld [vmem:[%s5223_s21 + $0x14d0] sm:$0xff] }
 0x153   : > { %4635 = vmatprep.subr.mxu1 %v860_v34  ;;  %4601 = vmatpush3.msra.mxu0 %v812_v35  ;;  %v911_v31 = vld [vmem:[%s5223_s21 + $0x1558] sm:$0xff]  ;;  %v926_v33 = vld [vmem:[%s5223_s21 + $0x15d0] sm:$0xff] }
 0x154   : > { %4636 = vmatpush3.msra.mxu1 %v844_v36  ;;  %4602 = vmatprep.subr.mxu0 %v827_v37  ;;  %v878_v34 = vld [vmem:[%s5223_s21 + $0x1450] sm:$0xff]  ;;  %v893_v36 = vld [vmem:[%s5223_s21 + $0x14c8] sm:$0xff] }
 0x155   : > { %4637 = vmatprep.subr.mxu1 %v859_v38  ;;  %4603 = vmatpush3.msra.mxu0 %v811_v39  ;;  %v910_v35 = vld [vmem:[%s5223_s21 + $0x1550] sm:$0xff]  ;;  %v925_v37 = vld [vmem:[%s5223_s21 + $0x15c8] sm:$0xff] }
 0x156   : > { %4638 = vmatpush3.msra.mxu1 %v843_v40  ;;  %4604 = vmatprep.subr.mxu0 %v826_v41  ;;  %v877_v38 = vld [vmem:[%s5223_s21 + $0x1448] sm:$0xff]  ;;  %v892_v40 = vld [vmem:[%s5223_s21 + $0x14c0] sm:$0xff] }
 0x157   : > { %4639 = vmatprep.subr.mxu1 %v858_v42  ;;  %4605 = vmatpush3.msra.mxu0 %v810_v43  ;;  %v909_v39 = vld [vmem:[%s5223_s21 + $0x1548] sm:$0xff]  ;;  %v924_v41 = vld [vmem:[%s5223_s21 + $0x15c0] sm:$0xff] }
 0x158   : > { %4640 = vmatpush3.msra.mxu1 %v842_v44  ;;  %4606 = vmatprep.subr.mxu0 %v825_v45  ;;  %v876_v42 = vld [vmem:[%s5223_s21 + $0x1440] sm:$0xff]  ;;  %v891_v44 = vld [vmem:[%s5223_s21 + $0x14b8] sm:$0xff] }
 0x159   : > { %4641 = vmatprep.subr.mxu1 %v857_v46  ;;  %4607 = vmatpush3.msra.mxu0 %v809_v47  ;;  %v908_v43 = vld [vmem:[%s5223_s21 + $0x1540] sm:$0xff]  ;;  %v923_v45 = vld [vmem:[%s5223_s21 + $0x15b8] sm:$0xff] }
 0x15a   : > { %4642 = vmatpush3.msra.mxu1 %v841_v48  ;;  %4608 = vmatprep.subr.mxu0 %v824_v50  ;;  %v875_v46 = vld [vmem:[%s5223_s21 + $0x1438] sm:$0xff]  ;;  %v890_v48 = vld [vmem:[%s5223_s21 + $0x14b0] sm:$0xff] }
 0x15b   : > { %4643 = vmatprep.subr.mxu1 %v856_v52  ;;  %4609 = vmatpush3.msra.mxu0 %v808_v53  ;;  %v907_v47 = vld [vmem:[%s5223_s21 + $0x1538] sm:$0xff]  ;;  %v874_v50 = vld [vmem:[%s5223_s21 + $0x1430] sm:$0xff]  ;;  %v889_v53 = vld [vmem:[%s5223_s21 + $0x14a8] sm:$0xff] }
 0x15c   : > { %4644 = vmatpush3.msra.mxu1 %v840_v54  ;;  %4610 = vmatprep.subr.mxu0 %v823_v55  ;;  %v906_v52 = vld [vmem:[%s5223_s21 + $0x1530] sm:$0xff]  ;;  %v921_v54 = vld [vmem:[%s5223_s21 + $0x15a8] sm:$0xff] }
 0x15d   : > { %4645 = vmatprep.subr.mxu1 %v855_v56  ;;  %4611 = vmatpush3.msra.mxu0 %v807_v58  ;;  %v873_v55 = vld [vmem:[%s5223_s21 + $0x1428] sm:$0xff]  ;;  %v888_v58 = vld [vmem:[%s5223_s21 + $0x14a0] sm:$0xff] }
 0x15e   : > { %4646 = vmatpush3.msra.mxu1 %v839_v59  ;;  %4612 = vmatprep.subr.mxu0 %v822_v60  ;;  %v905_v56 = vld [vmem:[%s5223_s21 + $0x1528] sm:$0xff]  ;;  %v920_v59 = vld [vmem:[%s5223_s21 + $0x15a0] sm:$0xff] }
 0x15f   : > { %4647 = vmatprep.subr.mxu1 %v854_v61  ;;  %4613 = vmatpush3.msra.mxu0 %v806_v63  ;;  %v872_v60 = vld [vmem:[%s5223_s21 + $0x1420] sm:$0xff]  ;;  %v919_v63 = vld [vmem:[%s5223_s21 + $0x1598] sm:$0xff] }
 0x160   : > { %4648 = vmatpush3.msra.mxu1 %v838_v0  ;;  %4614 = vmatprep.subr.mxu0 %v821_v1  ;;  %v904_v61 = vld [vmem:[%s5223_s21 + $0x1520] sm:$0xff]  ;;  %v1438_v0 = vcombine.high %v222_v57, %v222_v57  ;;  %v871_v1 = vld [vmem:[%s5223_s21 + $0x1418] sm:$0xff] }
 0x161   : > { %4649 = vmatprep.subr.mxu1 %v853_v2  ;;  %4615 = vmatpush3.msra.mxu0 %v805_v4  ;;  %v903_v2 = vld [vmem:[%s5223_s21 + $0x1518] sm:$0xff]  ;;  %v918_v4 = vld [vmem:[%s5223_s21 + $0x1590] sm:$0xff] }
 0x162   : > { %4650 = vmatpush3.msra.mxu1 %v837_v5  ;;  %4616 = vmatprep.subr.mxu0 %v820_v6  ;;  %v1445_v5 = vrot.slane %v222_v57, %v5290_v51  ;;  %v870_v6 = vld [vmem:[%s5223_s21 + $0x1410] sm:$0xff] }
 0x163   : > { %4651 = vmatprep.subr.mxu1 %v852_v7  ;;  %4617 = vmatpush3.msra.mxu0 %v804_v9  ;;  %v902_v7 = vld [vmem:[%s5223_s21 + $0x1510] sm:$0xff]  ;;  %v917_v9 = vld [vmem:[%s5223_s21 + $0x1588] sm:$0xff] }
 0x164   : > { %2928 = vmatprep.mubr.f32.mxu0 %v1436_v8  ;;  %4652 = vmatpush3.msra.mxu1 %v836_v10  ;;  %v885_v8 = vld [vmem:[%s5223_s21 + $0x1488] sm:$0xff]  ;;  %v1452_v10 = vrot.slane %v1438_v0, %v5290_v51  ;;  %v986_v57 = vld [vmem:[%s5223_s21 + $0x17b0] sm:$0xff]  ;;  %v223_v0 = vld [vmem:[%s5284_s27 + $0x58] sm:$0xff] }
 0x165   : > { %2929 = vmatmul.mubr.f32.vlgmr.msra.gmra.mxu0 %v1428_v62  ;;  %2998 = vmatprep.mubr.f32.mxu1 %v1437_v11  ;;  %v887_v62 = vld [vmem:[%s5223_s21 + $0x1498] sm:$0xff]  ;;  %v869_v11 = vld [vmem:[%s5223_s21 + $0x1408] sm:$0xff] }
 0x166   : > { %4656 = vmatprep.subr.mxu0 %v899_v12  ;;  %4691 = vmatprep.subr.mxu1 %v931_v13  ;;  %v901_v12 = vld [vmem:[%s5223_s21 + $0x1508] sm:$0xff]  ;;  %v884_v13 = vld [vmem:[%s5223_s21 + $0x1480] sm:$0xff] }
 0x167   : > { %2999 = vmatmul.mubr.f32.vlgmr.msra.gmra.mxu1 %v1435_v3  ;;  %4657 = vmatpush3.msra.mxu0 %v883_v14  ;;  %v886_v3 = vld [vmem:[%s5223_s21 + $0x1490] sm:$0xff]  ;;  %v916_v14 = vld [vmem:[%s5223_s21 + $0x1580] sm:$0xff] }
 0x168   : > { %4692 = vmatpush3.msra.mxu1 %v915_v15  ;;  %4658 = vmatprep.subr.mxu0 %v898_v16  ;;  %v1453_v15 = vcombine.high %v1445_v5, %v1445_v5  ;;  %v868_v16 = vld [vmem:[%s5223_s21 + $0x1400] sm:$0xff] }
 0x169   : > { %4693 = vmatprep.subr.mxu1 %v930_v17  ;;  %4659 = vmatpush3.msra.mxu0 %v882_v18  ;;  %v900_v17 = vld [vmem:[%s5223_s21 + $0x1500] sm:$0xff]  ;;  %v1454_v18 = vcombine.high %v1452_v10, %v1452_v10 }
 0x16a   : > { %4694 = vmatpush3.msra.mxu1 %v914_v19  ;;  %4660 = vmatprep.subr.mxu0 %v897_v20  ;;  %v963_v19 = vld [vmem:[%s5223_s21 + $0x16f8] sm:$0xff] }
 0x16b   : > { %4695 = vmatprep.subr.mxu1 %v929_v21  ;;  %4661 = vmatpush3.msra.mxu0 %v881_v22  ;;  %v995_v20 = vld [vmem:[%s5223_s21 + $0x17f8] sm:$0xff] }
 0x16c   : > { %4696 = vmatpush3.msra.mxu1 %v913_v23  ;;  %4662 = vmatprep.subr.mxu0 %v896_v24  ;;  %v947_v21 = vld [vmem:[%s5223_s21 + $0x1678] sm:$0xff]  ;;  %v962_v23 = vld [vmem:[%s5223_s21 + $0x16f0] sm:$0xff] }
 0x16d   : > { %4697 = vmatprep.subr.mxu1 %v928_v25  ;;  %4663 = vmatpush3.msra.mxu0 %v880_v26  ;;  %v979_v22 = vld [vmem:[%s5223_s21 + $0x1778] sm:$0xff]  ;;  %v994_v24 = vld [vmem:[%s5223_s21 + $0x17f0] sm:$0xff] }
 0x16e   : > { %4698 = vmatpush3.msra.mxu1 %v912_v27  ;;  %4664 = vmatprep.subr.mxu0 %v895_v28  ;;  %v946_v25 = vld [vmem:[%s5223_s21 + $0x1670] sm:$0xff]  ;;  %v961_v27 = vld [vmem:[%s5223_s21 + $0x16e8] sm:$0xff] }
 0x16f   : > { %4699 = vmatprep.subr.mxu1 %v927_v29  ;;  %4665 = vmatpush3.msra.mxu0 %v879_v30  ;;  %v978_v26 = vld [vmem:[%s5223_s21 + $0x1770] sm:$0xff]  ;;  %v993_v28 = vld [vmem:[%s5223_s21 + $0x17e8] sm:$0xff] }
 0x170   : > { %4700 = vmatpush3.msra.mxu1 %v911_v31  ;;  %4666 = vmatprep.subr.mxu0 %v894_v32  ;;  %v945_v29 = vld [vmem:[%s5223_s21 + $0x1668] sm:$0xff]  ;;  %v960_v31 = vld [vmem:[%s5223_s21 + $0x16e0] sm:$0xff] }
 0x171   : > { %4701 = vmatprep.subr.mxu1 %v926_v33  ;;  %4667 = vmatpush3.msra.mxu0 %v878_v34  ;;  %v977_v30 = vld [vmem:[%s5223_s21 + $0x1768] sm:$0xff]  ;;  %v992_v32 = vld [vmem:[%s5223_s21 + $0x17e0] sm:$0xff] }
 0x172   : > { %4702 = vmatpush3.msra.mxu1 %v910_v35  ;;  %4668 = vmatprep.subr.mxu0 %v893_v36  ;;  %v944_v33 = vld [vmem:[%s5223_s21 + $0x1660] sm:$0xff]  ;;  %v959_v35 = vld [vmem:[%s5223_s21 + $0x16d8] sm:$0xff] }
 0x173   : > { %4703 = vmatprep.subr.mxu1 %v925_v37  ;;  %4669 = vmatpush3.msra.mxu0 %v877_v38  ;;  %v976_v34 = vld [vmem:[%s5223_s21 + $0x1760] sm:$0xff]  ;;  %v991_v36 = vld [vmem:[%s5223_s21 + $0x17d8] sm:$0xff] }
 0x174   : > { %4704 = vmatpush3.msra.mxu1 %v909_v39  ;;  %4670 = vmatprep.subr.mxu0 %v892_v40  ;;  %v943_v37 = vld [vmem:[%s5223_s21 + $0x1658] sm:$0xff]  ;;  %v958_v39 = vld [vmem:[%s5223_s21 + $0x16d0] sm:$0xff] }
 0x175   : > { %4705 = vmatprep.subr.mxu1 %v924_v41  ;;  %4671 = vmatpush3.msra.mxu0 %v876_v42  ;;  %v975_v38 = vld [vmem:[%s5223_s21 + $0x1758] sm:$0xff]  ;;  %v990_v40 = vld [vmem:[%s5223_s21 + $0x17d0] sm:$0xff] }
 0x176   : > { %4706 = vmatpush3.msra.mxu1 %v908_v43  ;;  %4672 = vmatprep.subr.mxu0 %v891_v44  ;;  %v942_v41 = vld [vmem:[%s5223_s21 + $0x1650] sm:$0xff]  ;;  %v957_v43 = vld [vmem:[%s5223_s21 + $0x16c8] sm:$0xff] }
 0x177   : > { %4707 = vmatprep.subr.mxu1 %v923_v45  ;;  %4673 = vmatpush3.msra.mxu0 %v875_v46  ;;  %v974_v42 = vld [vmem:[%s5223_s21 + $0x1750] sm:$0xff]  ;;  %v989_v44 = vld [vmem:[%s5223_s21 + $0x17c8] sm:$0xff] }
 0x178   : > { %4708 = vmatpush3.msra.mxu1 %v907_v47  ;;  %4674 = vmatprep.subr.mxu0 %v890_v48  ;;  %v941_v45 = vld [vmem:[%s5223_s21 + $0x1648] sm:$0xff]  ;;  %v956_v47 = vld [vmem:[%s5223_s21 + $0x16c0] sm:$0xff] }
 0x179   : > { %4709 = vmatprep.subr.mxu1 %v922_v49  ;;  %4675 = vmatpush3.msra.mxu0 %v874_v50  ;;  %v973_v46 = vld [vmem:[%s5223_s21 + $0x1748] sm:$0xff]  ;;  %v988_v48 = vld [vmem:[%s5223_s21 + $0x17c0] sm:$0xff] }
 0x17a   : > { %4710 = vmatpush3.msra.mxu1 %v906_v52  ;;  %4676 = vmatprep.subr.mxu0 %v889_v53  ;;  %v940_v49 = vld [vmem:[%s5223_s21 + $0x1640] sm:$0xff]  ;;  %v955_v52 = vld [vmem:[%s5223_s21 + $0x16b8] sm:$0xff] }
 0x17b   : > { %4711 = vmatprep.subr.mxu1 %v921_v54  ;;  %4677 = vmatpush3.msra.mxu0 %v873_v55  ;;  %v972_v50 = vld [vmem:[%s5223_s21 + $0x1740] sm:$0xff]  ;;  %v987_v53 = vld [vmem:[%s5223_s21 + $0x17b8] sm:$0xff] }
 0x17c   : > { %4712 = vmatpush3.msra.mxu1 %v905_v56  ;;  %4678 = vmatprep.subr.mxu0 %v888_v58  ;;  %v939_v54 = vld [vmem:[%s5223_s21 + $0x1638] sm:$0xff]  ;;  %v954_v56 = vld [vmem:[%s5223_s21 + $0x16b0] sm:$0xff] }
 0x17d   : > { %4713 = vmatprep.subr.mxu1 %v920_v59  ;;  %4679 = vmatpush3.msra.mxu0 %v872_v60  ;;  %v971_v55 = vld [vmem:[%s5223_s21 + $0x1738] sm:$0xff]  ;;  %v938_v58 = vld [vmem:[%s5223_s21 + $0x1630] sm:$0xff]  ;;  %v953_v60 = vld [vmem:[%s5223_s21 + $0x16a8] sm:$0xff] }
 0x17e   : > { %4714 = vmatpush3.msra.mxu1 %v904_v61  ;;  %4680 = vmatprep.subr.mxu0 %v887_v62  ;;  %v970_v59 = vld [vmem:[%s5223_s21 + $0x1730] sm:$0xff]  ;;  %v985_v61 = vld [vmem:[%s5223_s21 + $0x17a8] sm:$0xff] }
 0x17f   : > { %4715 = vmatprep.subr.mxu1 %v919_v63  ;;  %4681 = vmatpush3.msra.mxu0 %v871_v1  ;;  %v937_v62 = vld [vmem:[%s5223_s21 + $0x1628] sm:$0xff]  ;;  %v952_v1 = vld [vmem:[%s5223_s21 + $0x16a0] sm:$0xff] }
 0x180   : > { %4716 = vmatpush3.msra.mxu1 %v903_v2  ;;  %4682 = vmatprep.subr.mxu0 %v886_v3  ;;  %v969_v63 = vld [vmem:[%s5223_s21 + $0x1728] sm:$0xff]  ;;  %v984_v2 = vld [vmem:[%s5223_s21 + $0x17a0] sm:$0xff] }
 0x181   : > { %4717 = vmatprep.subr.mxu1 %v918_v4  ;;  %4683 = vmatpush3.msra.mxu0 %v870_v6  ;;  %v936_v3 = vld [vmem:[%s5223_s21 + $0x1620] sm:$0xff]  ;;  %v983_v6 = vld [vmem:[%s5223_s21 + $0x1798] sm:$0xff] }
 0x182   : > { %4718 = vmatpush3.msra.mxu1 %v902_v7  ;;  %4684 = vmatprep.subr.mxu0 %v885_v8  ;;  %v968_v4 = vld [vmem:[%s5223_s21 + $0x1720] sm:$0xff]  ;;  %v1455_v7 = vcombine.high %v223_v0, %v223_v0  ;;  %v935_v8 = vld [vmem:[%s5223_s21 + $0x1618] sm:$0xff] }
 0x183   : > { %4719 = vmatprep.subr.mxu1 %v917_v9  ;;  %4685 = vmatpush3.msra.mxu0 %v869_v11  ;;  %v967_v9 = vld [vmem:[%s5223_s21 + $0x1718] sm:$0xff]  ;;  %v982_v11 = vld [vmem:[%s5223_s21 + $0x1790] sm:$0xff] }
 0x184   : > { %4720 = vmatpush3.msra.mxu1 %v901_v12  ;;  %4686 = vmatprep.subr.mxu0 %v884_v13  ;;  %v1462_v12 = vrot.slane %v223_v0, %v5290_v51  ;;  %v934_v13 = vld [vmem:[%s5223_s21 + $0x1610] sm:$0xff] }
 0x185   : > { %4721 = vmatprep.subr.mxu1 %v916_v14  ;;  %4687 = vmatpush3.msra.mxu0 %v868_v16  ;;  %v966_v14 = vld [vmem:[%s5223_s21 + $0x1710] sm:$0xff]  ;;  %v981_v16 = vld [vmem:[%s5223_s21 + $0x1788] sm:$0xff] }
 0x186   : > { %3068 = vmatprep.mubr.f32.mxu0 %v1453_v15  ;;  %4722 = vmatpush3.msra.mxu1 %v900_v17  ;;  %v949_v15 = vld [vmem:[%s5223_s21 + $0x1688] sm:$0xff]  ;;  %v1469_v17 = vrot.slane %v1455_v7, %v5290_v51  ;;  %v1050_v0 = vld [vmem:[%s5223_s21 + $0x19b0] sm:$0xff]  ;;  %v224_v7 = vld [vmem:[%s5284_s27 + $0x60] sm:$0xff] }
 0x187   : > { %3069 = vmatmul.mubr.f32.vlgmr.msra.gmra.mxu0 %v1445_v5  ;;  %3138 = vmatprep.mubr.f32.mxu1 %v1454_v18  ;;  %v951_v5 = vld [vmem:[%s5223_s21 + $0x1698] sm:$0xff]  ;;  %v933_v18 = vld [vmem:[%s5223_s21 + $0x1608] sm:$0xff] }
 0x188   : > { %4726 = vmatprep.subr.mxu0 %v963_v19  ;;  %4761 = vmatprep.subr.mxu1 %v995_v20  ;;  %v965_v19 = vld [vmem:[%s5223_s21 + $0x1708] sm:$0xff]  ;;  %v948_v20 = vld [vmem:[%s5223_s21 + $0x1680] sm:$0xff] }
 0x189   : > { %3139 = vmatmul.mubr.f32.vlgmr.msra.gmra.mxu1 %v1452_v10  ;;  %4727 = vmatpush3.msra.mxu0 %v947_v21  ;;  %v950_v10 = vld [vmem:[%s5223_s21 + $0x1690] sm:$0xff]  ;;  %v980_v21 = vld [vmem:[%s5223_s21 + $0x1780] sm:$0xff] }
 0x18a   : > { %4762 = vmatpush3.msra.mxu1 %v979_v22  ;;  %4728 = vmatprep.subr.mxu0 %v962_v23  ;;  %v1470_v22 = vcombine.high %v1462_v12, %v1462_v12  ;;  %v932_v23 = vld [vmem:[%s5223_s21 + $0x1600] sm:$0xff] }
 0x18b   : > { %4763 = vmatprep.subr.mxu1 %v994_v24  ;;  %4729 = vmatpush3.msra.mxu0 %v946_v25  ;;  %v964_v24 = vld [vmem:[%s5223_s21 + $0x1700] sm:$0xff]  ;;  %v1471_v25 = vcombine.high %v1469_v17, %v1469_v17 }
 0x18c   : > { %4764 = vmatpush3.msra.mxu1 %v978_v26  ;;  %4730 = vmatprep.subr.mxu0 %v961_v27  ;;  %v1027_v26 = vld [vmem:[%s5223_s21 + $0x18f8] sm:$0xff] }
 0x18d   : > { %4765 = vmatprep.subr.mxu1 %v993_v28  ;;  %4731 = vmatpush3.msra.mxu0 %v945_v29  ;;  %v1059_v27 = vld [vmem:[%s5223_s21 + $0x19f8] sm:$0xff] }
 0x18e   : > { %4766 = vmatpush3.msra.mxu1 %v977_v30  ;;  %4732 = vmatprep.subr.mxu0 %v960_v31  ;;  %v1011_v28 = vld [vmem:[%s5223_s21 + $0x1878] sm:$0xff]  ;;  %v1026_v30 = vld [vmem:[%s5223_s21 + $0x18f0] sm:$0xff] }
 0x18f   : > { %4767 = vmatprep.subr.mxu1 %v992_v32  ;;  %4733 = vmatpush3.msra.mxu0 %v944_v33  ;;  %v1043_v29 = vld [vmem:[%s5223_s21 + $0x1978] sm:$0xff]  ;;  %v1058_v31 = vld [vmem:[%s5223_s21 + $0x19f0] sm:$0xff] }
 0x190   : > { %4768 = vmatpush3.msra.mxu1 %v976_v34  ;;  %4734 = vmatprep.subr.mxu0 %v959_v35  ;;  %v1010_v32 = vld [vmem:[%s5223_s21 + $0x1870] sm:$0xff]  ;;  %v1025_v34 = vld [vmem:[%s5223_s21 + $0x18e8] sm:$0xff] }
 0x191   : > { %4769 = vmatprep.subr.mxu1 %v991_v36  ;;  %4735 = vmatpush3.msra.mxu0 %v943_v37  ;;  %v1042_v33 = vld [vmem:[%s5223_s21 + $0x1970] sm:$0xff]  ;;  %v1057_v35 = vld [vmem:[%s5223_s21 + $0x19e8] sm:$0xff] }
 0x192   : > { %4770 = vmatpush3.msra.mxu1 %v975_v38  ;;  %4736 = vmatprep.subr.mxu0 %v958_v39  ;;  %v1009_v36 = vld [vmem:[%s5223_s21 + $0x1868] sm:$0xff]  ;;  %v1024_v38 = vld [vmem:[%s5223_s21 + $0x18e0] sm:$0xff] }
 0x193   : > { %4771 = vmatprep.subr.mxu1 %v990_v40  ;;  %4737 = vmatpush3.msra.mxu0 %v942_v41  ;;  %v1041_v37 = vld [vmem:[%s5223_s21 + $0x1968] sm:$0xff]  ;;  %v1056_v39 = vld [vmem:[%s5223_s21 + $0x19e0] sm:$0xff] }
 0x194   : > { %4772 = vmatpush3.msra.mxu1 %v974_v42  ;;  %4738 = vmatprep.subr.mxu0 %v957_v43  ;;  %v1008_v40 = vld [vmem:[%s5223_s21 + $0x1860] sm:$0xff]  ;;  %v1023_v42 = vld [vmem:[%s5223_s21 + $0x18d8] sm:$0xff] }
 0x195   : > { %4773 = vmatprep.subr.mxu1 %v989_v44  ;;  %4739 = vmatpush3.msra.mxu0 %v941_v45  ;;  %v1040_v41 = vld [vmem:[%s5223_s21 + $0x1960] sm:$0xff]  ;;  %v1055_v43 = vld [vmem:[%s5223_s21 + $0x19d8] sm:$0xff] }
 0x196   : > { %4774 = vmatpush3.msra.mxu1 %v973_v46  ;;  %4740 = vmatprep.subr.mxu0 %v956_v47  ;;  %v1007_v44 = vld [vmem:[%s5223_s21 + $0x1858] sm:$0xff]  ;;  %v1022_v46 = vld [vmem:[%s5223_s21 + $0x18d0] sm:$0xff] }
 0x197   : > { %4775 = vmatprep.subr.mxu1 %v988_v48  ;;  %4741 = vmatpush3.msra.mxu0 %v940_v49  ;;  %v1039_v45 = vld [vmem:[%s5223_s21 + $0x1958] sm:$0xff]  ;;  %v1054_v47 = vld [vmem:[%s5223_s21 + $0x19d0] sm:$0xff] }
 0x198   : > { %4776 = vmatpush3.msra.mxu1 %v972_v50  ;;  %4742 = vmatprep.subr.mxu0 %v955_v52  ;;  %v1006_v48 = vld [vmem:[%s5223_s21 + $0x1850] sm:$0xff]  ;;  %v1021_v50 = vld [vmem:[%s5223_s21 + $0x18c8] sm:$0xff] }
 0x199   : > { %4777 = vmatprep.subr.mxu1 %v987_v53  ;;  %4743 = vmatpush3.msra.mxu0 %v939_v54  ;;  %v1038_v49 = vld [vmem:[%s5223_s21 + $0x1950] sm:$0xff]  ;;  %v1053_v52 = vld [vmem:[%s5223_s21 + $0x19c8] sm:$0xff] }
 0x19a   : > { %4778 = vmatpush3.msra.mxu1 %v971_v55  ;;  %4744 = vmatprep.subr.mxu0 %v954_v56  ;;  %v1005_v53 = vld [vmem:[%s5223_s21 + $0x1848] sm:$0xff]  ;;  %v1020_v55 = vld [vmem:[%s5223_s21 + $0x18c0] sm:$0xff] }
 0x19b   : > { %4779 = vmatprep.subr.mxu1 %v986_v57  ;;  %4745 = vmatpush3.msra.mxu0 %v938_v58  ;;  %v1037_v54 = vld [vmem:[%s5223_s21 + $0x1948] sm:$0xff]  ;;  %v1052_v56 = vld [vmem:[%s5223_s21 + $0x19c0] sm:$0xff] }
 0x19c   : > { %4780 = vmatpush3.msra.mxu1 %v970_v59  ;;  %4746 = vmatprep.subr.mxu0 %v953_v60  ;;  %v1004_v57 = vld [vmem:[%s5223_s21 + $0x1840] sm:$0xff]  ;;  %v1019_v59 = vld [vmem:[%s5223_s21 + $0x18b8] sm:$0xff] }
 0x19d   : > { %4781 = vmatprep.subr.mxu1 %v985_v61  ;;  %4747 = vmatpush3.msra.mxu0 %v937_v62  ;;  %v1036_v58 = vld [vmem:[%s5223_s21 + $0x1940] sm:$0xff]  ;;  %v1051_v60 = vld [vmem:[%s5223_s21 + $0x19b8] sm:$0xff] }
 0x19e   : > { %4782 = vmatpush3.msra.mxu1 %v969_v63  ;;  %4748 = vmatprep.subr.mxu0 %v952_v1  ;;  %v1003_v61 = vld [vmem:[%s5223_s21 + $0x1838] sm:$0xff]  ;;  %v1018_v63 = vld [vmem:[%s5223_s21 + $0x18b0] sm:$0xff] }
 0x19f   : > { %4783 = vmatprep.subr.mxu1 %v984_v2  ;;  %4749 = vmatpush3.msra.mxu0 %v936_v3  ;;  %v1035_v62 = vld [vmem:[%s5223_s21 + $0x1938] sm:$0xff]  ;;  %v1002_v1 = vld [vmem:[%s5223_s21 + $0x1830] sm:$0xff]  ;;  %v1017_v3 = vld [vmem:[%s5223_s21 + $0x18a8] sm:$0xff] }
 0x1a0   : > { %4784 = vmatpush3.msra.mxu1 %v968_v4  ;;  %4750 = vmatprep.subr.mxu0 %v951_v5  ;;  %v1034_v2 = vld [vmem:[%s5223_s21 + $0x1930] sm:$0xff]  ;;  %v1049_v4 = vld [vmem:[%s5223_s21 + $0x19a8] sm:$0xff] }
 0x1a1   : > { %4785 = vmatprep.subr.mxu1 %v983_v6  ;;  %4751 = vmatpush3.msra.mxu0 %v935_v8  ;;  %v1001_v5 = vld [vmem:[%s5223_s21 + $0x1828] sm:$0xff]  ;;  %v1016_v8 = vld [vmem:[%s5223_s21 + $0x18a0] sm:$0xff] }
 0x1a2   : > { %4786 = vmatpush3.msra.mxu1 %v967_v9  ;;  %4752 = vmatprep.subr.mxu0 %v950_v10  ;;  %v1033_v6 = vld [vmem:[%s5223_s21 + $0x1928] sm:$0xff]  ;;  %v1048_v9 = vld [vmem:[%s5223_s21 + $0x19a0] sm:$0xff] }
 0x1a3   : > { %4787 = vmatprep.subr.mxu1 %v982_v11  ;;  %4753 = vmatpush3.msra.mxu0 %v934_v13  ;;  %v1000_v10 = vld [vmem:[%s5223_s21 + $0x1820] sm:$0xff]  ;;  %v1047_v13 = vld [vmem:[%s5223_s21 + $0x1998] sm:$0xff] }
 0x1a4   : > { %4788 = vmatpush3.msra.mxu1 %v966_v14  ;;  %4754 = vmatprep.subr.mxu0 %v949_v15  ;;  %v1032_v11 = vld [vmem:[%s5223_s21 + $0x1920] sm:$0xff]  ;;  %v1472_v14 = vcombine.high %v224_v7, %v224_v7  ;;  %v999_v15 = vld [vmem:[%s5223_s21 + $0x1818] sm:$0xff] }
 0x1a5   : > { %4789 = vmatprep.subr.mxu1 %v981_v16  ;;  %4755 = vmatpush3.msra.mxu0 %v933_v18  ;;  %v1031_v16 = vld [vmem:[%s5223_s21 + $0x1918] sm:$0xff]  ;;  %v1046_v18 = vld [vmem:[%s5223_s21 + $0x1990] sm:$0xff] }
 0x1a6   : > { %4790 = vmatpush3.msra.mxu1 %v965_v19  ;;  %4756 = vmatprep.subr.mxu0 %v948_v20  ;;  %v1479_v19 = vrot.slane %v224_v7, %v5290_v51  ;;  %v998_v20 = vld [vmem:[%s5223_s21 + $0x1810] sm:$0xff] }
 0x1a7   : > { %4791 = vmatprep.subr.mxu1 %v980_v21  ;;  %4757 = vmatpush3.msra.mxu0 %v932_v23  ;;  %v1030_v21 = vld [vmem:[%s5223_s21 + $0x1910] sm:$0xff]  ;;  %v1045_v23 = vld [vmem:[%s5223_s21 + $0x1988] sm:$0xff] }
 0x1a8   : > { %3208 = vmatprep.mubr.f32.mxu0 %v1470_v22  ;;  %4792 = vmatpush3.msra.mxu1 %v964_v24  ;;  %v1013_v22 = vld [vmem:[%s5223_s21 + $0x1888] sm:$0xff]  ;;  %v1486_v24 = vrot.slane %v1472_v14, %v5290_v51  ;;  %v1114_v7 = vld [vmem:[%s5223_s21 + $0x1bb0] sm:$0xff] }
 0x1a9   : > { %3209 = vmatmul.mubr.f32.vlgmr.msra.gmra.mxu0 %v1462_v12  ;;  %3278 = vmatprep.mubr.f32.mxu1 %v1471_v25  ;;  %v1015_v12 = vld [vmem:[%s5223_s21 + $0x1898] sm:$0xff]  ;;  %v997_v25 = vld [vmem:[%s5223_s21 + $0x1808] sm:$0xff] }
 0x1aa   : > { %4796 = vmatprep.subr.mxu0 %v1027_v26  ;;  %4831 = vmatprep.subr.mxu1 %v1059_v27  ;;  %v1029_v26 = vld [vmem:[%s5223_s21 + $0x1908] sm:$0xff]  ;;  %v1012_v27 = vld [vmem:[%s5223_s21 + $0x1880] sm:$0xff] }
 0x1ab   : > { %3279 = vmatmul.mubr.f32.vlgmr.msra.gmra.mxu1 %v1469_v17  ;;  %4797 = vmatpush3.msra.mxu0 %v1011_v28  ;;  %v1014_v17 = vld [vmem:[%s5223_s21 + $0x1890] sm:$0xff]  ;;  %v1044_v28 = vld [vmem:[%s5223_s21 + $0x1980] sm:$0xff]  ;;  %v225_v14 = vld [vmem:[%s5284_s27 + $0x68] sm:$0xff] }
 0x1ac   : > { %4832 = vmatpush3.msra.mxu1 %v1043_v29  ;;  %4798 = vmatprep.subr.mxu0 %v1026_v30  ;;  %v1487_v29 = vcombine.high %v1479_v19, %v1479_v19  ;;  %v996_v30 = vld [vmem:[%s5223_s21 + $0x1800] sm:$0xff] }
 0x1ad   : > { %4833 = vmatprep.subr.mxu1 %v1058_v31  ;;  %4799 = vmatpush3.msra.mxu0 %v1010_v32  ;;  %v1028_v31 = vld [vmem:[%s5223_s21 + $0x1900] sm:$0xff]  ;;  %v1488_v32 = vcombine.high %v1486_v24, %v1486_v24 }
 0x1ae   : > { %4834 = vmatpush3.msra.mxu1 %v1042_v33  ;;  %4800 = vmatprep.subr.mxu0 %v1025_v34  ;;  %v1091_v33 = vld [vmem:[%s5223_s21 + $0x1af8] sm:$0xff] }
 0x1af   : > { %4835 = vmatprep.subr.mxu1 %v1057_v35  ;;  %4801 = vmatpush3.msra.mxu0 %v1009_v36  ;;  %v1123_v34 = vld [vmem:[%s5223_s21 + $0x1bf8] sm:$0xff] }
 0x1b0   : > { %4836 = vmatpush3.msra.mxu1 %v1041_v37  ;;  %4802 = vmatprep.subr.mxu0 %v1024_v38  ;;  %v1075_v35 = vld [vmem:[%s5223_s21 + $0x1a78] sm:$0xff]  ;;  %v1090_v37 = vld [vmem:[%s5223_s21 + $0x1af0] sm:$0xff] }
 0x1b1   : > { %4837 = vmatprep.subr.mxu1 %v1056_v39  ;;  %4803 = vmatpush3.msra.mxu0 %v1008_v40  ;;  %v1107_v36 = vld [vmem:[%s5223_s21 + $0x1b78] sm:$0xff]  ;;  %v1122_v38 = vld [vmem:[%s5223_s21 + $0x1bf0] sm:$0xff] }
 0x1b2   : > { %4838 = vmatpush3.msra.mxu1 %v1040_v41  ;;  %4804 = vmatprep.subr.mxu0 %v1023_v42  ;;  %v1074_v39 = vld [vmem:[%s5223_s21 + $0x1a70] sm:$0xff]  ;;  %v1089_v41 = vld [vmem:[%s5223_s21 + $0x1ae8] sm:$0xff] }
 0x1b3   : > { %4839 = vmatprep.subr.mxu1 %v1055_v43  ;;  %4805 = vmatpush3.msra.mxu0 %v1007_v44  ;;  %v1106_v40 = vld [vmem:[%s5223_s21 + $0x1b70] sm:$0xff]  ;;  %v1121_v42 = vld [vmem:[%s5223_s21 + $0x1be8] sm:$0xff] }
 0x1b4   : > { %4840 = vmatpush3.msra.mxu1 %v1039_v45  ;;  %4806 = vmatprep.subr.mxu0 %v1022_v46  ;;  %v1073_v43 = vld [vmem:[%s5223_s21 + $0x1a68] sm:$0xff]  ;;  %v1088_v45 = vld [vmem:[%s5223_s21 + $0x1ae0] sm:$0xff] }
 0x1b5   : > { %4841 = vmatprep.subr.mxu1 %v1054_v47  ;;  %4807 = vmatpush3.msra.mxu0 %v1006_v48  ;;  %v1105_v44 = vld [vmem:[%s5223_s21 + $0x1b68] sm:$0xff]  ;;  %v1120_v46 = vld [vmem:[%s5223_s21 + $0x1be0] sm:$0xff] }
 0x1b6   : > { %4842 = vmatpush3.msra.mxu1 %v1038_v49  ;;  %4808 = vmatprep.subr.mxu0 %v1021_v50  ;;  %v1072_v47 = vld [vmem:[%s5223_s21 + $0x1a60] sm:$0xff]  ;;  %v1087_v49 = vld [vmem:[%s5223_s21 + $0x1ad8] sm:$0xff] }
 0x1b7   : > { %4843 = vmatprep.subr.mxu1 %v1053_v52  ;;  %4809 = vmatpush3.msra.mxu0 %v1005_v53  ;;  %v1104_v48 = vld [vmem:[%s5223_s21 + $0x1b60] sm:$0xff]  ;;  %v1119_v50 = vld [vmem:[%s5223_s21 + $0x1bd8] sm:$0xff] }
 0x1b8   : > { %4844 = vmatpush3.msra.mxu1 %v1037_v54  ;;  %4810 = vmatprep.subr.mxu0 %v1020_v55  ;;  %v1071_v52 = vld [vmem:[%s5223_s21 + $0x1a58] sm:$0xff]  ;;  %v1086_v54 = vld [vmem:[%s5223_s21 + $0x1ad0] sm:$0xff] }
 0x1b9   : > { %4845 = vmatprep.subr.mxu1 %v1052_v56  ;;  %4811 = vmatpush3.msra.mxu0 %v1004_v57  ;;  %v1103_v53 = vld [vmem:[%s5223_s21 + $0x1b58] sm:$0xff]  ;;  %v1118_v55 = vld [vmem:[%s5223_s21 + $0x1bd0] sm:$0xff] }
 0x1ba   : > { %4846 = vmatpush3.msra.mxu1 %v1036_v58  ;;  %4812 = vmatprep.subr.mxu0 %v1019_v59  ;;  %v1070_v56 = vld [vmem:[%s5223_s21 + $0x1a50] sm:$0xff]  ;;  %v1085_v58 = vld [vmem:[%s5223_s21 + $0x1ac8] sm:$0xff] }
 0x1bb   : > { %4847 = vmatprep.subr.mxu1 %v1051_v60  ;;  %4813 = vmatpush3.msra.mxu0 %v1003_v61  ;;  %v1102_v57 = vld [vmem:[%s5223_s21 + $0x1b50] sm:$0xff]  ;;  %v1117_v59 = vld [vmem:[%s5223_s21 + $0x1bc8] sm:$0xff] }
 0x1bc   : > { %4848 = vmatpush3.msra.mxu1 %v1035_v62  ;;  %4814 = vmatprep.subr.mxu0 %v1018_v63  ;;  %v1069_v60 = vld [vmem:[%s5223_s21 + $0x1a48] sm:$0xff]  ;;  %v1084_v62 = vld [vmem:[%s5223_s21 + $0x1ac0] sm:$0xff] }
 0x1bd   : > { %4849 = vmatprep.subr.mxu1 %v1050_v0  ;;  %4815 = vmatpush3.msra.mxu0 %v1002_v1  ;;  %v1101_v61 = vld [vmem:[%s5223_s21 + $0x1b48] sm:$0xff]  ;;  %v1116_v63 = vld [vmem:[%s5223_s21 + $0x1bc0] sm:$0xff] }
 0x1be   : > { %4850 = vmatpush3.msra.mxu1 %v1034_v2  ;;  %4816 = vmatprep.subr.mxu0 %v1017_v3  ;;  %v1068_v0 = vld [vmem:[%s5223_s21 + $0x1a40] sm:$0xff]  ;;  %v1083_v2 = vld [vmem:[%s5223_s21 + $0x1ab8] sm:$0xff] }
 0x1bf   : > { %4851 = vmatprep.subr.mxu1 %v1049_v4  ;;  %4817 = vmatpush3.msra.mxu0 %v1001_v5  ;;  %v1100_v1 = vld [vmem:[%s5223_s21 + $0x1b40] sm:$0xff]  ;;  %v1115_v3 = vld [vmem:[%s5223_s21 + $0x1bb8] sm:$0xff] }
 0x1c0   : > { %4852 = vmatpush3.msra.mxu1 %v1033_v6  ;;  %4818 = vmatprep.subr.mxu0 %v1016_v8  ;;  %v1067_v4 = vld [vmem:[%s5223_s21 + $0x1a38] sm:$0xff]  ;;  %v1082_v6 = vld [vmem:[%s5223_s21 + $0x1ab0] sm:$0xff] }
 0x1c1   : > { %4853 = vmatprep.subr.mxu1 %v1048_v9  ;;  %4819 = vmatpush3.msra.mxu0 %v1000_v10  ;;  %v1099_v5 = vld [vmem:[%s5223_s21 + $0x1b38] sm:$0xff]  ;;  %v1066_v8 = vld [vmem:[%s5223_s21 + $0x1a30] sm:$0xff]  ;;  %v1081_v10 = vld [vmem:[%s5223_s21 + $0x1aa8] sm:$0xff] }
 0x1c2   : > { %4854 = vmatpush3.msra.mxu1 %v1032_v11  ;;  %4820 = vmatprep.subr.mxu0 %v1015_v12  ;;  %v1098_v9 = vld [vmem:[%s5223_s21 + $0x1b30] sm:$0xff]  ;;  %v1113_v11 = vld [vmem:[%s5223_s21 + $0x1ba8] sm:$0xff] }
 0x1c3   : > { %4855 = vmatprep.subr.mxu1 %v1047_v13  ;;  %4821 = vmatpush3.msra.mxu0 %v999_v15  ;;  %v1065_v12 = vld [vmem:[%s5223_s21 + $0x1a28] sm:$0xff]  ;;  %v1080_v15 = vld [vmem:[%s5223_s21 + $0x1aa0] sm:$0xff] }
 0x1c4   : > { %4856 = vmatpush3.msra.mxu1 %v1031_v16  ;;  %4822 = vmatprep.subr.mxu0 %v1014_v17  ;;  %v1097_v13 = vld [vmem:[%s5223_s21 + $0x1b28] sm:$0xff]  ;;  %v1112_v16 = vld [vmem:[%s5223_s21 + $0x1ba0] sm:$0xff] }
 0x1c5   : > { %4857 = vmatprep.subr.mxu1 %v1046_v18  ;;  %4823 = vmatpush3.msra.mxu0 %v998_v20  ;;  %v1064_v17 = vld [vmem:[%s5223_s21 + $0x1a20] sm:$0xff]  ;;  %v1111_v20 = vld [vmem:[%s5223_s21 + $0x1b98] sm:$0xff] }
 0x1c6   : > { %4858 = vmatpush3.msra.mxu1 %v1030_v21  ;;  %4824 = vmatprep.subr.mxu0 %v1013_v22  ;;  %v1096_v18 = vld [vmem:[%s5223_s21 + $0x1b20] sm:$0xff]  ;;  %v1489_v21 = vcombine.high %v225_v14, %v225_v14  ;;  %v1063_v22 = vld [vmem:[%s5223_s21 + $0x1a18] sm:$0xff] }
 0x1c7   : > { %4859 = vmatprep.subr.mxu1 %v1045_v23  ;;  %4825 = vmatpush3.msra.mxu0 %v997_v25  ;;  %v1095_v23 = vld [vmem:[%s5223_s21 + $0x1b18] sm:$0xff]  ;;  %v1110_v25 = vld [vmem:[%s5223_s21 + $0x1b90] sm:$0xff] }
 0x1c8   : > { %4860 = vmatpush3.msra.mxu1 %v1029_v26  ;;  %4826 = vmatprep.subr.mxu0 %v1012_v27  ;;  %v1496_v26 = vrot.slane %v225_v14, %v5290_v51  ;;  %v1062_v27 = vld [vmem:[%s5223_s21 + $0x1a10] sm:$0xff] }
 0x1c9   : > { %4861 = vmatprep.subr.mxu1 %v1044_v28  ;;  %4827 = vmatpush3.msra.mxu0 %v996_v30  ;;  %v1094_v28 = vld [vmem:[%s5223_s21 + $0x1b10] sm:$0xff]  ;;  %v1109_v30 = vld [vmem:[%s5223_s21 + $0x1b88] sm:$0xff] }
 0x1ca   : > { %3348 = vmatprep.mubr.f32.mxu0 %v1487_v29  ;;  %4862 = vmatpush3.msra.mxu1 %v1028_v31  ;;  %v1077_v29 = vld [vmem:[%s5223_s21 + $0x1a88] sm:$0xff]  ;;  %v1503_v31 = vrot.slane %v1489_v21, %v5290_v51  ;;  %v1178_v14 = vld [vmem:[%s5223_s21 + $0x1db0] sm:$0xff] }
 0x1cb   : > { %3349 = vmatmul.mubr.f32.vlgmr.msra.gmra.mxu0 %v1479_v19  ;;  %3418 = vmatprep.mubr.f32.mxu1 %v1488_v32  ;;  %v1079_v19 = vld [vmem:[%s5223_s21 + $0x1a98] sm:$0xff]  ;;  %v1061_v32 = vld [vmem:[%s5223_s21 + $0x1a08] sm:$0xff]  ;;  %v226_v21 = vld [vmem:[%s5284_s27 + $0x70] sm:$0xff] }
 0x1cc   : > { %4866 = vmatprep.subr.mxu0 %v1091_v33  ;;  %4901 = vmatprep.subr.mxu1 %v1123_v34  ;;  %v1093_v33 = vld [vmem:[%s5223_s21 + $0x1b08] sm:$0xff]  ;;  %v1076_v34 = vld [vmem:[%s5223_s21 + $0x1a80] sm:$0xff] }
 0x1cd   : > { %3419 = vmatmul.mubr.f32.vlgmr.msra.gmra.mxu1 %v1486_v24  ;;  %4867 = vmatpush3.msra.mxu0 %v1075_v35  ;;  %v1078_v24 = vld [vmem:[%s5223_s21 + $0x1a90] sm:$0xff]  ;;  %v1108_v35 = vld [vmem:[%s5223_s21 + $0x1b80] sm:$0xff] }
 0x1ce   : > { %4902 = vmatpush3.msra.mxu1 %v1107_v36  ;;  %4868 = vmatprep.subr.mxu0 %v1090_v37  ;;  %v1504_v36 = vcombine.high %v1496_v26, %v1496_v26  ;;  %v1060_v37 = vld [vmem:[%s5223_s21 + $0x1a00] sm:$0xff] }
 0x1cf   : > { %4903 = vmatprep.subr.mxu1 %v1122_v38  ;;  %4869 = vmatpush3.msra.mxu0 %v1074_v39  ;;  %v1092_v38 = vld [vmem:[%s5223_s21 + $0x1b00] sm:$0xff]  ;;  %v1505_v39 = vcombine.high %v1503_v31, %v1503_v31 }
 0x1d0   : > { %4904 = vmatpush3.msra.mxu1 %v1106_v40  ;;  %4870 = vmatprep.subr.mxu0 %v1089_v41  ;;  %v1155_v40 = vld [vmem:[%s5223_s21 + $0x1cf8] sm:$0xff] }
 0x1d1   : > { %4905 = vmatprep.subr.mxu1 %v1121_v42  ;;  %4871 = vmatpush3.msra.mxu0 %v1073_v43  ;;  %v1187_v41 = vld [vmem:[%s5223_s21 + $0x1df8] sm:$0xff] }
 0x1d2   : > { %4906 = vmatpush3.msra.mxu1 %v1105_v44  ;;  %4872 = vmatprep.subr.mxu0 %v1088_v45  ;;  %v1139_v42 = vld [vmem:[%s5223_s21 + $0x1c78] sm:$0xff]  ;;  %v1154_v44 = vld [vmem:[%s5223_s21 + $0x1cf0] sm:$0xff] }
 0x1d3   : > { %4907 = vmatprep.subr.mxu1 %v1120_v46  ;;  %4873 = vmatpush3.msra.mxu0 %v1072_v47  ;;  %v1171_v43 = vld [vmem:[%s5223_s21 + $0x1d78] sm:$0xff]  ;;  %v1186_v45 = vld [vmem:[%s5223_s21 + $0x1df0] sm:$0xff] }
 0x1d4   : > { %4908 = vmatpush3.msra.mxu1 %v1104_v48  ;;  %4874 = vmatprep.subr.mxu0 %v1087_v49  ;;  %v1138_v46 = vld [vmem:[%s5223_s21 + $0x1c70] sm:$0xff]  ;;  %v1153_v48 = vld [vmem:[%s5223_s21 + $0x1ce8] sm:$0xff] }
 0x1d5   : > { %4909 = vmatprep.subr.mxu1 %v1119_v50  ;;  %4875 = vmatpush3.msra.mxu0 %v1071_v52  ;;  %v1170_v47 = vld [vmem:[%s5223_s21 + $0x1d70] sm:$0xff]  ;;  %v1185_v49 = vld [vmem:[%s5223_s21 + $0x1de8] sm:$0xff] }
 0x1d6   : > { %4910 = vmatpush3.msra.mxu1 %v1103_v53  ;;  %4876 = vmatprep.subr.mxu0 %v1086_v54  ;;  %v1137_v50 = vld [vmem:[%s5223_s21 + $0x1c68] sm:$0xff]  ;;  %v1152_v53 = vld [vmem:[%s5223_s21 + $0x1ce0] sm:$0xff] }
 0x1d7   : > { %4911 = vmatprep.subr.mxu1 %v1118_v55  ;;  %4877 = vmatpush3.msra.mxu0 %v1070_v56  ;;  %v1169_v52 = vld [vmem:[%s5223_s21 + $0x1d68] sm:$0xff]  ;;  %v1184_v54 = vld [vmem:[%s5223_s21 + $0x1de0] sm:$0xff] }
 0x1d8   : > { %4912 = vmatpush3.msra.mxu1 %v1102_v57  ;;  %4878 = vmatprep.subr.mxu0 %v1085_v58  ;;  %v1136_v55 = vld [vmem:[%s5223_s21 + $0x1c60] sm:$0xff]  ;;  %v1151_v57 = vld [vmem:[%s5223_s21 + $0x1cd8] sm:$0xff] }
 0x1d9   : > { %4913 = vmatprep.subr.mxu1 %v1117_v59  ;;  %4879 = vmatpush3.msra.mxu0 %v1069_v60  ;;  %v1168_v56 = vld [vmem:[%s5223_s21 + $0x1d60] sm:$0xff]  ;;  %v1183_v58 = vld [vmem:[%s5223_s21 + $0x1dd8] sm:$0xff] }
 0x1da   : > { %4914 = vmatpush3.msra.mxu1 %v1101_v61  ;;  %4880 = vmatprep.subr.mxu0 %v1084_v62  ;;  %v1135_v59 = vld [vmem:[%s5223_s21 + $0x1c58] sm:$0xff]  ;;  %v1150_v61 = vld [vmem:[%s5223_s21 + $0x1cd0] sm:$0xff] }
 0x1db   : > { %4915 = vmatprep.subr.mxu1 %v1116_v63  ;;  %4881 = vmatpush3.msra.mxu0 %v1068_v0  ;;  %v1167_v60 = vld [vmem:[%s5223_s21 + $0x1d58] sm:$0xff]  ;;  %v1182_v62 = vld [vmem:[%s5223_s21 + $0x1dd0] sm:$0xff] }
 0x1dc   : > { %4916 = vmatpush3.msra.mxu1 %v1100_v1  ;;  %4882 = vmatprep.subr.mxu0 %v1083_v2  ;;  %v1134_v63 = vld [vmem:[%s5223_s21 + $0x1c50] sm:$0xff]  ;;  %v1149_v1 = vld [vmem:[%s5223_s21 + $0x1cc8] sm:$0xff] }
 0x1dd   : > { %4917 = vmatprep.subr.mxu1 %v1115_v3  ;;  %4883 = vmatpush3.msra.mxu0 %v1067_v4  ;;  %v1166_v0 = vld [vmem:[%s5223_s21 + $0x1d50] sm:$0xff]  ;;  %v1181_v2 = vld [vmem:[%s5223_s21 + $0x1dc8] sm:$0xff] }
 0x1de   : > { %4918 = vmatpush3.msra.mxu1 %v1099_v5  ;;  %4884 = vmatprep.subr.mxu0 %v1082_v6  ;;  %v1133_v3 = vld [vmem:[%s5223_s21 + $0x1c48] sm:$0xff]  ;;  %v1148_v5 = vld [vmem:[%s5223_s21 + $0x1cc0] sm:$0xff] }
 0x1df   : > { %4919 = vmatprep.subr.mxu1 %v1114_v7  ;;  %4885 = vmatpush3.msra.mxu0 %v1066_v8  ;;  %v1165_v4 = vld [vmem:[%s5223_s21 + $0x1d48] sm:$0xff]  ;;  %v1180_v6 = vld [vmem:[%s5223_s21 + $0x1dc0] sm:$0xff] }
 0x1e0   : > { %4920 = vmatpush3.msra.mxu1 %v1098_v9  ;;  %4886 = vmatprep.subr.mxu0 %v1081_v10  ;;  %v1132_v7 = vld [vmem:[%s5223_s21 + $0x1c40] sm:$0xff]  ;;  %v1147_v9 = vld [vmem:[%s5223_s21 + $0x1cb8] sm:$0xff] }
 0x1e1   : > { %4921 = vmatprep.subr.mxu1 %v1113_v11  ;;  %4887 = vmatpush3.msra.mxu0 %v1065_v12  ;;  %v1164_v8 = vld [vmem:[%s5223_s21 + $0x1d40] sm:$0xff]  ;;  %v1179_v10 = vld [vmem:[%s5223_s21 + $0x1db8] sm:$0xff] }
 0x1e2   : > { %4922 = vmatpush3.msra.mxu1 %v1097_v13  ;;  %4888 = vmatprep.subr.mxu0 %v1080_v15  ;;  %v1131_v11 = vld [vmem:[%s5223_s21 + $0x1c38] sm:$0xff]  ;;  %v1146_v13 = vld [vmem:[%s5223_s21 + $0x1cb0] sm:$0xff] }
 0x1e3   : > { %4923 = vmatprep.subr.mxu1 %v1112_v16  ;;  %4889 = vmatpush3.msra.mxu0 %v1064_v17  ;;  %v1163_v12 = vld [vmem:[%s5223_s21 + $0x1d38] sm:$0xff]  ;;  %v1130_v15 = vld [vmem:[%s5223_s21 + $0x1c30] sm:$0xff]  ;;  %v1145_v17 = vld [vmem:[%s5223_s21 + $0x1ca8] sm:$0xff] }
 0x1e4   : > { %4924 = vmatpush3.msra.mxu1 %v1096_v18  ;;  %4890 = vmatprep.subr.mxu0 %v1079_v19  ;;  %v1162_v16 = vld [vmem:[%s5223_s21 + $0x1d30] sm:$0xff]  ;;  %v1177_v18 = vld [vmem:[%s5223_s21 + $0x1da8] sm:$0xff] }
 0x1e5   : > { %4925 = vmatprep.subr.mxu1 %v1111_v20  ;;  %4891 = vmatpush3.msra.mxu0 %v1063_v22  ;;  %v1129_v19 = vld [vmem:[%s5223_s21 + $0x1c28] sm:$0xff]  ;;  %v1144_v22 = vld [vmem:[%s5223_s21 + $0x1ca0] sm:$0xff] }
 0x1e6   : > { %4926 = vmatpush3.msra.mxu1 %v1095_v23  ;;  %4892 = vmatprep.subr.mxu0 %v1078_v24  ;;  %v1161_v20 = vld [vmem:[%s5223_s21 + $0x1d28] sm:$0xff]  ;;  %v1176_v23 = vld [vmem:[%s5223_s21 + $0x1da0] sm:$0xff] }
 0x1e7   : > { %4927 = vmatprep.subr.mxu1 %v1110_v25  ;;  %4893 = vmatpush3.msra.mxu0 %v1062_v27  ;;  %v1128_v24 = vld [vmem:[%s5223_s21 + $0x1c20] sm:$0xff]  ;;  %v1175_v27 = vld [vmem:[%s5223_s21 + $0x1d98] sm:$0xff] }
 0x1e8   : > { %4928 = vmatpush3.msra.mxu1 %v1094_v28  ;;  %4894 = vmatprep.subr.mxu0 %v1077_v29  ;;  %v1160_v25 = vld [vmem:[%s5223_s21 + $0x1d20] sm:$0xff]  ;;  %v1506_v28 = vcombine.high %v226_v21, %v226_v21  ;;  %v1127_v29 = vld [vmem:[%s5223_s21 + $0x1c18] sm:$0xff] }
 0x1e9   : > { %4929 = vmatprep.subr.mxu1 %v1109_v30  ;;  %4895 = vmatpush3.msra.mxu0 %v1061_v32  ;;  %v1159_v30 = vld [vmem:[%s5223_s21 + $0x1d18] sm:$0xff]  ;;  %v1174_v32 = vld [vmem:[%s5223_s21 + $0x1d90] sm:$0xff] }
 0x1ea   : > { %4930 = vmatpush3.msra.mxu1 %v1093_v33  ;;  %4896 = vmatprep.subr.mxu0 %v1076_v34  ;;  %v1513_v33 = vrot.slane %v226_v21, %v5290_v51  ;;  %v1126_v34 = vld [vmem:[%s5223_s21 + $0x1c10] sm:$0xff] }
 0x1eb   : > { %4931 = vmatprep.subr.mxu1 %v1108_v35  ;;  %4897 = vmatpush3.msra.mxu0 %v1060_v37  ;;  %v1158_v35 = vld [vmem:[%s5223_s21 + $0x1d10] sm:$0xff]  ;;  %v1173_v37 = vld [vmem:[%s5223_s21 + $0x1d88] sm:$0xff] }
 0x1ec   : > { %3488 = vmatprep.mubr.f32.mxu0 %v1504_v36  ;;  %4932 = vmatpush3.msra.mxu1 %v1092_v38  ;;  %v1141_v36 = vld [vmem:[%s5223_s21 + $0x1c88] sm:$0xff]  ;;  %v1520_v38 = vrot.slane %v1506_v28, %v5290_v51  ;;  %v1242_v21 = vld [vmem:[%s5223_s21 + $0x1fb0] sm:$0xff] }
 0x1ed   : > { %3489 = vmatmul.mubr.f32.vlgmr.msra.gmra.mxu0 %v1496_v26  ;;  %3558 = vmatprep.mubr.f32.mxu1 %v1505_v39  ;;  %v1143_v26 = vld [vmem:[%s5223_s21 + $0x1c98] sm:$0xff]  ;;  %v1125_v39 = vld [vmem:[%s5223_s21 + $0x1c08] sm:$0xff] }
 0x1ee   : > { %4936 = vmatprep.subr.mxu0 %v1155_v40  ;;  %4971 = vmatprep.subr.mxu1 %v1187_v41  ;;  %v1157_v40 = vld [vmem:[%s5223_s21 + $0x1d08] sm:$0xff]  ;;  %v1140_v41 = vld [vmem:[%s5223_s21 + $0x1c80] sm:$0xff] }
 0x1ef   : > { %3559 = vmatmul.mubr.f32.vlgmr.msra.gmra.mxu1 %v1503_v31  ;;  %4937 = vmatpush3.msra.mxu0 %v1139_v42  ;;  %v1142_v31 = vld [vmem:[%s5223_s21 + $0x1c90] sm:$0xff]  ;;  %v1172_v42 = vld [vmem:[%s5223_s21 + $0x1d80] sm:$0xff]  ;;  %v1225_v28 = vld [vmem:[%s5223_s21 + $0x1f28] sm:$0xff] }
 0x1f0   : > { %4972 = vmatpush3.msra.mxu1 %v1171_v43  ;;  %4938 = vmatprep.subr.mxu0 %v1154_v44  ;;  %v1521_v43 = vcombine.high %v1513_v33, %v1513_v33  ;;  %v1124_v44 = vld [vmem:[%s5223_s21 + $0x1c00] sm:$0xff] }
 0x1f1   : > { %4973 = vmatprep.subr.mxu1 %v1186_v45  ;;  %4939 = vmatpush3.msra.mxu0 %v1138_v46  ;;  %v1156_v45 = vld [vmem:[%s5223_s21 + $0x1d00] sm:$0xff]  ;;  %v1522_v46 = vcombine.high %v1520_v38, %v1520_v38 }
 0x1f2   : > { %4974 = vmatpush3.msra.mxu1 %v1170_v47  ;;  %4940 = vmatprep.subr.mxu0 %v1153_v48  ;;  %v1219_v47 = vld [vmem:[%s5223_s21 + $0x1ef8] sm:$0xff] }
 0x1f3   : > { %4975 = vmatprep.subr.mxu1 %v1185_v49  ;;  %4941 = vmatpush3.msra.mxu0 %v1137_v50  ;;  %v1251_v48 = vld [vmem:[%s5223_s21 + $0x1ff8] sm:$0xff] }
 0x1f4   : > { %4976 = vmatpush3.msra.mxu1 %v1169_v52  ;;  %4942 = vmatprep.subr.mxu0 %v1152_v53  ;;  %v1203_v49 = vld [vmem:[%s5223_s21 + $0x1e78] sm:$0xff]  ;;  %v1218_v52 = vld [vmem:[%s5223_s21 + $0x1ef0] sm:$0xff] }
 0x1f5   : > { %4977 = vmatprep.subr.mxu1 %v1184_v54  ;;  %4943 = vmatpush3.msra.mxu0 %v1136_v55  ;;  %v1235_v50 = vld [vmem:[%s5223_s21 + $0x1f78] sm:$0xff]  ;;  %v1250_v53 = vld [vmem:[%s5223_s21 + $0x1ff0] sm:$0xff] }
 0x1f6   : > { %4978 = vmatpush3.msra.mxu1 %v1168_v56  ;;  %4944 = vmatprep.subr.mxu0 %v1151_v57  ;;  %v1202_v54 = vld [vmem:[%s5223_s21 + $0x1e70] sm:$0xff]  ;;  %v1217_v56 = vld [vmem:[%s5223_s21 + $0x1ee8] sm:$0xff] }
 0x1f7   : > { %4979 = vmatprep.subr.mxu1 %v1183_v58  ;;  %4945 = vmatpush3.msra.mxu0 %v1135_v59  ;;  %v1234_v55 = vld [vmem:[%s5223_s21 + $0x1f70] sm:$0xff]  ;;  %v1249_v57 = vld [vmem:[%s5223_s21 + $0x1fe8] sm:$0xff] }
 0x1f8   : > { %4980 = vmatpush3.msra.mxu1 %v1167_v60  ;;  %4946 = vmatprep.subr.mxu0 %v1150_v61  ;;  %v1201_v58 = vld [vmem:[%s5223_s21 + $0x1e68] sm:$0xff]  ;;  %v1216_v60 = vld [vmem:[%s5223_s21 + $0x1ee0] sm:$0xff] }
 0x1f9   : > { %4981 = vmatprep.subr.mxu1 %v1182_v62  ;;  %4947 = vmatpush3.msra.mxu0 %v1134_v63  ;;  %v1233_v59 = vld [vmem:[%s5223_s21 + $0x1f68] sm:$0xff]  ;;  %v1248_v61 = vld [vmem:[%s5223_s21 + $0x1fe0] sm:$0xff] }
 0x1fa   : > { %4982 = vmatpush3.msra.mxu1 %v1166_v0  ;;  %4948 = vmatprep.subr.mxu0 %v1149_v1  ;;  %v1200_v62 = vld [vmem:[%s5223_s21 + $0x1e60] sm:$0xff]  ;;  %v1215_v0 = vld [vmem:[%s5223_s21 + $0x1ed8] sm:$0xff] }
 0x1fb   : > { %4983 = vmatprep.subr.mxu1 %v1181_v2  ;;  %4949 = vmatpush3.msra.mxu0 %v1133_v3  ;;  %v1232_v63 = vld [vmem:[%s5223_s21 + $0x1f60] sm:$0xff]  ;;  %v1247_v1 = vld [vmem:[%s5223_s21 + $0x1fd8] sm:$0xff] }
 0x1fc   : > { %4984 = vmatpush3.msra.mxu1 %v1165_v4  ;;  %4950 = vmatprep.subr.mxu0 %v1148_v5  ;;  %v1199_v2 = vld [vmem:[%s5223_s21 + $0x1e58] sm:$0xff]  ;;  %v1214_v4 = vld [vmem:[%s5223_s21 + $0x1ed0] sm:$0xff] }
 0x1fd   : > { %4985 = vmatprep.subr.mxu1 %v1180_v6  ;;  %4951 = vmatpush3.msra.mxu0 %v1132_v7  ;;  %v1231_v3 = vld [vmem:[%s5223_s21 + $0x1f58] sm:$0xff]  ;;  %v1246_v5 = vld [vmem:[%s5223_s21 + $0x1fd0] sm:$0xff] }
 0x1fe   : > { %4986 = vmatpush3.msra.mxu1 %v1164_v8  ;;  %4952 = vmatprep.subr.mxu0 %v1147_v9  ;;  %v1198_v6 = vld [vmem:[%s5223_s21 + $0x1e50] sm:$0xff]  ;;  %v1213_v8 = vld [vmem:[%s5223_s21 + $0x1ec8] sm:$0xff] }
 0x1ff   : > { %4987 = vmatprep.subr.mxu1 %v1179_v10  ;;  %4953 = vmatpush3.msra.mxu0 %v1131_v11  ;;  %v1230_v7 = vld [vmem:[%s5223_s21 + $0x1f50] sm:$0xff]  ;;  %v1245_v9 = vld [vmem:[%s5223_s21 + $0x1fc8] sm:$0xff] }
 0x200   : > { %4988 = vmatpush3.msra.mxu1 %v1163_v12  ;;  %4954 = vmatprep.subr.mxu0 %v1146_v13  ;;  %v1197_v10 = vld [vmem:[%s5223_s21 + $0x1e48] sm:$0xff]  ;;  %v1212_v12 = vld [vmem:[%s5223_s21 + $0x1ec0] sm:$0xff] }
 0x201   : > { %4989 = vmatprep.subr.mxu1 %v1178_v14  ;;  %4955 = vmatpush3.msra.mxu0 %v1130_v15  ;;  %v1229_v11 = vld [vmem:[%s5223_s21 + $0x1f48] sm:$0xff]  ;;  %v1244_v13 = vld [vmem:[%s5223_s21 + $0x1fc0] sm:$0xff] }
 0x202   : > { %4990 = vmatpush3.msra.mxu1 %v1162_v16  ;;  %4956 = vmatprep.subr.mxu0 %v1145_v17  ;;  %v1196_v14 = vld [vmem:[%s5223_s21 + $0x1e40] sm:$0xff]  ;;  %v1211_v16 = vld [vmem:[%s5223_s21 + $0x1eb8] sm:$0xff] }
 0x203   : > { %4991 = vmatprep.subr.mxu1 %v1177_v18  ;;  %4957 = vmatpush3.msra.mxu0 %v1129_v19  ;;  %v1228_v15 = vld [vmem:[%s5223_s21 + $0x1f40] sm:$0xff]  ;;  %v1243_v17 = vld [vmem:[%s5223_s21 + $0x1fb8] sm:$0xff] }
 0x204   : > { %4992 = vmatpush3.msra.mxu1 %v1161_v20  ;;  %4958 = vmatprep.subr.mxu0 %v1144_v22  ;;  %v1195_v18 = vld [vmem:[%s5223_s21 + $0x1e38] sm:$0xff]  ;;  %v1210_v20 = vld [vmem:[%s5223_s21 + $0x1eb0] sm:$0xff] }
 0x205   : > { %4993 = vmatprep.subr.mxu1 %v1176_v23  ;;  %4959 = vmatpush3.msra.mxu0 %v1128_v24  ;;  %v1227_v19 = vld [vmem:[%s5223_s21 + $0x1f38] sm:$0xff]  ;;  %v1194_v22 = vld [vmem:[%s5223_s21 + $0x1e30] sm:$0xff]  ;;  %v1209_v24 = vld [vmem:[%s5223_s21 + $0x1ea8] sm:$0xff] }
 0x206   : > { %4994 = vmatpush3.msra.mxu1 %v1160_v25  ;;  %4960 = vmatprep.subr.mxu0 %v1143_v26  ;;  %v1226_v23 = vld [vmem:[%s5223_s21 + $0x1f30] sm:$0xff]  ;;  %v1241_v25 = vld [vmem:[%s5223_s21 + $0x1fa8] sm:$0xff]  ;;  %v227_v26 = vld [vmem:[%s5284_s27 + $0x78] sm:$0xff] }
 0x207   : > { %4995 = vmatprep.subr.mxu1 %v1175_v27  ;;  %4961 = vmatpush3.msra.mxu0 %v1127_v29  ;;  %v1193_v27 = vld [vmem:[%s5223_s21 + $0x1e28] sm:$0xff]  ;;  %v1208_v29 = vld [vmem:[%s5223_s21 + $0x1ea0] sm:$0xff] }
 0x208   : > { %4996 = vmatpush3.msra.mxu1 %v1159_v30  ;;  %4962 = vmatprep.subr.mxu0 %v1142_v31  ;;  %v1240_v30 = vld [vmem:[%s5223_s21 + $0x1fa0] sm:$0xff] }
 0x209   : > { %4997 = vmatprep.subr.mxu1 %v1174_v32  ;;  %4963 = vmatpush3.msra.mxu0 %v1126_v34  ;;  %v1192_v31 = vld [vmem:[%s5223_s21 + $0x1e20] sm:$0xff]  ;;  %v1207_v34 = vld [vmem:[%s5223_s21 + $0x1e98] sm:$0xff] }
 0x20a   : > { %4998 = vmatpush3.msra.mxu1 %v1158_v35  ;;  %4964 = vmatprep.subr.mxu0 %v1141_v36  ;;  %v1224_v32 = vld [vmem:[%s5223_s21 + $0x1f20] sm:$0xff]  ;;  %v1239_v35 = vld [vmem:[%s5223_s21 + $0x1f98] sm:$0xff] }
 0x20b   : > { %4999 = vmatprep.subr.mxu1 %v1173_v37  ;;  %4965 = vmatpush3.msra.mxu0 %v1125_v39  ;;  %v1191_v36 = vld [vmem:[%s5223_s21 + $0x1e18] sm:$0xff]  ;;  %v1238_v39 = vld [vmem:[%s5223_s21 + $0x1f90] sm:$0xff] }
 0x20c   : > { %5000 = vmatpush3.msra.mxu1 %v1157_v40  ;;  %4966 = vmatprep.subr.mxu0 %v1140_v41  ;;  %v1223_v37 = vld [vmem:[%s5223_s21 + $0x1f18] sm:$0xff]  ;;  %v1530_v40 = vrot.slane %v227_v26, %v5290_v51  ;;  %v1190_v41 = vld [vmem:[%s5223_s21 + $0x1e10] sm:$0xff] }
 0x20d   : > { %5001 = vmatprep.subr.mxu1 %v1172_v42  ;;  %4967 = vmatpush3.msra.mxu0 %v1124_v44  ;;  %v1222_v42 = vld [vmem:[%s5223_s21 + $0x1f10] sm:$0xff]  ;;  %v1205_v44 = vld [vmem:[%s5223_s21 + $0x1e88] sm:$0xff] }
 0x20e   : > { %3628 = vmatprep.mubr.f32.mxu0 %v1521_v43  ;;  %5002 = vmatpush3.msra.mxu1 %v1156_v45  ;;  %v1237_v45 = vld [vmem:[%s5223_s21 + $0x1f88] sm:$0xff] }
 0x20f   : > { %3629 = vmatmul.mubr.f32.vlgmr.msra.gmra.mxu0 %v1513_v33  ;;  %3698 = vmatprep.mubr.f32.mxu1 %v1522_v46  ;;  %v1523_v33 = vcombine.high %v227_v26, %v227_v26  ;;  %v1189_v46 = vld [vmem:[%s5223_s21 + $0x1e08] sm:$0xff] }
 0x210   : > { %5006 = vmatprep.subr.mxu0 %v1219_v47  ;;  %5041 = vmatprep.subr.mxu1 %v1251_v48  ;;  %v1221_v47 = vld [vmem:[%s5223_s21 + $0x1f08] sm:$0xff]  ;;  %v1204_v48 = vld [vmem:[%s5223_s21 + $0x1e80] sm:$0xff] }
 0x211   : > { %3699 = vmatmul.mubr.f32.vlgmr.msra.gmra.mxu1 %v1520_v38  ;;  %5007 = vmatpush3.msra.mxu0 %v1203_v49  ;;  %v1206_v38 = vld [vmem:[%s5223_s21 + $0x1e90] sm:$0xff]  ;;  %v1537_v43 = vrot.slane %v1523_v33, %v5290_v51  ;;  %v1236_v49 = vld [vmem:[%s5223_s21 + $0x1f80] sm:$0xff] }
 0x212   : > { %5042 = vmatpush3.msra.mxu1 %v1235_v50  ;;  %5008 = vmatprep.subr.mxu0 %v1218_v52  ;;  %v1538_v50 = vcombine.high %v1530_v40, %v1530_v40  ;;  %v1188_v52 = vld [vmem:[%s5223_s21 + $0x1e00] sm:$0xff] }
 0x213   : > { %5043 = vmatprep.subr.mxu1 %v1250_v53  ;;  %5009 = vmatpush3.msra.mxu0 %v1202_v54  ;;  %v1539_v53 = vcombine.high %v1537_v43, %v1537_v43  ;;  %v1220_v51 = vld [vmem:[%s5223_s21 + $0x1f00] sm:$0xff]  ;;  %v3988_v54 = vpop.f32.mrf.mxu0 }
 0x214   : > { %5044 = vmatpush3.msra.mxu1 %v1234_v55  ;;  %5010 = vmatprep.subr.mxu0 %v1217_v56  ;;  %v4023_v55 = vpop.f32.mrf.mxu1 }
 0x215   : > { %5045 = vmatprep.subr.mxu1 %v1249_v57  ;;  %5011 = vmatpush3.msra.mxu0 %v1201_v58  ;;  %v3989_v56 = vpop.f32.mrf.mxu0 }
 0x216   : > { %5046 = vmatpush3.msra.mxu1 %v1233_v59  ;;  %5012 = vmatprep.subr.mxu0 %v1216_v60  ;;  %v4024_v58 = vpop.f32.mrf.mxu1 }
 0x217   : > { %5047 = vmatprep.subr.mxu1 %v1248_v61  ;;  %5013 = vmatpush3.msra.mxu0 %v1200_v62  ;;  %v4058_v57 = vpop.f32.mrf.mxu0  ;;  %v3990_v61 = vadd.f32 %v3989_v56, %v3988_v54  ;;  %v4025_v62 = vadd.f32 %v4024_v58, %v4023_v55 }
 0x218   : > { %5048 = vmatpush3.msra.mxu1 %v1232_v63  ;;  %5014 = vmatprep.subr.mxu0 %v1215_v0  ;;  %v4093_v59 = vpop.f32.mrf.mxu1 }
 0x219   : > { %5049 = vmatprep.subr.mxu1 %v1247_v1  ;;  %5015 = vmatpush3.msra.mxu0 %v1199_v2  ;;  %v4059_v60 = vpop.f32.mrf.mxu0  ;;  %v1741_v2 = vadd.f32 %v4025_v62, %v3990_v61 }
 0x21a   : > { %5050 = vmatpush3.msra.mxu1 %v1231_v3  ;;  %5016 = vmatprep.subr.mxu0 %v1214_v4  ;;  %v4060_v0 = vadd.f32 %v4059_v60, %v4058_v57  ;;  %v4094_v1 = vpop.f32.mrf.mxu1 }
 0x21b   : > { %5051 = vmatprep.subr.mxu1 %v1246_v5  ;;  %5017 = vmatpush3.msra.mxu0 %v1198_v6  ;;  %v4128_v63 = vpop.f32.mrf.mxu0  ;;  %v4095_v6 = vadd.f32 %v4094_v1, %v4093_v59 }
 0x21c   : > { %5052 = vmatpush3.msra.mxu1 %v1230_v7  ;;  %5018 = vmatprep.subr.mxu0 %v1213_v8  ;;  %v4163_v3 = vpop.f32.mrf.mxu1  ;;  %v1811_v5 = vadd.f32 %v4060_v0, %v1741_v2 }
 0x21d   : > { %5053 = vmatprep.subr.mxu1 %v1245_v9  ;;  %5019 = vmatpush3.msra.mxu0 %v1197_v10  ;;  %v4129_v4 = vpop.f32.mrf.mxu0 }
 0x21e   : > { %5054 = vmatpush3.msra.mxu1 %v1229_v11  ;;  %5020 = vmatprep.subr.mxu0 %v1212_v12  ;;  %v4130_v8 = vadd.f32 %v4129_v4, %v4128_v63  ;;  %v4164_v9 = vpop.f32.mrf.mxu1  ;;  %v1881_v10 = vadd.f32 %v4095_v6, %v1811_v5 }
 0x21f   : > { %5055 = vmatprep.subr.mxu1 %v1244_v13  ;;  %5021 = vmatpush3.msra.mxu0 %v1196_v14  ;;  %v4198_v7 = vpop.f32.mrf.mxu0  ;;  %v4165_v14 = vadd.f32 %v4164_v9, %v4163_v3 }
 0x220   : > { %5056 = vmatpush3.msra.mxu1 %v1228_v15  ;;  %5022 = vmatprep.subr.mxu0 %v1211_v16  ;;  %v4233_v11 = vpop.f32.mrf.mxu1  ;;  %v1951_v13 = vadd.f32 %v4130_v8, %v1881_v10 }
 0x221   : > { %5057 = vmatprep.subr.mxu1 %v1243_v17  ;;  %5023 = vmatpush3.msra.mxu0 %v1195_v18  ;;  %v4199_v12 = vpop.f32.mrf.mxu0 }
 0x222   : > { %5058 = vmatpush3.msra.mxu1 %v1227_v19  ;;  %5024 = vmatprep.subr.mxu0 %v1210_v20  ;;  %v4200_v16 = vadd.f32 %v4199_v12, %v4198_v7  ;;  %v4234_v17 = vpop.f32.mrf.mxu1  ;;  %v2021_v18 = vadd.f32 %v4165_v14, %v1951_v13 }
 0x223   : > { %5059 = vmatprep.subr.mxu1 %v1242_v21  ;;  %5025 = vmatpush3.msra.mxu0 %v1194_v22  ;;  %v4268_v15 = vpop.f32.mrf.mxu0  ;;  %v4235_v22 = vadd.f32 %v4234_v17, %v4233_v11 }
 0x224   : > { %5060 = vmatpush3.msra.mxu1 %v1226_v23  ;;  %5026 = vmatprep.subr.mxu0 %v1209_v24  ;;  %v4303_v19 = vpop.f32.mrf.mxu1  ;;  %v2091_v21 = vadd.f32 %v4200_v16, %v2021_v18 }
 0x225   : > { %5061 = vmatprep.subr.mxu1 %v1241_v25  ;;  %5027 = vmatpush3.msra.mxu0 %v1193_v27  ;;  %v4269_v20 = vpop.f32.mrf.mxu0 }
 0x226   : > { %5062 = vmatpush3.msra.mxu1 %v1225_v28  ;;  %5028 = vmatprep.subr.mxu0 %v1208_v29  ;;  %v4270_v24 = vadd.f32 %v4269_v20, %v4268_v15  ;;  %v4304_v25 = vpop.f32.mrf.mxu1  ;;  %v2161_v26 = vadd.f32 %v4235_v22, %v2091_v21 }
 0x227   : > { %5063 = vmatprep.subr.mxu1 %v1240_v30  ;;  %5029 = vmatpush3.msra.mxu0 %v1192_v31  ;;  %v4338_v23 = vpop.f32.mrf.mxu0  ;;  %v4305_v30 = vadd.f32 %v4304_v25, %v4303_v19 }
 0x228   : > { %5064 = vmatpush3.msra.mxu1 %v1224_v32  ;;  %5030 = vmatprep.subr.mxu0 %v1207_v34  ;;  %v4373_v27 = vpop.f32.mrf.mxu1  ;;  %v2231_v29 = vadd.f32 %v4270_v24, %v2161_v26 }
 0x229   : > { %5065 = vmatprep.subr.mxu1 %v1239_v35  ;;  %5031 = vmatpush3.msra.mxu0 %v1191_v36  ;;  %v4339_v28 = vpop.f32.mrf.mxu0 }
 0x22a   : > { %5066 = vmatpush3.msra.mxu1 %v1223_v37  ;;  %5032 = vmatprep.subr.mxu0 %v1206_v38  ;;  %v4340_v32 = vadd.f32 %v4339_v28, %v4338_v23  ;;  %v4374_v33 = vpop.f32.mrf.mxu1  ;;  %v2301_v34 = vadd.f32 %v4305_v30, %v2231_v29 }
 0x22b   : > { %5067 = vmatprep.subr.mxu1 %v1238_v39  ;;  %5033 = vmatpush3.msra.mxu0 %v1190_v41  ;;  %v4408_v31 = vpop.f32.mrf.mxu0  ;;  %v4375_v38 = vadd.f32 %v4374_v33, %v4373_v27 }
 0x22c   : > { %5068 = vmatpush3.msra.mxu1 %v1222_v42  ;;  %5034 = vmatprep.subr.mxu0 %v1205_v44  ;;  %v4443_v35 = vpop.f32.mrf.mxu1  ;;  %v2371_v37 = vadd.f32 %v4340_v32, %v2301_v34 }
 0x22d   : > { %5069 = vmatprep.subr.mxu1 %v1237_v45  ;;  %5035 = vmatpush3.msra.mxu0 %v1189_v46  ;;  %v4409_v36 = vpop.f32.mrf.mxu0 }
 0x22e   : > { %5070 = vmatpush3.msra.mxu1 %v1221_v47  ;;  %5036 = vmatprep.subr.mxu0 %v1204_v48  ;;  %v4444_v41 = vpop.f32.mrf.mxu1  ;;  %v2441_v42 = vadd.f32 %v4375_v38, %v2371_v37 }
 0x22f   : > { %5071 = vmatprep.subr.mxu1 %v1236_v49  ;;  %5037 = vmatpush3.msra.mxu0 %v1188_v52  ;;  %v4478_v39 = vpop.f32.mrf.mxu0  ;;  %v4445_v46 = vadd.f32 %v4444_v41, %v4443_v35 }
 0x230   : > { %3768 = vmatprep.mubr.f32.mxu0 %v1538_v50  ;;  %5072 = vmatpush3.msra.mxu1 %v1220_v51 }
 0x231   : > { %3838 = vmatprep.mubr.f32.mxu1 %v1539_v53  ;;  %3769 = vmatmul.mubr.f32.vlgmr.msra.gmra.mxu0 %v1530_v40  ;;  %v4410_v40 = vadd.f32 %v4409_v36, %v4408_v31  ;;  %v4479_v44 = vpop.f32.mrf.mxu0 }
 0x232   : > { %3839 = vmatmul.mubr.f32.vlgmr.msra.gmra.mxu1 %v1537_v43  ;;  %v4513_v43 = vpop.f32.mrf.mxu1  ;;  %v4480_v48 = vadd.f32 %v4479_v44, %v4478_v39 }
 0x233   : > { %v2511_v45 = vadd.f32 %v4410_v40, %v2441_v42  ;;  %v4548_v47 = vpop.f32.mrf.mxu0 }
 0x234   : > { %v4514_v49 = vpop.f32.mrf.mxu1 }
 0x235   : > { %v2581_v50 = vadd.f32 %v4445_v46, %v2511_v45  ;;  %v4549_v53 = vpop.f32.mrf.mxu0  ;;  %v4515_v54 = vadd.f32 %v4514_v49, %v4513_v43 }
 0x236   : > { %v4583_v52 = vpop.f32.mrf.mxu1  ;;  %v4550_v56 = vadd.f32 %v4549_v53, %v4548_v47 }
 0x237   : > { %v2651_v51 = vadd.f32 %v4480_v48, %v2581_v50  ;;  %v4618_v55 = vpop.f32.mrf.mxu0 }
 0x238   : > { %v4584_v57 = vpop.f32.mrf.mxu1 }
 0x239   : > { %v2721_v58 = vadd.f32 %v4515_v54, %v2651_v51  ;;  %v4619_v60 = vpop.f32.mrf.mxu0  ;;  %v4585_v62 = vadd.f32 %v4584_v57, %v4583_v52 }
 0x23a   : > { %v4653_v59 = vpop.f32.mrf.mxu1  ;;  %v4620_v0 = vadd.f32 %v4619_v60, %v4618_v55 }
 0x23b   : > { %v2791_v61 = vadd.f32 %v4550_v56, %v2721_v58 }
 0x23c   : > { %v4654_v1 = vpop.f32.mrf.mxu1 }
 0x23d   : > { %v2861_v2 = vadd.f32 %v4585_v62, %v2791_v61  ;;  %v4655_v6 = vadd.f32 %v4654_v1, %v4653_v59 }
 0x23f   : > { %v2931_v5 = vadd.f32 %v4620_v0, %v2861_v2 }
 0x241   : > { %v3001_v10 = vadd.f32 %v4655_v6, %v2931_v5 }
 0x247   : > { %v4688_v63 = vpop.f32.mrf.mxu0 }
 0x249   : > { %v4723_v3 = vpop.f32.mrf.mxu1  ;;  %v4689_v4 = vpop.f32.mrf.mxu0 }
 0x24a   : > { %v4690_v8 = vadd.f32 %v4689_v4, %v4688_v63 }
 0x24b   : > { %v4724_v9 = vpop.f32.mrf.mxu1 }
 0x24c   : > { %v3071_v13 = vadd.f32 %v4690_v8, %v3001_v10  ;;  %v4725_v14 = vadd.f32 %v4724_v9, %v4723_v3 }
 0x24e   : > { %v3141_v18 = vadd.f32 %v4725_v14, %v3071_v13 }
 0x269   : > { %v4758_v7 = vpop.f32.mrf.mxu0 }
 0x26b   : > { %v4793_v11 = vpop.f32.mrf.mxu1  ;;  %v4759_v12 = vpop.f32.mrf.mxu0 }
 0x26c   : > { %v4760_v16 = vadd.f32 %v4759_v12, %v4758_v7 }
 0x26d   : > { %v4794_v17 = vpop.f32.mrf.mxu1 }
 0x26e   : > { %v3211_v21 = vadd.f32 %v4760_v16, %v3141_v18  ;;  %v4795_v22 = vadd.f32 %v4794_v17, %v4793_v11 }
 0x270   : > { %v3281_v26 = vadd.f32 %v4795_v22, %v3211_v21 }
 0x28b   : > { %v4828_v15 = vpop.f32.mrf.mxu0 }
 0x28d   : > { %v4863_v19 = vpop.f32.mrf.mxu1  ;;  %v4829_v20 = vpop.f32.mrf.mxu0 }
 0x28e   : > { %v4830_v24 = vadd.f32 %v4829_v20, %v4828_v15 }
 0x28f   : > { %v4864_v25 = vpop.f32.mrf.mxu1 }
 0x290   : > { %v3351_v29 = vadd.f32 %v4830_v24, %v3281_v26  ;;  %v4865_v30 = vadd.f32 %v4864_v25, %v4863_v19 }
 0x292   : > { %v3421_v34 = vadd.f32 %v4865_v30, %v3351_v29 }
 0x2ad   : > { %v4898_v23 = vpop.f32.mrf.mxu0 }
 0x2af   : > { %v4933_v27 = vpop.f32.mrf.mxu1  ;;  %v4899_v28 = vpop.f32.mrf.mxu0 }
 0x2b0   : > { %v4900_v32 = vadd.f32 %v4899_v28, %v4898_v23 }
 0x2b1   : > { %v4934_v33 = vpop.f32.mrf.mxu1 }
 0x2b2   : > { %v3491_v37 = vadd.f32 %v4900_v32, %v3421_v34  ;;  %v4935_v38 = vadd.f32 %v4934_v33, %v4933_v27 }
 0x2b4   : > { %v3561_v41 = vadd.f32 %v4935_v38, %v3491_v37 }
 0x2cf   : > { %v4968_v31 = vpop.f32.mrf.mxu0 }
 0x2d1   : > { %v5003_v35 = vpop.f32.mrf.mxu1  ;;  %v4969_v36 = vpop.f32.mrf.mxu0 }
 0x2d2   : > { %v4970_v39 = vadd.f32 %v4969_v36, %v4968_v31 }
 0x2d3   : > { %v5004_v40 = vpop.f32.mrf.mxu1 }
 0x2d4   : > { %v3631_v42 = vadd.f32 %v4970_v39, %v3561_v41  ;;  %v5005_v43 = vadd.f32 %v5004_v40, %v5003_v35 }
 0x2d6   : > { %v3701_v48 = vadd.f32 %v5005_v43, %v3631_v42 }
 0x2f1   : > { %v5038_v44 = vpop.f32.mrf.mxu0 }
 0x2f2   : > { %v5073_v45 = vpop.f32.mrf.mxu1 }
 0x2f3   : > { %v5039_v46 = vpop.f32.mrf.mxu0 }
 0x2f4   : > { %v5074_v47 = vpop.f32.mrf.mxu1  ;;  %v5040_v49 = vadd.f32 %v5039_v46, %v5038_v44  ;;  %3847 = sbr.rel (%p3949_p6) target bundleno = 765 (0x2fd), region = 36 }
 0x2f5   : > { %v5075_v52 = vadd.f32 %v5074_v47, %v5073_v45 }
 0x2f6   : > { %v3771_v50 = vadd.f32 %v5040_v49, %v3701_v48 }
 0x2f8   : > { %v3841_v53 = vadd.f32 %v5075_v52, %v3771_v50 }
 0x2f9   : > { %v3950_v51 = vld [vmem:[%s6351_s2] ss:$0 sm:$0xff] }
 0x2fa   : > { %v3855_v54 = vadd.f32 %v3950_v51, %v3841_v53 }
 0x2fc   : > { %3856 = vst [vmem:[#allocation2] sm:$0x3] %v3855_v54 }
 0x2fd PF: > { %p3951_p7 = scmp.eq.s32.totalorder %s5166_s12, 0 }
 0x2ff   : > { %3860 = sbr.rel (%p3951_p7) target bundleno = 776 (0x308), region = 40 }
 0x304   : > { %v3861_v55 = vld [vmem:[#allocation2] sm:$0x3] }
 0x305   : > { %v3862_v56 = vadd.f32 %v3861_v55, %v3841_v53 }
 0x307   : > { %3863 = vst [vmem:[#allocation2] sm:$0x3] %v3862_v56 }
 0x308 PF: > { %p6325_p8 = scmp.eq.s32.totalorder %s3941_s15, 3  ;;  %s5177_s4 = smov [#allocation2]  }
 0x309   : > { %s3873_s5 = sshll.u32 %s5177_s4, 4  ;;  %s3874_s5 = int_to_ptr.vmem [resolvable:$true] %s3873_s5 }
 0x30a   : > { %s5124_s6 = scalar_lea.vmem %s3874_s5, 32  ;;  %p5131_p12 = scmp.lt.s32.totalorder %s3874_s5, %s3874_s5 }
 0x30b   : > { %p5125_p9 = scmp.ne.s32.totalorder %s3874_s5, %s5124_s6  ;;  %p5132_p13 = scmp.lt.s32.totalorder %s5124_s6, %s5124_s6 }
 0x30d   : > { %p5126_p10 = pnand %p5125_p9, %p6325_p8  ;;  %p5133_p0 = por %p5132_p13, %p5131_p12 }
 0x30f   : > { %p5127_p11 = pneg %p5126_p10 }
 0x311   : > { %p5134_p1 = pnand %p5133_p0, %p5127_p11 }
 0x313   : > { %5137 = shalt.err (!%p5134_p1)
}
 0x314   : > { %5077 = dma.vmem_to_hbm [thread:$0]  (%p6325_p8), %s3874_s5, 32, %s6352_s3, [#allocation3]  }
 0x315   : > { %5161 = dma.done.wait (%p6325_p8), [#allocation3], 32  }
 0x316   : > { %5163 = vsyncadd (%p6325_p8), [#allocation3], 4294967264 }
 0x317 PF: > { %s14_s14 = sadd.s32 1, %s5174_s14   ;;  %s6355_s12 = smov %s5170_s13 }
 0x318   : > { %p11_p2 = scmp.ge.s32.totalorder %s14_s14, 6   ;;  %s6356_s13 = smov %s6358_s16 }
 0x31a   :  { %13 = sbr.rel (!%p11_p2) target bundleno = 2 (0x2), region = 71 }
 0x31f   :  { %3886 = vsyncpa [#allocation3], 1 }
 0x320   :  { %3888 = vsyncpa [#allocation3 + $0x1], 1 }

</bundles_post_ra>
